<compile_context>
chip_gen: v6e
topology: v6e:2x2x1
jax: 0.10.0
libtpu: 0.0.40
codegen_flags: <defaults>
</compile_context>

<pallas_src>
import jax
import jax.numpy as jnp
from jax.experimental import pallas as pl
from jax.experimental.pallas import tpu as pltpu

KSIZE = 3   # conv kernel size
DIL = 2     # dilation rate
PAD = 2     # spatial padding (== dilation -> output H, W unchanged)


def _dilated_conv_relu_kernel(x_ref, w_ref, b_ref, o_ref, xpad_ref):
    # x_ref:    (B, C_in, H, W)             whole batch, NCHW as-is        (VMEM)
    # w_ref:    (C_out*C_in*K*K,) f32       flat conv weights, scalar read (SMEM)
    # b_ref:    (C_out,) f32                bias, scalar read              (SMEM)
    # o_ref:    (B, C_out, H, W)            output                         (VMEM)
    # xpad_ref: (B, C_in, H+2P, W+2P) f32   zero-padded image scratch      (VMEM)
    B, C_in, H, W = x_ref.shape
    C_out = o_ref.shape[1]
    HP = H + 2 * PAD
    WP = W + 2 * PAD

    # Zero only the four PAD-wide halo strips; the interior is fully overwritten below,
    # so a full-scratch zero fill would be wasted store bandwidth.
    xpad_ref[:, :, :PAD, :] = jnp.zeros((B, C_in, PAD, WP), jnp.float32)
    xpad_ref[:, :, PAD + H:, :] = jnp.zeros((B, C_in, PAD, WP), jnp.float32)
    xpad_ref[:, :, :, :PAD] = jnp.zeros((B, C_in, HP, PAD), jnp.float32)
    xpad_ref[:, :, :, PAD + W:] = jnp.zeros((B, C_in, HP, PAD), jnp.float32)
    xpad_ref[:, :, PAD:PAD + H, PAD:PAD + W] = x_ref[...].astype(jnp.float32)

    # One (B, H, W) f32 accumulator per output channel, pre-seeded with the bias.
    accs = [jnp.full((B, H, W), b_ref[co], dtype=jnp.float32) for co in range(C_out)]

    # Dilated 3x3 conv as unrolled scalar*vector FMAs on the VPU. The shifted slab is
    # extracted once per (ci, ky, kx) and reused by every output channel, so the
    # unaligned-offset loads drop from C_out*C_in*9 to C_in*9.
    for ci in range(C_in):
        for ky in range(KSIZE):
            for kx in range(KSIZE):
                slab = xpad_ref[:, ci, ky * DIL:ky * DIL + H, kx * DIL:kx * DIL + W]
                for co in range(C_out):
                    w = w_ref[((co * C_in + ci) * KSIZE + ky) * KSIZE + kx]
                    accs[co] = accs[co] + w * slab

    for co in range(C_out):
        o_ref[:, co] = jnp.maximum(accs[co], 0.0).astype(o_ref.dtype)


def dilated_conv_relu(x, weight, bias):
    """x: (B, C_in, H, W) NCHW; weight: (C_out, C_in, 3, 3); bias: (C_out,)."""
    B, C_in, H, W = x.shape
    C_out = weight.shape[0]
    assert weight.shape == (C_out, C_in, KSIZE, KSIZE)
    assert bias.shape == (C_out,)

    # Hoisted parameter prep: cast to f32 once and flatten row-major for SMEM scalar
    # indexing inside the kernel (no per-call transpose / astype work in the kernel).
    w_flat = weight.astype(jnp.float32).reshape(-1)
    b_f32 = bias.astype(jnp.float32)

    return pl.pallas_call(
        _dilated_conv_relu_kernel,
        out_shape=jax.ShapeDtypeStruct((B, C_out, H, W), x.dtype),
        grid=(1,),  # whole batch fused into a single step (per-step overhead dominates here)
        in_specs=[
            # Full batch in one VMEM block, NCHW as-is (W on lanes, H on sublanes).
            pl.BlockSpec((B, C_in, H, W), lambda i: (0, 0, 0, 0)),
            # Tiny weight / bias tables live wholly in SMEM for scalar reads.
            pl.BlockSpec(memory_space=pltpu.MemorySpace.SMEM),
            pl.BlockSpec(memory_space=pltpu.MemorySpace.SMEM),
        ],
        out_specs=pl.BlockSpec((B, C_out, H, W), lambda i: (0, 0, 0, 0)),
        scratch_shapes=[
            pltpu.VMEM((B, C_in, H + 2 * PAD, W + 2 * PAD), jnp.float32),
        ],
        compiler_params=pltpu.CompilerParams(
            dimension_semantics=("arbitrary",),  # single step; no cross-core split at this size
        ),
    )(x, w_flat, b_f32)


def reference(x, weight, bias):
    # Pure-JAX reference of the PyTorch forward: dilated conv + bias + ReLU.
    y = jax.lax.conv_general_dilated(
        x, weight,
        window_strides=(1, 1),
        padding=((PAD, PAD), (PAD, PAD)),
        rhs_dilation=(DIL, DIL),
        dimension_numbers=("NCHW", "OIHW", "NCHW"),
    )
    return jax.nn.relu(y + bias[None, :, None, None])


if __name__ == "__main__":
    key = jax.random.PRNGKey(0)
    k_x, k_w, k_b = jax.random.split(key, 3)

    B, C_in, C_out, H, W = 2, 4, 4, 16, 16
    x = jax.random.normal(k_x, (B, C_in, H, W), dtype=jnp.float32)

    # Deterministic init matching Conv2d(C_in, C_out, kernel_size=3, dilation=2, padding=2):
    # weight (C_out, C_in, 3, 3), bias (C_out,), uniform(-1/sqrt(fan_in), 1/sqrt(fan_in)).
    fan_in = C_in * KSIZE * KSIZE
    bound = 1.0 / (fan_in ** 0.5)
    weight = jax.random.uniform(k_w, (C_out, C_in, KSIZE, KSIZE), jnp.float32, -bound, bound)
    bias = jax.random.uniform(k_b, (C_out,), jnp.float32, -bound, bound)

    out = dilated_conv_relu(x, weight, bias)
    out = jax.block_until_ready(out)

    ref = reference(x, weight, bias)
    assert out.shape == (B, C_out, H, W)
    assert jnp.allclose(out, ref, atol=1e-5, rtol=1e-5), "mismatch vs reference"

    print("KERNEL_OK")
</pallas_src>

<mosaic_0001>
module attributes {stable_mosaic.version = 11 : i64} {
  func.func @_dilated_conv_relu_kernel(%arg0: i32, %arg1: memref<2x4x16x16xf32, #tpu.memory_space<vmem>>, %arg2: memref<144xf32, #tpu.memory_space<smem>>, %arg3: memref<4xf32, #tpu.memory_space<smem>>, %arg4: memref<2x4x16x16xf32, #tpu.memory_space<vmem>>, %arg5: memref<2x4x20x20xf32, #tpu.memory_space<vmem>>) attributes {dimension_semantics = [#tpu.dimension_semantics<arbitrary>], iteration_bounds = array<i64: 1>, scalar_prefetch = 0 : i64, scratch_operands = 1 : i64, tpu.core_type = #tpu.core_type<tc>, window_params = [{pipeline_mode = #tpu.pipeline_mode<synchronous>, transform_indices = @transform_0, window_bounds = array<i64: 2, 4, 16, 16>}, {transform_indices = @transform_1, window_bounds = array<i64: 144>}, {transform_indices = @transform_2, window_bounds = array<i64: 4>}, {pipeline_mode = #tpu.pipeline_mode<synchronous>, transform_indices = @transform_3, window_bounds = array<i64: 2, 4, 16, 16>}]} {
    %cst = arith.constant 0.000000e+00 : f32
    %0 = vector.broadcast %cst : f32 to vector<2x4x2x20xf32>
    %c0 = arith.constant 0 : index
    %c0_0 = arith.constant 0 : index
    %c0_1 = arith.constant 0 : index
    %c0_2 = arith.constant 0 : index
    %1 = vector.load %arg5[%c0, %c0_0, %c0_1, %c0_2] : memref<2x4x20x20xf32, #tpu.memory_space<vmem>>, vector<2x4x2x20xf32>
    tpu.vector_store %arg5[%c0, %c0_0, %c0_1, %c0_2], %0 {strides = array<i32>} : memref<2x4x20x20xf32, #tpu.memory_space<vmem>>, vector<2x4x2x20xf32>,
    %cst_3 = arith.constant 0.000000e+00 : f32
    %2 = vector.broadcast %cst_3 : f32 to vector<2x4x2x20xf32>
    %c0_4 = arith.constant 0 : index
    %c0_5 = arith.constant 0 : index
    %c18 = arith.constant 18 : index
    %c0_6 = arith.constant 0 : index
    %3 = vector.load %arg5[%c0_4, %c0_5, %c18, %c0_6] : memref<2x4x20x20xf32, #tpu.memory_space<vmem>>, vector<2x4x2x20xf32>
    tpu.vector_store %arg5[%c0_4, %c0_5, %c18, %c0_6], %2 {strides = array<i32>} : memref<2x4x20x20xf32, #tpu.memory_space<vmem>>, vector<2x4x2x20xf32>,
    %cst_7 = arith.constant 0.000000e+00 : f32
    %4 = vector.broadcast %cst_7 : f32 to vector<2x4x20x2xf32>
    %c0_8 = arith.constant 0 : index
    %c0_9 = arith.constant 0 : index
    %c0_10 = arith.constant 0 : index
    %c0_11 = arith.constant 0 : index
    %5 = vector.load %arg5[%c0_8, %c0_9, %c0_10, %c0_11] : memref<2x4x20x20xf32, #tpu.memory_space<vmem>>, vector<2x4x20x2xf32>
    tpu.vector_store %arg5[%c0_8, %c0_9, %c0_10, %c0_11], %4 {strides = array<i32>} : memref<2x4x20x20xf32, #tpu.memory_space<vmem>>, vector<2x4x20x2xf32>,
    %cst_12 = arith.constant 0.000000e+00 : f32
    %6 = vector.broadcast %cst_12 : f32 to vector<2x4x20x2xf32>
    %c0_13 = arith.constant 0 : index
    %c0_14 = arith.constant 0 : index
    %c0_15 = arith.constant 0 : index
    %c18_16 = arith.constant 18 : index
    %7 = vector.load %arg5[%c0_13, %c0_14, %c0_15, %c18_16] : memref<2x4x20x20xf32, #tpu.memory_space<vmem>>, vector<2x4x20x2xf32>
    tpu.vector_store %arg5[%c0_13, %c0_14, %c0_15, %c18_16], %6 {strides = array<i32>} : memref<2x4x20x20xf32, #tpu.memory_space<vmem>>, vector<2x4x20x2xf32>,
    %c0_17 = arith.constant 0 : index
    %c0_18 = arith.constant 0 : index
    %c0_19 = arith.constant 0 : index
    %c0_20 = arith.constant 0 : index
    %8 = vector.load %arg1[%c0_17, %c0_18, %c0_19, %c0_20] : memref<2x4x16x16xf32, #tpu.memory_space<vmem>>, vector<2x4x16x16xf32>
    %c0_21 = arith.constant 0 : index
    %c0_22 = arith.constant 0 : index
    %c2 = arith.constant 2 : index
    %c2_23 = arith.constant 2 : index
    %9 = vector.load %arg5[%c0_21, %c0_22, %c2, %c2_23] : memref<2x4x20x20xf32, #tpu.memory_space<vmem>>, vector<2x4x16x16xf32>
    tpu.vector_store %arg5[%c0_21, %c0_22, %c2, %c2_23], %8 {strides = array<i32>} : memref<2x4x20x20xf32, #tpu.memory_space<vmem>>, vector<2x4x16x16xf32>,
    %c0_24 = arith.constant 0 : index
    %10 = memref.load %arg3[%c0_24] : memref<4xf32, #tpu.memory_space<smem>>
    %11 = vector.broadcast %10 : f32 to vector<2x16x16xf32>
    %c1 = arith.constant 1 : index
    %12 = memref.load %arg3[%c1] : memref<4xf32, #tpu.memory_space<smem>>
    %13 = vector.broadcast %12 : f32 to vector<2x16x16xf32>
    %c2_25 = arith.constant 2 : index
    %14 = memref.load %arg3[%c2_25] : memref<4xf32, #tpu.memory_space<smem>>
    %15 = vector.broadcast %14 : f32 to vector<2x16x16xf32>
    %c3 = arith.constant 3 : index
    %16 = memref.load %arg3[%c3] : memref<4xf32, #tpu.memory_space<smem>>
    %17 = vector.broadcast %16 : f32 to vector<2x16x16xf32>
    %c0_26 = arith.constant 0 : index
    %c0_27 = arith.constant 0 : index
    %c0_28 = arith.constant 0 : index
    %c0_29 = arith.constant 0 : index
    %18 = vector.load %arg5[%c0_26, %c0_27, %c0_28, %c0_29] : memref<2x4x20x20xf32, #tpu.memory_space<vmem>>, vector<2x1x16x16xf32>
    %19 = vector.shape_cast %18 : vector<2x1x16x16xf32> to vector<2x16x16xf32>
    %c0_30 = arith.constant 0 : index
    %20 = memref.load %arg2[%c0_30] : memref<144xf32, #tpu.memory_space<smem>>
    %21 = vector.broadcast %20 : f32 to vector<2x16x16xf32>
    %22 = arith.mulf %21, %19 : vector<2x16x16xf32>
    %23 = arith.addf %11, %22 : vector<2x16x16xf32>
    %c36 = arith.constant 36 : index
    %24 = memref.load %arg2[%c36] : memref<144xf32, #tpu.memory_space<smem>>
    %25 = vector.broadcast %24 : f32 to vector<2x16x16xf32>
    %26 = arith.mulf %25, %19 : vector<2x16x16xf32>
    %27 = arith.addf %13, %26 : vector<2x16x16xf32>
    %c72 = arith.constant 72 : index
    %28 = memref.load %arg2[%c72] : memref<144xf32, #tpu.memory_space<smem>>
    %29 = vector.broadcast %28 : f32 to vector<2x16x16xf32>
    %30 = arith.mulf %29, %19 : vector<2x16x16xf32>
    %31 = arith.addf %15, %30 : vector<2x16x16xf32>
    %c108 = arith.constant 108 : index
    %32 = memref.load %arg2[%c108] : memref<144xf32, #tpu.memory_space<smem>>
    %33 = vector.broadcast %32 : f32 to vector<2x16x16xf32>
    %34 = arith.mulf %33, %19 : vector<2x16x16xf32>
    %35 = arith.addf %17, %34 : vector<2x16x16xf32>
    %c0_31 = arith.constant 0 : index
    %c0_32 = arith.constant 0 : index
    %c0_33 = arith.constant 0 : index
    %c2_34 = arith.constant 2 : index
    %36 = vector.load %arg5[%c0_31, %c0_32, %c0_33, %c2_34] : memref<2x4x20x20xf32, #tpu.memory_space<vmem>>, vector<2x1x16x16xf32>
    %37 = vector.shape_cast %36 : vector<2x1x16x16xf32> to vector<2x16x16xf32>
    %c1_35 = arith.constant 1 : index
    %38 = memref.load %arg2[%c1_35] : memref<144xf32, #tpu.memory_space<smem>>
    %39 = vector.broadcast %38 : f32 to vector<2x16x16xf32>
    %40 = arith.mulf %39, %37 : vector<2x16x16xf32>
    %41 = arith.addf %23, %40 : vector<2x16x16xf32>
    %c37 = arith.constant 37 : index
    %42 = memref.load %arg2[%c37] : memref<144xf32, #tpu.memory_space<smem>>
    %43 = vector.broadcast %42 : f32 to vector<2x16x16xf32>
    %44 = arith.mulf %43, %37 : vector<2x16x16xf32>
    %45 = arith.addf %27, %44 : vector<2x16x16xf32>
    %c73 = arith.constant 73 : index
    %46 = memref.load %arg2[%c73] : memref<144xf32, #tpu.memory_space<smem>>
    %47 = vector.broadcast %46 : f32 to vector<2x16x16xf32>
    %48 = arith.mulf %47, %37 : vector<2x16x16xf32>
    %49 = arith.addf %31, %48 : vector<2x16x16xf32>
    %c109 = arith.constant 109 : index
    %50 = memref.load %arg2[%c109] : memref<144xf32, #tpu.memory_space<smem>>
    %51 = vector.broadcast %50 : f32 to vector<2x16x16xf32>
    %52 = arith.mulf %51, %37 : vector<2x16x16xf32>
    %53 = arith.addf %35, %52 : vector<2x16x16xf32>
    %c0_36 = arith.constant 0 : index
    %c0_37 = arith.constant 0 : index
    %c0_38 = arith.constant 0 : index
    %c4 = arith.constant 4 : index
    %54 = vector.load %arg5[%c0_36, %c0_37, %c0_38, %c4] : memref<2x4x20x20xf32, #tpu.memory_space<vmem>>, vector<2x1x16x16xf32>
    %55 = vector.shape_cast %54 : vector<2x1x16x16xf32> to vector<2x16x16xf32>
    %c2_39 = arith.constant 2 : index
    %56 = memref.load %arg2[%c2_39] : memref<144xf32, #tpu.memory_space<smem>>
    %57 = vector.broadcast %56 : f32 to vector<2x16x16xf32>
    %58 = arith.mulf %57, %55 : vector<2x16x16xf32>
    %59 = arith.addf %41, %58 : vector<2x16x16xf32>
    %c38 = arith.constant 38 : index
    %60 = memref.load %arg2[%c38] : memref<144xf32, #tpu.memory_space<smem>>
    %61 = vector.broadcast %60 : f32 to vector<2x16x16xf32>
    %62 = arith.mulf %61, %55 : vector<2x16x16xf32>
    %63 = arith.addf %45, %62 : vector<2x16x16xf32>
    %c74 = arith.constant 74 : index
    %64 = memref.load %arg2[%c74] : memref<144xf32, #tpu.memory_space<smem>>
    %65 = vector.broadcast %64 : f32 to vector<2x16x16xf32>
    %66 = arith.mulf %65, %55 : vector<2x16x16xf32>
    %67 = arith.addf %49, %66 : vector<2x16x16xf32>
    %c110 = arith.constant 110 : index
    %68 = memref.load %arg2[%c110] : memref<144xf32, #tpu.memory_space<smem>>
    %69 = vector.broadcast %68 : f32 to vector<2x16x16xf32>
    %70 = arith.mulf %69, %55 : vector<2x16x16xf32>
    %71 = arith.addf %53, %70 : vector<2x16x16xf32>
    %c0_40 = arith.constant 0 : index
    %c0_41 = arith.constant 0 : index
    %c2_42 = arith.constant 2 : index
    %c0_43 = arith.constant 0 : index
    %72 = vector.load %arg5[%c0_40, %c0_41, %c2_42, %c0_43] : memref<2x4x20x20xf32, #tpu.memory_space<vmem>>, vector<2x1x16x16xf32>
    %73 = vector.shape_cast %72 : vector<2x1x16x16xf32> to vector<2x16x16xf32>
    %c3_44 = arith.constant 3 : index
    %74 = memref.load %arg2[%c3_44] : memref<144xf32, #tpu.memory_space<smem>>
    %75 = vector.broadcast %74 : f32 to vector<2x16x16xf32>
    %76 = arith.mulf %75, %73 : vector<2x16x16xf32>
    %77 = arith.addf %59, %76 : vector<2x16x16xf32>
    %c39 = arith.constant 39 : index
    %78 = memref.load %arg2[%c39] : memref<144xf32, #tpu.memory_space<smem>>
    %79 = vector.broadcast %78 : f32 to vector<2x16x16xf32>
    %80 = arith.mulf %79, %73 : vector<2x16x16xf32>
    %81 = arith.addf %63, %80 : vector<2x16x16xf32>
    %c75 = arith.constant 75 : index
    %82 = memref.load %arg2[%c75] : memref<144xf32, #tpu.memory_space<smem>>
    %83 = vector.broadcast %82 : f32 to vector<2x16x16xf32>
    %84 = arith.mulf %83, %73 : vector<2x16x16xf32>
    %85 = arith.addf %67, %84 : vector<2x16x16xf32>
    %c111 = arith.constant 111 : index
    %86 = memref.load %arg2[%c111] : memref<144xf32, #tpu.memory_space<smem>>
    %87 = vector.broadcast %86 : f32 to vector<2x16x16xf32>
    %88 = arith.mulf %87, %73 : vector<2x16x16xf32>
    %89 = arith.addf %71, %88 : vector<2x16x16xf32>
    %c0_45 = arith.constant 0 : index
    %c0_46 = arith.constant 0 : index
    %c2_47 = arith.constant 2 : index
    %c2_48 = arith.constant 2 : index
    %90 = vector.load %arg5[%c0_45, %c0_46, %c2_47, %c2_48] : memref<2x4x20x20xf32, #tpu.memory_space<vmem>>, vector<2x1x16x16xf32>
    %91 = vector.shape_cast %90 : vector<2x1x16x16xf32> to vector<2x16x16xf32>
    %c4_49 = arith.constant 4 : index
    %92 = memref.load %arg2[%c4_49] : memref<144xf32, #tpu.memory_space<smem>>
    %93 = vector.broadcast %92 : f32 to vector<2x16x16xf32>
    %94 = arith.mulf %93, %91 : vector<2x16x16xf32>
    %95 = arith.addf %77, %94 : vector<2x16x16xf32>
    %c40 = arith.constant 40 : index
    %96 = memref.load %arg2[%c40] : memref<144xf32, #tpu.memory_space<smem>>
    %97 = vector.broadcast %96 : f32 to vector<2x16x16xf32>
    %98 = arith.mulf %97, %91 : vector<2x16x16xf32>
    %99 = arith.addf %81, %98 : vector<2x16x16xf32>
    %c76 = arith.constant 76 : index
    %100 = memref.load %arg2[%c76] : memref<144xf32, #tpu.memory_space<smem>>
    %101 = vector.broadcast %100 : f32 to vector<2x16x16xf32>
    %102 = arith.mulf %101, %91 : vector<2x16x16xf32>
    %103 = arith.addf %85, %102 : vector<2x16x16xf32>
    %c112 = arith.constant 112 : index
    %104 = memref.load %arg2[%c112] : memref<144xf32, #tpu.memory_space<smem>>
    %105 = vector.broadcast %104 : f32 to vector<2x16x16xf32>
    %106 = arith.mulf %105, %91 : vector<2x16x16xf32>
    %107 = arith.addf %89, %106 : vector<2x16x16xf32>
    %c0_50 = arith.constant 0 : index
    %c0_51 = arith.constant 0 : index
    %c2_52 = arith.constant 2 : index
    %c4_53 = arith.constant 4 : index
    %108 = vector.load %arg5[%c0_50, %c0_51, %c2_52, %c4_53] : memref<2x4x20x20xf32, #tpu.memory_space<vmem>>, vector<2x1x16x16xf32>
    %109 = vector.shape_cast %108 : vector<2x1x16x16xf32> to vector<2x16x16xf32>
    %c5 = arith.constant 5 : index
    %110 = memref.load %arg2[%c5] : memref<144xf32, #tpu.memory_space<smem>>
    %111 = vector.broadcast %110 : f32 to vector<2x16x16xf32>
    %112 = arith.mulf %111, %109 : vector<2x16x16xf32>
    %113 = arith.addf %95, %112 : vector<2x16x16xf32>
    %c41 = arith.constant 41 : index
    %114 = memref.load %arg2[%c41] : memref<144xf32, #tpu.memory_space<smem>>
    %115 = vector.broadcast %114 : f32 to vector<2x16x16xf32>
    %116 = arith.mulf %115, %109 : vector<2x16x16xf32>
    %117 = arith.addf %99, %116 : vector<2x16x16xf32>
    %c77 = arith.constant 77 : index
    %118 = memref.load %arg2[%c77] : memref<144xf32, #tpu.memory_space<smem>>
    %119 = vector.broadcast %118 : f32 to vector<2x16x16xf32>
    %120 = arith.mulf %119, %109 : vector<2x16x16xf32>
    %121 = arith.addf %103, %120 : vector<2x16x16xf32>
    %c113 = arith.constant 113 : index
    %122 = memref.load %arg2[%c113] : memref<144xf32, #tpu.memory_space<smem>>
    %123 = vector.broadcast %122 : f32 to vector<2x16x16xf32>
    %124 = arith.mulf %123, %109 : vector<2x16x16xf32>
    %125 = arith.addf %107, %124 : vector<2x16x16xf32>
    %c0_54 = arith.constant 0 : index
    %c0_55 = arith.constant 0 : index
    %c4_56 = arith.constant 4 : index
    %c0_57 = arith.constant 0 : index
    %126 = vector.load %arg5[%c0_54, %c0_55, %c4_56, %c0_57] : memref<2x4x20x20xf32, #tpu.memory_space<vmem>>, vector<2x1x16x16xf32>
    %127 = vector.shape_cast %126 : vector<2x1x16x16xf32> to vector<2x16x16xf32>
    %c6 = arith.constant 6 : index
    %128 = memref.load %arg2[%c6] : memref<144xf32, #tpu.memory_space<smem>>
    %129 = vector.broadcast %128 : f32 to vector<2x16x16xf32>
    %130 = arith.mulf %129, %127 : vector<2x16x16xf32>
    %131 = arith.addf %113, %130 : vector<2x16x16xf32>
    %c42 = arith.constant 42 : index
    %132 = memref.load %arg2[%c42] : memref<144xf32, #tpu.memory_space<smem>>
    %133 = vector.broadcast %132 : f32 to vector<2x16x16xf32>
    %134 = arith.mulf %133, %127 : vector<2x16x16xf32>
    %135 = arith.addf %117, %134 : vector<2x16x16xf32>
    %c78 = arith.constant 78 : index
    %136 = memref.load %arg2[%c78] : memref<144xf32, #tpu.memory_space<smem>>
    %137 = vector.broadcast %136 : f32 to vector<2x16x16xf32>
    %138 = arith.mulf %137, %127 : vector<2x16x16xf32>
    %139 = arith.addf %121, %138 : vector<2x16x16xf32>
    %c114 = arith.constant 114 : index
    %140 = memref.load %arg2[%c114] : memref<144xf32, #tpu.memory_space<smem>>
    %141 = vector.broadcast %140 : f32 to vector<2x16x16xf32>
    %142 = arith.mulf %141, %127 : vector<2x16x16xf32>
    %143 = arith.addf %125, %142 : vector<2x16x16xf32>
    %c0_58 = arith.constant 0 : index
    %c0_59 = arith.constant 0 : index
    %c4_60 = arith.constant 4 : index
    %c2_61 = arith.constant 2 : index
    %144 = vector.load %arg5[%c0_58, %c0_59, %c4_60, %c2_61] : memref<2x4x20x20xf32, #tpu.memory_space<vmem>>, vector<2x1x16x16xf32>
    %145 = vector.shape_cast %144 : vector<2x1x16x16xf32> to vector<2x16x16xf32>
    %c7 = arith.constant 7 : index
    %146 = memref.load %arg2[%c7] : memref<144xf32, #tpu.memory_space<smem>>
    %147 = vector.broadcast %146 : f32 to vector<2x16x16xf32>
    %148 = arith.mulf %147, %145 : vector<2x16x16xf32>
    %149 = arith.addf %131, %148 : vector<2x16x16xf32>
    %c43 = arith.constant 43 : index
    %150 = memref.load %arg2[%c43] : memref<144xf32, #tpu.memory_space<smem>>
    %151 = vector.broadcast %150 : f32 to vector<2x16x16xf32>
    %152 = arith.mulf %151, %145 : vector<2x16x16xf32>
    %153 = arith.addf %135, %152 : vector<2x16x16xf32>
    %c79 = arith.constant 79 : index
    %154 = memref.load %arg2[%c79] : memref<144xf32, #tpu.memory_space<smem>>
    %155 = vector.broadcast %154 : f32 to vector<2x16x16xf32>
    %156 = arith.mulf %155, %145 : vector<2x16x16xf32>
    %157 = arith.addf %139, %156 : vector<2x16x16xf32>
    %c115 = arith.constant 115 : index
    %158 = memref.load %arg2[%c115] : memref<144xf32, #tpu.memory_space<smem>>
    %159 = vector.broadcast %158 : f32 to vector<2x16x16xf32>
    %160 = arith.mulf %159, %145 : vector<2x16x16xf32>
    %161 = arith.addf %143, %160 : vector<2x16x16xf32>
    %c0_62 = arith.constant 0 : index
    %c0_63 = arith.constant 0 : index
    %c4_64 = arith.constant 4 : index
    %c4_65 = arith.constant 4 : index
    %162 = vector.load %arg5[%c0_62, %c0_63, %c4_64, %c4_65] : memref<2x4x20x20xf32, #tpu.memory_space<vmem>>, vector<2x1x16x16xf32>
    %163 = vector.shape_cast %162 : vector<2x1x16x16xf32> to vector<2x16x16xf32>
    %c8 = arith.constant 8 : index
    %164 = memref.load %arg2[%c8] : memref<144xf32, #tpu.memory_space<smem>>
    %165 = vector.broadcast %164 : f32 to vector<2x16x16xf32>
    %166 = arith.mulf %165, %163 : vector<2x16x16xf32>
    %167 = arith.addf %149, %166 : vector<2x16x16xf32>
    %c44 = arith.constant 44 : index
    %168 = memref.load %arg2[%c44] : memref<144xf32, #tpu.memory_space<smem>>
    %169 = vector.broadcast %168 : f32 to vector<2x16x16xf32>
    %170 = arith.mulf %169, %163 : vector<2x16x16xf32>
    %171 = arith.addf %153, %170 : vector<2x16x16xf32>
    %c80 = arith.constant 80 : index
    %172 = memref.load %arg2[%c80] : memref<144xf32, #tpu.memory_space<smem>>
    %173 = vector.broadcast %172 : f32 to vector<2x16x16xf32>
    %174 = arith.mulf %173, %163 : vector<2x16x16xf32>
    %175 = arith.addf %157, %174 : vector<2x16x16xf32>
    %c116 = arith.constant 116 : index
    %176 = memref.load %arg2[%c116] : memref<144xf32, #tpu.memory_space<smem>>
    %177 = vector.broadcast %176 : f32 to vector<2x16x16xf32>
    %178 = arith.mulf %177, %163 : vector<2x16x16xf32>
    %179 = arith.addf %161, %178 : vector<2x16x16xf32>
    %c0_66 = arith.constant 0 : index
    %c1_67 = arith.constant 1 : index
    %c0_68 = arith.constant 0 : index
    %c0_69 = arith.constant 0 : index
    %180 = vector.load %arg5[%c0_66, %c1_67, %c0_68, %c0_69] : memref<2x4x20x20xf32, #tpu.memory_space<vmem>>, vector<2x1x16x16xf32>
    %181 = vector.shape_cast %180 : vector<2x1x16x16xf32> to vector<2x16x16xf32>
    %c9 = arith.constant 9 : index
    %182 = memref.load %arg2[%c9] : memref<144xf32, #tpu.memory_space<smem>>
    %183 = vector.broadcast %182 : f32 to vector<2x16x16xf32>
    %184 = arith.mulf %183, %181 : vector<2x16x16xf32>
    %185 = arith.addf %167, %184 : vector<2x16x16xf32>
    %c45 = arith.constant 45 : index
    %186 = memref.load %arg2[%c45] : memref<144xf32, #tpu.memory_space<smem>>
    %187 = vector.broadcast %186 : f32 to vector<2x16x16xf32>
    %188 = arith.mulf %187, %181 : vector<2x16x16xf32>
    %189 = arith.addf %171, %188 : vector<2x16x16xf32>
    %c81 = arith.constant 81 : index
    %190 = memref.load %arg2[%c81] : memref<144xf32, #tpu.memory_space<smem>>
    %191 = vector.broadcast %190 : f32 to vector<2x16x16xf32>
    %192 = arith.mulf %191, %181 : vector<2x16x16xf32>
    %193 = arith.addf %175, %192 : vector<2x16x16xf32>
    %c117 = arith.constant 117 : index
    %194 = memref.load %arg2[%c117] : memref<144xf32, #tpu.memory_space<smem>>
    %195 = vector.broadcast %194 : f32 to vector<2x16x16xf32>
    %196 = arith.mulf %195, %181 : vector<2x16x16xf32>
    %197 = arith.addf %179, %196 : vector<2x16x16xf32>
    %c0_70 = arith.constant 0 : index
    %c1_71 = arith.constant 1 : index
    %c0_72 = arith.constant 0 : index
    %c2_73 = arith.constant 2 : index
    %198 = vector.load %arg5[%c0_70, %c1_71, %c0_72, %c2_73] : memref<2x4x20x20xf32, #tpu.memory_space<vmem>>, vector<2x1x16x16xf32>
    %199 = vector.shape_cast %198 : vector<2x1x16x16xf32> to vector<2x16x16xf32>
    %c10 = arith.constant 10 : index
    %200 = memref.load %arg2[%c10] : memref<144xf32, #tpu.memory_space<smem>>
    %201 = vector.broadcast %200 : f32 to vector<2x16x16xf32>
    %202 = arith.mulf %201, %199 : vector<2x16x16xf32>
    %203 = arith.addf %185, %202 : vector<2x16x16xf32>
    %c46 = arith.constant 46 : index
    %204 = memref.load %arg2[%c46] : memref<144xf32, #tpu.memory_space<smem>>
    %205 = vector.broadcast %204 : f32 to vector<2x16x16xf32>
    %206 = arith.mulf %205, %199 : vector<2x16x16xf32>
    %207 = arith.addf %189, %206 : vector<2x16x16xf32>
    %c82 = arith.constant 82 : index
    %208 = memref.load %arg2[%c82] : memref<144xf32, #tpu.memory_space<smem>>
    %209 = vector.broadcast %208 : f32 to vector<2x16x16xf32>
    %210 = arith.mulf %209, %199 : vector<2x16x16xf32>
    %211 = arith.addf %193, %210 : vector<2x16x16xf32>
    %c118 = arith.constant 118 : index
    %212 = memref.load %arg2[%c118] : memref<144xf32, #tpu.memory_space<smem>>
    %213 = vector.broadcast %212 : f32 to vector<2x16x16xf32>
    %214 = arith.mulf %213, %199 : vector<2x16x16xf32>
    %215 = arith.addf %197, %214 : vector<2x16x16xf32>
    %c0_74 = arith.constant 0 : index
    %c1_75 = arith.constant 1 : index
    %c0_76 = arith.constant 0 : index
    %c4_77 = arith.constant 4 : index
    %216 = vector.load %arg5[%c0_74, %c1_75, %c0_76, %c4_77] : memref<2x4x20x20xf32, #tpu.memory_space<vmem>>, vector<2x1x16x16xf32>
    %217 = vector.shape_cast %216 : vector<2x1x16x16xf32> to vector<2x16x16xf32>
    %c11 = arith.constant 11 : index
    %218 = memref.load %arg2[%c11] : memref<144xf32, #tpu.memory_space<smem>>
    %219 = vector.broadcast %218 : f32 to vector<2x16x16xf32>
    %220 = arith.mulf %219, %217 : vector<2x16x16xf32>
    %221 = arith.addf %203, %220 : vector<2x16x16xf32>
    %c47 = arith.constant 47 : index
    %222 = memref.load %arg2[%c47] : memref<144xf32, #tpu.memory_space<smem>>
    %223 = vector.broadcast %222 : f32 to vector<2x16x16xf32>
    %224 = arith.mulf %223, %217 : vector<2x16x16xf32>
    %225 = arith.addf %207, %224 : vector<2x16x16xf32>
    %c83 = arith.constant 83 : index
    %226 = memref.load %arg2[%c83] : memref<144xf32, #tpu.memory_space<smem>>
    %227 = vector.broadcast %226 : f32 to vector<2x16x16xf32>
    %228 = arith.mulf %227, %217 : vector<2x16x16xf32>
    %229 = arith.addf %211, %228 : vector<2x16x16xf32>
    %c119 = arith.constant 119 : index
    %230 = memref.load %arg2[%c119] : memref<144xf32, #tpu.memory_space<smem>>
    %231 = vector.broadcast %230 : f32 to vector<2x16x16xf32>
    %232 = arith.mulf %231, %217 : vector<2x16x16xf32>
    %233 = arith.addf %215, %232 : vector<2x16x16xf32>
    %c0_78 = arith.constant 0 : index
    %c1_79 = arith.constant 1 : index
    %c2_80 = arith.constant 2 : index
    %c0_81 = arith.constant 0 : index
    %234 = vector.load %arg5[%c0_78, %c1_79, %c2_80, %c0_81] : memref<2x4x20x20xf32, #tpu.memory_space<vmem>>, vector<2x1x16x16xf32>
    %235 = vector.shape_cast %234 : vector<2x1x16x16xf32> to vector<2x16x16xf32>
    %c12 = arith.constant 12 : index
    %236 = memref.load %arg2[%c12] : memref<144xf32, #tpu.memory_space<smem>>
    %237 = vector.broadcast %236 : f32 to vector<2x16x16xf32>
    %238 = arith.mulf %237, %235 : vector<2x16x16xf32>
    %239 = arith.addf %221, %238 : vector<2x16x16xf32>
    %c48 = arith.constant 48 : index
    %240 = memref.load %arg2[%c48] : memref<144xf32, #tpu.memory_space<smem>>
    %241 = vector.broadcast %240 : f32 to vector<2x16x16xf32>
    %242 = arith.mulf %241, %235 : vector<2x16x16xf32>
    %243 = arith.addf %225, %242 : vector<2x16x16xf32>
    %c84 = arith.constant 84 : index
    %244 = memref.load %arg2[%c84] : memref<144xf32, #tpu.memory_space<smem>>
    %245 = vector.broadcast %244 : f32 to vector<2x16x16xf32>
    %246 = arith.mulf %245, %235 : vector<2x16x16xf32>
    %247 = arith.addf %229, %246 : vector<2x16x16xf32>
    %c120 = arith.constant 120 : index
    %248 = memref.load %arg2[%c120] : memref<144xf32, #tpu.memory_space<smem>>
    %249 = vector.broadcast %248 : f32 to vector<2x16x16xf32>
    %250 = arith.mulf %249, %235 : vector<2x16x16xf32>
    %251 = arith.addf %233, %250 : vector<2x16x16xf32>
    %c0_82 = arith.constant 0 : index
    %c1_83 = arith.constant 1 : index
    %c2_84 = arith.constant 2 : index
    %c2_85 = arith.constant 2 : index
    %252 = vector.load %arg5[%c0_82, %c1_83, %c2_84, %c2_85] : memref<2x4x20x20xf32, #tpu.memory_space<vmem>>, vector<2x1x16x16xf32>
    %253 = vector.shape_cast %252 : vector<2x1x16x16xf32> to vector<2x16x16xf32>
    %c13 = arith.constant 13 : index
    %254 = memref.load %arg2[%c13] : memref<144xf32, #tpu.memory_space<smem>>
    %255 = vector.broadcast %254 : f32 to vector<2x16x16xf32>
    %256 = arith.mulf %255, %253 : vector<2x16x16xf32>
    %257 = arith.addf %239, %256 : vector<2x16x16xf32>
    %c49 = arith.constant 49 : index
    %258 = memref.load %arg2[%c49] : memref<144xf32, #tpu.memory_space<smem>>
    %259 = vector.broadcast %258 : f32 to vector<2x16x16xf32>
    %260 = arith.mulf %259, %253 : vector<2x16x16xf32>
    %261 = arith.addf %243, %260 : vector<2x16x16xf32>
    %c85 = arith.constant 85 : index
    %262 = memref.load %arg2[%c85] : memref<144xf32, #tpu.memory_space<smem>>
    %263 = vector.broadcast %262 : f32 to vector<2x16x16xf32>
    %264 = arith.mulf %263, %253 : vector<2x16x16xf32>
    %265 = arith.addf %247, %264 : vector<2x16x16xf32>
    %c121 = arith.constant 121 : index
    %266 = memref.load %arg2[%c121] : memref<144xf32, #tpu.memory_space<smem>>
    %267 = vector.broadcast %266 : f32 to vector<2x16x16xf32>
    %268 = arith.mulf %267, %253 : vector<2x16x16xf32>
    %269 = arith.addf %251, %268 : vector<2x16x16xf32>
    %c0_86 = arith.constant 0 : index
    %c1_87 = arith.constant 1 : index
    %c2_88 = arith.constant 2 : index
    %c4_89 = arith.constant 4 : index
    %270 = vector.load %arg5[%c0_86, %c1_87, %c2_88, %c4_89] : memref<2x4x20x20xf32, #tpu.memory_space<vmem>>, vector<2x1x16x16xf32>
    %271 = vector.shape_cast %270 : vector<2x1x16x16xf32> to vector<2x16x16xf32>
    %c14 = arith.constant 14 : index
    %272 = memref.load %arg2[%c14] : memref<144xf32, #tpu.memory_space<smem>>
    %273 = vector.broadcast %272 : f32 to vector<2x16x16xf32>
    %274 = arith.mulf %273, %271 : vector<2x16x16xf32>
    %275 = arith.addf %257, %274 : vector<2x16x16xf32>
    %c50 = arith.constant 50 : index
    %276 = memref.load %arg2[%c50] : memref<144xf32, #tpu.memory_space<smem>>
    %277 = vector.broadcast %276 : f32 to vector<2x16x16xf32>
    %278 = arith.mulf %277, %271 : vector<2x16x16xf32>
    %279 = arith.addf %261, %278 : vector<2x16x16xf32>
    %c86 = arith.constant 86 : index
    %280 = memref.load %arg2[%c86] : memref<144xf32, #tpu.memory_space<smem>>
    %281 = vector.broadcast %280 : f32 to vector<2x16x16xf32>
    %282 = arith.mulf %281, %271 : vector<2x16x16xf32>
    %283 = arith.addf %265, %282 : vector<2x16x16xf32>
    %c122 = arith.constant 122 : index
    %284 = memref.load %arg2[%c122] : memref<144xf32, #tpu.memory_space<smem>>
    %285 = vector.broadcast %284 : f32 to vector<2x16x16xf32>
    %286 = arith.mulf %285, %271 : vector<2x16x16xf32>
    %287 = arith.addf %269, %286 : vector<2x16x16xf32>
    %c0_90 = arith.constant 0 : index
    %c1_91 = arith.constant 1 : index
    %c4_92 = arith.constant 4 : index
    %c0_93 = arith.constant 0 : index
    %288 = vector.load %arg5[%c0_90, %c1_91, %c4_92, %c0_93] : memref<2x4x20x20xf32, #tpu.memory_space<vmem>>, vector<2x1x16x16xf32>
    %289 = vector.shape_cast %288 : vector<2x1x16x16xf32> to vector<2x16x16xf32>
    %c15 = arith.constant 15 : index
    %290 = memref.load %arg2[%c15] : memref<144xf32, #tpu.memory_space<smem>>
    %291 = vector.broadcast %290 : f32 to vector<2x16x16xf32>
    %292 = arith.mulf %291, %289 : vector<2x16x16xf32>
    %293 = arith.addf %275, %292 : vector<2x16x16xf32>
    %c51 = arith.constant 51 : index
    %294 = memref.load %arg2[%c51] : memref<144xf32, #tpu.memory_space<smem>>
    %295 = vector.broadcast %294 : f32 to vector<2x16x16xf32>
    %296 = arith.mulf %295, %289 : vector<2x16x16xf32>
    %297 = arith.addf %279, %296 : vector<2x16x16xf32>
    %c87 = arith.constant 87 : index
    %298 = memref.load %arg2[%c87] : memref<144xf32, #tpu.memory_space<smem>>
    %299 = vector.broadcast %298 : f32 to vector<2x16x16xf32>
    %300 = arith.mulf %299, %289 : vector<2x16x16xf32>
    %301 = arith.addf %283, %300 : vector<2x16x16xf32>
    %c123 = arith.constant 123 : index
    %302 = memref.load %arg2[%c123] : memref<144xf32, #tpu.memory_space<smem>>
    %303 = vector.broadcast %302 : f32 to vector<2x16x16xf32>
    %304 = arith.mulf %303, %289 : vector<2x16x16xf32>
    %305 = arith.addf %287, %304 : vector<2x16x16xf32>
    %c0_94 = arith.constant 0 : index
    %c1_95 = arith.constant 1 : index
    %c4_96 = arith.constant 4 : index
    %c2_97 = arith.constant 2 : index
    %306 = vector.load %arg5[%c0_94, %c1_95, %c4_96, %c2_97] : memref<2x4x20x20xf32, #tpu.memory_space<vmem>>, vector<2x1x16x16xf32>
    %307 = vector.shape_cast %306 : vector<2x1x16x16xf32> to vector<2x16x16xf32>
    %c16 = arith.constant 16 : index
    %308 = memref.load %arg2[%c16] : memref<144xf32, #tpu.memory_space<smem>>
    %309 = vector.broadcast %308 : f32 to vector<2x16x16xf32>
    %310 = arith.mulf %309, %307 : vector<2x16x16xf32>
    %311 = arith.addf %293, %310 : vector<2x16x16xf32>
    %c52 = arith.constant 52 : index
    %312 = memref.load %arg2[%c52] : memref<144xf32, #tpu.memory_space<smem>>
    %313 = vector.broadcast %312 : f32 to vector<2x16x16xf32>
    %314 = arith.mulf %313, %307 : vector<2x16x16xf32>
    %315 = arith.addf %297, %314 : vector<2x16x16xf32>
    %c88 = arith.constant 88 : index
    %316 = memref.load %arg2[%c88] : memref<144xf32, #tpu.memory_space<smem>>
    %317 = vector.broadcast %316 : f32 to vector<2x16x16xf32>
    %318 = arith.mulf %317, %307 : vector<2x16x16xf32>
    %319 = arith.addf %301, %318 : vector<2x16x16xf32>
    %c124 = arith.constant 124 : index
    %320 = memref.load %arg2[%c124] : memref<144xf32, #tpu.memory_space<smem>>
    %321 = vector.broadcast %320 : f32 to vector<2x16x16xf32>
    %322 = arith.mulf %321, %307 : vector<2x16x16xf32>
    %323 = arith.addf %305, %322 : vector<2x16x16xf32>
    %c0_98 = arith.constant 0 : index
    %c1_99 = arith.constant 1 : index
    %c4_100 = arith.constant 4 : index
    %c4_101 = arith.constant 4 : index
    %324 = vector.load %arg5[%c0_98, %c1_99, %c4_100, %c4_101] : memref<2x4x20x20xf32, #tpu.memory_space<vmem>>, vector<2x1x16x16xf32>
    %325 = vector.shape_cast %324 : vector<2x1x16x16xf32> to vector<2x16x16xf32>
    %c17 = arith.constant 17 : index
    %326 = memref.load %arg2[%c17] : memref<144xf32, #tpu.memory_space<smem>>
    %327 = vector.broadcast %326 : f32 to vector<2x16x16xf32>
    %328 = arith.mulf %327, %325 : vector<2x16x16xf32>
    %329 = arith.addf %311, %328 : vector<2x16x16xf32>
    %c53 = arith.constant 53 : index
    %330 = memref.load %arg2[%c53] : memref<144xf32, #tpu.memory_space<smem>>
    %331 = vector.broadcast %330 : f32 to vector<2x16x16xf32>
    %332 = arith.mulf %331, %325 : vector<2x16x16xf32>
    %333 = arith.addf %315, %332 : vector<2x16x16xf32>
    %c89 = arith.constant 89 : index
    %334 = memref.load %arg2[%c89] : memref<144xf32, #tpu.memory_space<smem>>
    %335 = vector.broadcast %334 : f32 to vector<2x16x16xf32>
    %336 = arith.mulf %335, %325 : vector<2x16x16xf32>
    %337 = arith.addf %319, %336 : vector<2x16x16xf32>
    %c125 = arith.constant 125 : index
    %338 = memref.load %arg2[%c125] : memref<144xf32, #tpu.memory_space<smem>>
    %339 = vector.broadcast %338 : f32 to vector<2x16x16xf32>
    %340 = arith.mulf %339, %325 : vector<2x16x16xf32>
    %341 = arith.addf %323, %340 : vector<2x16x16xf32>
    %c0_102 = arith.constant 0 : index
    %c2_103 = arith.constant 2 : index
    %c0_104 = arith.constant 0 : index
    %c0_105 = arith.constant 0 : index
    %342 = vector.load %arg5[%c0_102, %c2_103, %c0_104, %c0_105] : memref<2x4x20x20xf32, #tpu.memory_space<vmem>>, vector<2x1x16x16xf32>
    %343 = vector.shape_cast %342 : vector<2x1x16x16xf32> to vector<2x16x16xf32>
    %c18_106 = arith.constant 18 : index
    %344 = memref.load %arg2[%c18_106] : memref<144xf32, #tpu.memory_space<smem>>
    %345 = vector.broadcast %344 : f32 to vector<2x16x16xf32>
    %346 = arith.mulf %345, %343 : vector<2x16x16xf32>
    %347 = arith.addf %329, %346 : vector<2x16x16xf32>
    %c54 = arith.constant 54 : index
    %348 = memref.load %arg2[%c54] : memref<144xf32, #tpu.memory_space<smem>>
    %349 = vector.broadcast %348 : f32 to vector<2x16x16xf32>
    %350 = arith.mulf %349, %343 : vector<2x16x16xf32>
    %351 = arith.addf %333, %350 : vector<2x16x16xf32>
    %c90 = arith.constant 90 : index
    %352 = memref.load %arg2[%c90] : memref<144xf32, #tpu.memory_space<smem>>
    %353 = vector.broadcast %352 : f32 to vector<2x16x16xf32>
    %354 = arith.mulf %353, %343 : vector<2x16x16xf32>
    %355 = arith.addf %337, %354 : vector<2x16x16xf32>
    %c126 = arith.constant 126 : index
    %356 = memref.load %arg2[%c126] : memref<144xf32, #tpu.memory_space<smem>>
    %357 = vector.broadcast %356 : f32 to vector<2x16x16xf32>
    %358 = arith.mulf %357, %343 : vector<2x16x16xf32>
    %359 = arith.addf %341, %358 : vector<2x16x16xf32>
    %c0_107 = arith.constant 0 : index
    %c2_108 = arith.constant 2 : index
    %c0_109 = arith.constant 0 : index
    %c2_110 = arith.constant 2 : index
    %360 = vector.load %arg5[%c0_107, %c2_108, %c0_109, %c2_110] : memref<2x4x20x20xf32, #tpu.memory_space<vmem>>, vector<2x1x16x16xf32>
    %361 = vector.shape_cast %360 : vector<2x1x16x16xf32> to vector<2x16x16xf32>
    %c19 = arith.constant 19 : index
    %362 = memref.load %arg2[%c19] : memref<144xf32, #tpu.memory_space<smem>>
    %363 = vector.broadcast %362 : f32 to vector<2x16x16xf32>
    %364 = arith.mulf %363, %361 : vector<2x16x16xf32>
    %365 = arith.addf %347, %364 : vector<2x16x16xf32>
    %c55 = arith.constant 55 : index
    %366 = memref.load %arg2[%c55] : memref<144xf32, #tpu.memory_space<smem>>
    %367 = vector.broadcast %366 : f32 to vector<2x16x16xf32>
    %368 = arith.mulf %367, %361 : vector<2x16x16xf32>
    %369 = arith.addf %351, %368 : vector<2x16x16xf32>
    %c91 = arith.constant 91 : index
    %370 = memref.load %arg2[%c91] : memref<144xf32, #tpu.memory_space<smem>>
    %371 = vector.broadcast %370 : f32 to vector<2x16x16xf32>
    %372 = arith.mulf %371, %361 : vector<2x16x16xf32>
    %373 = arith.addf %355, %372 : vector<2x16x16xf32>
    %c127 = arith.constant 127 : index
    %374 = memref.load %arg2[%c127] : memref<144xf32, #tpu.memory_space<smem>>
    %375 = vector.broadcast %374 : f32 to vector<2x16x16xf32>
    %376 = arith.mulf %375, %361 : vector<2x16x16xf32>
    %377 = arith.addf %359, %376 : vector<2x16x16xf32>
    %c0_111 = arith.constant 0 : index
    %c2_112 = arith.constant 2 : index
    %c0_113 = arith.constant 0 : index
    %c4_114 = arith.constant 4 : index
    %378 = vector.load %arg5[%c0_111, %c2_112, %c0_113, %c4_114] : memref<2x4x20x20xf32, #tpu.memory_space<vmem>>, vector<2x1x16x16xf32>
    %379 = vector.shape_cast %378 : vector<2x1x16x16xf32> to vector<2x16x16xf32>
    %c20 = arith.constant 20 : index
    %380 = memref.load %arg2[%c20] : memref<144xf32, #tpu.memory_space<smem>>
    %381 = vector.broadcast %380 : f32 to vector<2x16x16xf32>
    %382 = arith.mulf %381, %379 : vector<2x16x16xf32>
    %383 = arith.addf %365, %382 : vector<2x16x16xf32>
    %c56 = arith.constant 56 : index
    %384 = memref.load %arg2[%c56] : memref<144xf32, #tpu.memory_space<smem>>
    %385 = vector.broadcast %384 : f32 to vector<2x16x16xf32>
    %386 = arith.mulf %385, %379 : vector<2x16x16xf32>
    %387 = arith.addf %369, %386 : vector<2x16x16xf32>
    %c92 = arith.constant 92 : index
    %388 = memref.load %arg2[%c92] : memref<144xf32, #tpu.memory_space<smem>>
    %389 = vector.broadcast %388 : f32 to vector<2x16x16xf32>
    %390 = arith.mulf %389, %379 : vector<2x16x16xf32>
    %391 = arith.addf %373, %390 : vector<2x16x16xf32>
    %c128 = arith.constant 128 : index
    %392 = memref.load %arg2[%c128] : memref<144xf32, #tpu.memory_space<smem>>
    %393 = vector.broadcast %392 : f32 to vector<2x16x16xf32>
    %394 = arith.mulf %393, %379 : vector<2x16x16xf32>
    %395 = arith.addf %377, %394 : vector<2x16x16xf32>
    %c0_115 = arith.constant 0 : index
    %c2_116 = arith.constant 2 : index
    %c2_117 = arith.constant 2 : index
    %c0_118 = arith.constant 0 : index
    %396 = vector.load %arg5[%c0_115, %c2_116, %c2_117, %c0_118] : memref<2x4x20x20xf32, #tpu.memory_space<vmem>>, vector<2x1x16x16xf32>
    %397 = vector.shape_cast %396 : vector<2x1x16x16xf32> to vector<2x16x16xf32>
    %c21 = arith.constant 21 : index
    %398 = memref.load %arg2[%c21] : memref<144xf32, #tpu.memory_space<smem>>
    %399 = vector.broadcast %398 : f32 to vector<2x16x16xf32>
    %400 = arith.mulf %399, %397 : vector<2x16x16xf32>
    %401 = arith.addf %383, %400 : vector<2x16x16xf32>
    %c57 = arith.constant 57 : index
    %402 = memref.load %arg2[%c57] : memref<144xf32, #tpu.memory_space<smem>>
    %403 = vector.broadcast %402 : f32 to vector<2x16x16xf32>
    %404 = arith.mulf %403, %397 : vector<2x16x16xf32>
    %405 = arith.addf %387, %404 : vector<2x16x16xf32>
    %c93 = arith.constant 93 : index
    %406 = memref.load %arg2[%c93] : memref<144xf32, #tpu.memory_space<smem>>
    %407 = vector.broadcast %406 : f32 to vector<2x16x16xf32>
    %408 = arith.mulf %407, %397 : vector<2x16x16xf32>
    %409 = arith.addf %391, %408 : vector<2x16x16xf32>
    %c129 = arith.constant 129 : index
    %410 = memref.load %arg2[%c129] : memref<144xf32, #tpu.memory_space<smem>>
    %411 = vector.broadcast %410 : f32 to vector<2x16x16xf32>
    %412 = arith.mulf %411, %397 : vector<2x16x16xf32>
    %413 = arith.addf %395, %412 : vector<2x16x16xf32>
    %c0_119 = arith.constant 0 : index
    %c2_120 = arith.constant 2 : index
    %c2_121 = arith.constant 2 : index
    %c2_122 = arith.constant 2 : index
    %414 = vector.load %arg5[%c0_119, %c2_120, %c2_121, %c2_122] : memref<2x4x20x20xf32, #tpu.memory_space<vmem>>, vector<2x1x16x16xf32>
    %415 = vector.shape_cast %414 : vector<2x1x16x16xf32> to vector<2x16x16xf32>
    %c22 = arith.constant 22 : index
    %416 = memref.load %arg2[%c22] : memref<144xf32, #tpu.memory_space<smem>>
    %417 = vector.broadcast %416 : f32 to vector<2x16x16xf32>
    %418 = arith.mulf %417, %415 : vector<2x16x16xf32>
    %419 = arith.addf %401, %418 : vector<2x16x16xf32>
    %c58 = arith.constant 58 : index
    %420 = memref.load %arg2[%c58] : memref<144xf32, #tpu.memory_space<smem>>
    %421 = vector.broadcast %420 : f32 to vector<2x16x16xf32>
    %422 = arith.mulf %421, %415 : vector<2x16x16xf32>
    %423 = arith.addf %405, %422 : vector<2x16x16xf32>
    %c94 = arith.constant 94 : index
    %424 = memref.load %arg2[%c94] : memref<144xf32, #tpu.memory_space<smem>>
    %425 = vector.broadcast %424 : f32 to vector<2x16x16xf32>
    %426 = arith.mulf %425, %415 : vector<2x16x16xf32>
    %427 = arith.addf %409, %426 : vector<2x16x16xf32>
    %c130 = arith.constant 130 : index
    %428 = memref.load %arg2[%c130] : memref<144xf32, #tpu.memory_space<smem>>
    %429 = vector.broadcast %428 : f32 to vector<2x16x16xf32>
    %430 = arith.mulf %429, %415 : vector<2x16x16xf32>
    %431 = arith.addf %413, %430 : vector<2x16x16xf32>
    %c0_123 = arith.constant 0 : index
    %c2_124 = arith.constant 2 : index
    %c2_125 = arith.constant 2 : index
    %c4_126 = arith.constant 4 : index
    %432 = vector.load %arg5[%c0_123, %c2_124, %c2_125, %c4_126] : memref<2x4x20x20xf32, #tpu.memory_space<vmem>>, vector<2x1x16x16xf32>
    %433 = vector.shape_cast %432 : vector<2x1x16x16xf32> to vector<2x16x16xf32>
    %c23 = arith.constant 23 : index
    %434 = memref.load %arg2[%c23] : memref<144xf32, #tpu.memory_space<smem>>
    %435 = vector.broadcast %434 : f32 to vector<2x16x16xf32>
    %436 = arith.mulf %435, %433 : vector<2x16x16xf32>
    %437 = arith.addf %419, %436 : vector<2x16x16xf32>
    %c59 = arith.constant 59 : index
    %438 = memref.load %arg2[%c59] : memref<144xf32, #tpu.memory_space<smem>>
    %439 = vector.broadcast %438 : f32 to vector<2x16x16xf32>
    %440 = arith.mulf %439, %433 : vector<2x16x16xf32>
    %441 = arith.addf %423, %440 : vector<2x16x16xf32>
    %c95 = arith.constant 95 : index
    %442 = memref.load %arg2[%c95] : memref<144xf32, #tpu.memory_space<smem>>
    %443 = vector.broadcast %442 : f32 to vector<2x16x16xf32>
    %444 = arith.mulf %443, %433 : vector<2x16x16xf32>
    %445 = arith.addf %427, %444 : vector<2x16x16xf32>
    %c131 = arith.constant 131 : index
    %446 = memref.load %arg2[%c131] : memref<144xf32, #tpu.memory_space<smem>>
    %447 = vector.broadcast %446 : f32 to vector<2x16x16xf32>
    %448 = arith.mulf %447, %433 : vector<2x16x16xf32>
    %449 = arith.addf %431, %448 : vector<2x16x16xf32>
    %c0_127 = arith.constant 0 : index
    %c2_128 = arith.constant 2 : index
    %c4_129 = arith.constant 4 : index
    %c0_130 = arith.constant 0 : index
    %450 = vector.load %arg5[%c0_127, %c2_128, %c4_129, %c0_130] : memref<2x4x20x20xf32, #tpu.memory_space<vmem>>, vector<2x1x16x16xf32>
    %451 = vector.shape_cast %450 : vector<2x1x16x16xf32> to vector<2x16x16xf32>
    %c24 = arith.constant 24 : index
    %452 = memref.load %arg2[%c24] : memref<144xf32, #tpu.memory_space<smem>>
    %453 = vector.broadcast %452 : f32 to vector<2x16x16xf32>
    %454 = arith.mulf %453, %451 : vector<2x16x16xf32>
    %455 = arith.addf %437, %454 : vector<2x16x16xf32>
    %c60 = arith.constant 60 : index
    %456 = memref.load %arg2[%c60] : memref<144xf32, #tpu.memory_space<smem>>
    %457 = vector.broadcast %456 : f32 to vector<2x16x16xf32>
    %458 = arith.mulf %457, %451 : vector<2x16x16xf32>
    %459 = arith.addf %441, %458 : vector<2x16x16xf32>
    %c96 = arith.constant 96 : index
    %460 = memref.load %arg2[%c96] : memref<144xf32, #tpu.memory_space<smem>>
    %461 = vector.broadcast %460 : f32 to vector<2x16x16xf32>
    %462 = arith.mulf %461, %451 : vector<2x16x16xf32>
    %463 = arith.addf %445, %462 : vector<2x16x16xf32>
    %c132 = arith.constant 132 : index
    %464 = memref.load %arg2[%c132] : memref<144xf32, #tpu.memory_space<smem>>
    %465 = vector.broadcast %464 : f32 to vector<2x16x16xf32>
    %466 = arith.mulf %465, %451 : vector<2x16x16xf32>
    %467 = arith.addf %449, %466 : vector<2x16x16xf32>
    %c0_131 = arith.constant 0 : index
    %c2_132 = arith.constant 2 : index
    %c4_133 = arith.constant 4 : index
    %c2_134 = arith.constant 2 : index
    %468 = vector.load %arg5[%c0_131, %c2_132, %c4_133, %c2_134] : memref<2x4x20x20xf32, #tpu.memory_space<vmem>>, vector<2x1x16x16xf32>
    %469 = vector.shape_cast %468 : vector<2x1x16x16xf32> to vector<2x16x16xf32>
    %c25 = arith.constant 25 : index
    %470 = memref.load %arg2[%c25] : memref<144xf32, #tpu.memory_space<smem>>
    %471 = vector.broadcast %470 : f32 to vector<2x16x16xf32>
    %472 = arith.mulf %471, %469 : vector<2x16x16xf32>
    %473 = arith.addf %455, %472 : vector<2x16x16xf32>
    %c61 = arith.constant 61 : index
    %474 = memref.load %arg2[%c61] : memref<144xf32, #tpu.memory_space<smem>>
    %475 = vector.broadcast %474 : f32 to vector<2x16x16xf32>
    %476 = arith.mulf %475, %469 : vector<2x16x16xf32>
    %477 = arith.addf %459, %476 : vector<2x16x16xf32>
    %c97 = arith.constant 97 : index
    %478 = memref.load %arg2[%c97] : memref<144xf32, #tpu.memory_space<smem>>
    %479 = vector.broadcast %478 : f32 to vector<2x16x16xf32>
    %480 = arith.mulf %479, %469 : vector<2x16x16xf32>
    %481 = arith.addf %463, %480 : vector<2x16x16xf32>
    %c133 = arith.constant 133 : index
    %482 = memref.load %arg2[%c133] : memref<144xf32, #tpu.memory_space<smem>>
    %483 = vector.broadcast %482 : f32 to vector<2x16x16xf32>
    %484 = arith.mulf %483, %469 : vector<2x16x16xf32>
    %485 = arith.addf %467, %484 : vector<2x16x16xf32>
    %c0_135 = arith.constant 0 : index
    %c2_136 = arith.constant 2 : index
    %c4_137 = arith.constant 4 : index
    %c4_138 = arith.constant 4 : index
    %486 = vector.load %arg5[%c0_135, %c2_136, %c4_137, %c4_138] : memref<2x4x20x20xf32, #tpu.memory_space<vmem>>, vector<2x1x16x16xf32>
    %487 = vector.shape_cast %486 : vector<2x1x16x16xf32> to vector<2x16x16xf32>
    %c26 = arith.constant 26 : index
    %488 = memref.load %arg2[%c26] : memref<144xf32, #tpu.memory_space<smem>>
    %489 = vector.broadcast %488 : f32 to vector<2x16x16xf32>
    %490 = arith.mulf %489, %487 : vector<2x16x16xf32>
    %491 = arith.addf %473, %490 : vector<2x16x16xf32>
    %c62 = arith.constant 62 : index
    %492 = memref.load %arg2[%c62] : memref<144xf32, #tpu.memory_space<smem>>
    %493 = vector.broadcast %492 : f32 to vector<2x16x16xf32>
    %494 = arith.mulf %493, %487 : vector<2x16x16xf32>
    %495 = arith.addf %477, %494 : vector<2x16x16xf32>
    %c98 = arith.constant 98 : index
    %496 = memref.load %arg2[%c98] : memref<144xf32, #tpu.memory_space<smem>>
    %497 = vector.broadcast %496 : f32 to vector<2x16x16xf32>
    %498 = arith.mulf %497, %487 : vector<2x16x16xf32>
    %499 = arith.addf %481, %498 : vector<2x16x16xf32>
    %c134 = arith.constant 134 : index
    %500 = memref.load %arg2[%c134] : memref<144xf32, #tpu.memory_space<smem>>
    %501 = vector.broadcast %500 : f32 to vector<2x16x16xf32>
    %502 = arith.mulf %501, %487 : vector<2x16x16xf32>
    %503 = arith.addf %485, %502 : vector<2x16x16xf32>
    %c0_139 = arith.constant 0 : index
    %c3_140 = arith.constant 3 : index
    %c0_141 = arith.constant 0 : index
    %c0_142 = arith.constant 0 : index
    %504 = vector.load %arg5[%c0_139, %c3_140, %c0_141, %c0_142] : memref<2x4x20x20xf32, #tpu.memory_space<vmem>>, vector<2x1x16x16xf32>
    %505 = vector.shape_cast %504 : vector<2x1x16x16xf32> to vector<2x16x16xf32>
    %c27 = arith.constant 27 : index
    %506 = memref.load %arg2[%c27] : memref<144xf32, #tpu.memory_space<smem>>
    %507 = vector.broadcast %506 : f32 to vector<2x16x16xf32>
    %508 = arith.mulf %507, %505 : vector<2x16x16xf32>
    %509 = arith.addf %491, %508 : vector<2x16x16xf32>
    %c63 = arith.constant 63 : index
    %510 = memref.load %arg2[%c63] : memref<144xf32, #tpu.memory_space<smem>>
    %511 = vector.broadcast %510 : f32 to vector<2x16x16xf32>
    %512 = arith.mulf %511, %505 : vector<2x16x16xf32>
    %513 = arith.addf %495, %512 : vector<2x16x16xf32>
    %c99 = arith.constant 99 : index
    %514 = memref.load %arg2[%c99] : memref<144xf32, #tpu.memory_space<smem>>
    %515 = vector.broadcast %514 : f32 to vector<2x16x16xf32>
    %516 = arith.mulf %515, %505 : vector<2x16x16xf32>
    %517 = arith.addf %499, %516 : vector<2x16x16xf32>
    %c135 = arith.constant 135 : index
    %518 = memref.load %arg2[%c135] : memref<144xf32, #tpu.memory_space<smem>>
    %519 = vector.broadcast %518 : f32 to vector<2x16x16xf32>
    %520 = arith.mulf %519, %505 : vector<2x16x16xf32>
    %521 = arith.addf %503, %520 : vector<2x16x16xf32>
    %c0_143 = arith.constant 0 : index
    %c3_144 = arith.constant 3 : index
    %c0_145 = arith.constant 0 : index
    %c2_146 = arith.constant 2 : index
    %522 = vector.load %arg5[%c0_143, %c3_144, %c0_145, %c2_146] : memref<2x4x20x20xf32, #tpu.memory_space<vmem>>, vector<2x1x16x16xf32>
    %523 = vector.shape_cast %522 : vector<2x1x16x16xf32> to vector<2x16x16xf32>
    %c28 = arith.constant 28 : index
    %524 = memref.load %arg2[%c28] : memref<144xf32, #tpu.memory_space<smem>>
    %525 = vector.broadcast %524 : f32 to vector<2x16x16xf32>
    %526 = arith.mulf %525, %523 : vector<2x16x16xf32>
    %527 = arith.addf %509, %526 : vector<2x16x16xf32>
    %c64 = arith.constant 64 : index
    %528 = memref.load %arg2[%c64] : memref<144xf32, #tpu.memory_space<smem>>
    %529 = vector.broadcast %528 : f32 to vector<2x16x16xf32>
    %530 = arith.mulf %529, %523 : vector<2x16x16xf32>
    %531 = arith.addf %513, %530 : vector<2x16x16xf32>
    %c100 = arith.constant 100 : index
    %532 = memref.load %arg2[%c100] : memref<144xf32, #tpu.memory_space<smem>>
    %533 = vector.broadcast %532 : f32 to vector<2x16x16xf32>
    %534 = arith.mulf %533, %523 : vector<2x16x16xf32>
    %535 = arith.addf %517, %534 : vector<2x16x16xf32>
    %c136 = arith.constant 136 : index
    %536 = memref.load %arg2[%c136] : memref<144xf32, #tpu.memory_space<smem>>
    %537 = vector.broadcast %536 : f32 to vector<2x16x16xf32>
    %538 = arith.mulf %537, %523 : vector<2x16x16xf32>
    %539 = arith.addf %521, %538 : vector<2x16x16xf32>
    %c0_147 = arith.constant 0 : index
    %c3_148 = arith.constant 3 : index
    %c0_149 = arith.constant 0 : index
    %c4_150 = arith.constant 4 : index
    %540 = vector.load %arg5[%c0_147, %c3_148, %c0_149, %c4_150] : memref<2x4x20x20xf32, #tpu.memory_space<vmem>>, vector<2x1x16x16xf32>
    %541 = vector.shape_cast %540 : vector<2x1x16x16xf32> to vector<2x16x16xf32>
    %c29 = arith.constant 29 : index
    %542 = memref.load %arg2[%c29] : memref<144xf32, #tpu.memory_space<smem>>
    %543 = vector.broadcast %542 : f32 to vector<2x16x16xf32>
    %544 = arith.mulf %543, %541 : vector<2x16x16xf32>
    %545 = arith.addf %527, %544 : vector<2x16x16xf32>
    %c65 = arith.constant 65 : index
    %546 = memref.load %arg2[%c65] : memref<144xf32, #tpu.memory_space<smem>>
    %547 = vector.broadcast %546 : f32 to vector<2x16x16xf32>
    %548 = arith.mulf %547, %541 : vector<2x16x16xf32>
    %549 = arith.addf %531, %548 : vector<2x16x16xf32>
    %c101 = arith.constant 101 : index
    %550 = memref.load %arg2[%c101] : memref<144xf32, #tpu.memory_space<smem>>
    %551 = vector.broadcast %550 : f32 to vector<2x16x16xf32>
    %552 = arith.mulf %551, %541 : vector<2x16x16xf32>
    %553 = arith.addf %535, %552 : vector<2x16x16xf32>
    %c137 = arith.constant 137 : index
    %554 = memref.load %arg2[%c137] : memref<144xf32, #tpu.memory_space<smem>>
    %555 = vector.broadcast %554 : f32 to vector<2x16x16xf32>
    %556 = arith.mulf %555, %541 : vector<2x16x16xf32>
    %557 = arith.addf %539, %556 : vector<2x16x16xf32>
    %c0_151 = arith.constant 0 : index
    %c3_152 = arith.constant 3 : index
    %c2_153 = arith.constant 2 : index
    %c0_154 = arith.constant 0 : index
    %558 = vector.load %arg5[%c0_151, %c3_152, %c2_153, %c0_154] : memref<2x4x20x20xf32, #tpu.memory_space<vmem>>, vector<2x1x16x16xf32>
    %559 = vector.shape_cast %558 : vector<2x1x16x16xf32> to vector<2x16x16xf32>
    %c30 = arith.constant 30 : index
    %560 = memref.load %arg2[%c30] : memref<144xf32, #tpu.memory_space<smem>>
    %561 = vector.broadcast %560 : f32 to vector<2x16x16xf32>
    %562 = arith.mulf %561, %559 : vector<2x16x16xf32>
    %563 = arith.addf %545, %562 : vector<2x16x16xf32>
    %c66 = arith.constant 66 : index
    %564 = memref.load %arg2[%c66] : memref<144xf32, #tpu.memory_space<smem>>
    %565 = vector.broadcast %564 : f32 to vector<2x16x16xf32>
    %566 = arith.mulf %565, %559 : vector<2x16x16xf32>
    %567 = arith.addf %549, %566 : vector<2x16x16xf32>
    %c102 = arith.constant 102 : index
    %568 = memref.load %arg2[%c102] : memref<144xf32, #tpu.memory_space<smem>>
    %569 = vector.broadcast %568 : f32 to vector<2x16x16xf32>
    %570 = arith.mulf %569, %559 : vector<2x16x16xf32>
    %571 = arith.addf %553, %570 : vector<2x16x16xf32>
    %c138 = arith.constant 138 : index
    %572 = memref.load %arg2[%c138] : memref<144xf32, #tpu.memory_space<smem>>
    %573 = vector.broadcast %572 : f32 to vector<2x16x16xf32>
    %574 = arith.mulf %573, %559 : vector<2x16x16xf32>
    %575 = arith.addf %557, %574 : vector<2x16x16xf32>
    %c0_155 = arith.constant 0 : index
    %c3_156 = arith.constant 3 : index
    %c2_157 = arith.constant 2 : index
    %c2_158 = arith.constant 2 : index
    %576 = vector.load %arg5[%c0_155, %c3_156, %c2_157, %c2_158] : memref<2x4x20x20xf32, #tpu.memory_space<vmem>>, vector<2x1x16x16xf32>
    %577 = vector.shape_cast %576 : vector<2x1x16x16xf32> to vector<2x16x16xf32>
    %c31 = arith.constant 31 : index
    %578 = memref.load %arg2[%c31] : memref<144xf32, #tpu.memory_space<smem>>
    %579 = vector.broadcast %578 : f32 to vector<2x16x16xf32>
    %580 = arith.mulf %579, %577 : vector<2x16x16xf32>
    %581 = arith.addf %563, %580 : vector<2x16x16xf32>
    %c67 = arith.constant 67 : index
    %582 = memref.load %arg2[%c67] : memref<144xf32, #tpu.memory_space<smem>>
    %583 = vector.broadcast %582 : f32 to vector<2x16x16xf32>
    %584 = arith.mulf %583, %577 : vector<2x16x16xf32>
    %585 = arith.addf %567, %584 : vector<2x16x16xf32>
    %c103 = arith.constant 103 : index
    %586 = memref.load %arg2[%c103] : memref<144xf32, #tpu.memory_space<smem>>
    %587 = vector.broadcast %586 : f32 to vector<2x16x16xf32>
    %588 = arith.mulf %587, %577 : vector<2x16x16xf32>
    %589 = arith.addf %571, %588 : vector<2x16x16xf32>
    %c139 = arith.constant 139 : index
    %590 = memref.load %arg2[%c139] : memref<144xf32, #tpu.memory_space<smem>>
    %591 = vector.broadcast %590 : f32 to vector<2x16x16xf32>
    %592 = arith.mulf %591, %577 : vector<2x16x16xf32>
    %593 = arith.addf %575, %592 : vector<2x16x16xf32>
    %c0_159 = arith.constant 0 : index
    %c3_160 = arith.constant 3 : index
    %c2_161 = arith.constant 2 : index
    %c4_162 = arith.constant 4 : index
    %594 = vector.load %arg5[%c0_159, %c3_160, %c2_161, %c4_162] : memref<2x4x20x20xf32, #tpu.memory_space<vmem>>, vector<2x1x16x16xf32>
    %595 = vector.shape_cast %594 : vector<2x1x16x16xf32> to vector<2x16x16xf32>
    %c32 = arith.constant 32 : index
    %596 = memref.load %arg2[%c32] : memref<144xf32, #tpu.memory_space<smem>>
    %597 = vector.broadcast %596 : f32 to vector<2x16x16xf32>
    %598 = arith.mulf %597, %595 : vector<2x16x16xf32>
    %599 = arith.addf %581, %598 : vector<2x16x16xf32>
    %c68 = arith.constant 68 : index
    %600 = memref.load %arg2[%c68] : memref<144xf32, #tpu.memory_space<smem>>
    %601 = vector.broadcast %600 : f32 to vector<2x16x16xf32>
    %602 = arith.mulf %601, %595 : vector<2x16x16xf32>
    %603 = arith.addf %585, %602 : vector<2x16x16xf32>
    %c104 = arith.constant 104 : index
    %604 = memref.load %arg2[%c104] : memref<144xf32, #tpu.memory_space<smem>>
    %605 = vector.broadcast %604 : f32 to vector<2x16x16xf32>
    %606 = arith.mulf %605, %595 : vector<2x16x16xf32>
    %607 = arith.addf %589, %606 : vector<2x16x16xf32>
    %c140 = arith.constant 140 : index
    %608 = memref.load %arg2[%c140] : memref<144xf32, #tpu.memory_space<smem>>
    %609 = vector.broadcast %608 : f32 to vector<2x16x16xf32>
    %610 = arith.mulf %609, %595 : vector<2x16x16xf32>
    %611 = arith.addf %593, %610 : vector<2x16x16xf32>
    %c0_163 = arith.constant 0 : index
    %c3_164 = arith.constant 3 : index
    %c4_165 = arith.constant 4 : index
    %c0_166 = arith.constant 0 : index
    %612 = vector.load %arg5[%c0_163, %c3_164, %c4_165, %c0_166] : memref<2x4x20x20xf32, #tpu.memory_space<vmem>>, vector<2x1x16x16xf32>
    %613 = vector.shape_cast %612 : vector<2x1x16x16xf32> to vector<2x16x16xf32>
    %c33 = arith.constant 33 : index
    %614 = memref.load %arg2[%c33] : memref<144xf32, #tpu.memory_space<smem>>
    %615 = vector.broadcast %614 : f32 to vector<2x16x16xf32>
    %616 = arith.mulf %615, %613 : vector<2x16x16xf32>
    %617 = arith.addf %599, %616 : vector<2x16x16xf32>
    %c69 = arith.constant 69 : index
    %618 = memref.load %arg2[%c69] : memref<144xf32, #tpu.memory_space<smem>>
    %619 = vector.broadcast %618 : f32 to vector<2x16x16xf32>
    %620 = arith.mulf %619, %613 : vector<2x16x16xf32>
    %621 = arith.addf %603, %620 : vector<2x16x16xf32>
    %c105 = arith.constant 105 : index
    %622 = memref.load %arg2[%c105] : memref<144xf32, #tpu.memory_space<smem>>
    %623 = vector.broadcast %622 : f32 to vector<2x16x16xf32>
    %624 = arith.mulf %623, %613 : vector<2x16x16xf32>
    %625 = arith.addf %607, %624 : vector<2x16x16xf32>
    %c141 = arith.constant 141 : index
    %626 = memref.load %arg2[%c141] : memref<144xf32, #tpu.memory_space<smem>>
    %627 = vector.broadcast %626 : f32 to vector<2x16x16xf32>
    %628 = arith.mulf %627, %613 : vector<2x16x16xf32>
    %629 = arith.addf %611, %628 : vector<2x16x16xf32>
    %c0_167 = arith.constant 0 : index
    %c3_168 = arith.constant 3 : index
    %c4_169 = arith.constant 4 : index
    %c2_170 = arith.constant 2 : index
    %630 = vector.load %arg5[%c0_167, %c3_168, %c4_169, %c2_170] : memref<2x4x20x20xf32, #tpu.memory_space<vmem>>, vector<2x1x16x16xf32>
    %631 = vector.shape_cast %630 : vector<2x1x16x16xf32> to vector<2x16x16xf32>
    %c34 = arith.constant 34 : index
    %632 = memref.load %arg2[%c34] : memref<144xf32, #tpu.memory_space<smem>>
    %633 = vector.broadcast %632 : f32 to vector<2x16x16xf32>
    %634 = arith.mulf %633, %631 : vector<2x16x16xf32>
    %635 = arith.addf %617, %634 : vector<2x16x16xf32>
    %c70 = arith.constant 70 : index
    %636 = memref.load %arg2[%c70] : memref<144xf32, #tpu.memory_space<smem>>
    %637 = vector.broadcast %636 : f32 to vector<2x16x16xf32>
    %638 = arith.mulf %637, %631 : vector<2x16x16xf32>
    %639 = arith.addf %621, %638 : vector<2x16x16xf32>
    %c106 = arith.constant 106 : index
    %640 = memref.load %arg2[%c106] : memref<144xf32, #tpu.memory_space<smem>>
    %641 = vector.broadcast %640 : f32 to vector<2x16x16xf32>
    %642 = arith.mulf %641, %631 : vector<2x16x16xf32>
    %643 = arith.addf %625, %642 : vector<2x16x16xf32>
    %c142 = arith.constant 142 : index
    %644 = memref.load %arg2[%c142] : memref<144xf32, #tpu.memory_space<smem>>
    %645 = vector.broadcast %644 : f32 to vector<2x16x16xf32>
    %646 = arith.mulf %645, %631 : vector<2x16x16xf32>
    %647 = arith.addf %629, %646 : vector<2x16x16xf32>
    %c0_171 = arith.constant 0 : index
    %c3_172 = arith.constant 3 : index
    %c4_173 = arith.constant 4 : index
    %c4_174 = arith.constant 4 : index
    %648 = vector.load %arg5[%c0_171, %c3_172, %c4_173, %c4_174] : memref<2x4x20x20xf32, #tpu.memory_space<vmem>>, vector<2x1x16x16xf32>
    %649 = vector.shape_cast %648 : vector<2x1x16x16xf32> to vector<2x16x16xf32>
    %c35 = arith.constant 35 : index
    %650 = memref.load %arg2[%c35] : memref<144xf32, #tpu.memory_space<smem>>
    %651 = vector.broadcast %650 : f32 to vector<2x16x16xf32>
    %652 = arith.mulf %651, %649 : vector<2x16x16xf32>
    %653 = arith.addf %635, %652 : vector<2x16x16xf32>
    %c71 = arith.constant 71 : index
    %654 = memref.load %arg2[%c71] : memref<144xf32, #tpu.memory_space<smem>>
    %655 = vector.broadcast %654 : f32 to vector<2x16x16xf32>
    %656 = arith.mulf %655, %649 : vector<2x16x16xf32>
    %657 = arith.addf %639, %656 : vector<2x16x16xf32>
    %c107 = arith.constant 107 : index
    %658 = memref.load %arg2[%c107] : memref<144xf32, #tpu.memory_space<smem>>
    %659 = vector.broadcast %658 : f32 to vector<2x16x16xf32>
    %660 = arith.mulf %659, %649 : vector<2x16x16xf32>
    %661 = arith.addf %643, %660 : vector<2x16x16xf32>
    %c143 = arith.constant 143 : index
    %662 = memref.load %arg2[%c143] : memref<144xf32, #tpu.memory_space<smem>>
    %663 = vector.broadcast %662 : f32 to vector<2x16x16xf32>
    %664 = arith.mulf %663, %649 : vector<2x16x16xf32>
    %665 = arith.addf %647, %664 : vector<2x16x16xf32>
    %cst_175 = arith.constant 0.000000e+00 : f32
    %666 = vector.broadcast %cst_175 : f32 to vector<2x16x16xf32>
    %667 = arith.maximumf %653, %666 : vector<2x16x16xf32>
    %c0_176 = arith.constant 0 : index
    %c0_177 = arith.constant 0 : index
    %c0_178 = arith.constant 0 : index
    %c0_179 = arith.constant 0 : index
    %668 = vector.load %arg4[%c0_176, %c0_177, %c0_178, %c0_179] : memref<2x4x16x16xf32, #tpu.memory_space<vmem>>, vector<2x1x16x16xf32>
    %669 = vector.shape_cast %668 : vector<2x1x16x16xf32> to vector<2x16x16xf32>
    %670 = vector.shape_cast %667 : vector<2x16x16xf32> to vector<2x1x16x16xf32>
    tpu.vector_store %arg4[%c0_176, %c0_177, %c0_178, %c0_179], %670 {strides = array<i32>} : memref<2x4x16x16xf32, #tpu.memory_space<vmem>>, vector<2x1x16x16xf32>,
    %cst_180 = arith.constant 0.000000e+00 : f32
    %671 = vector.broadcast %cst_180 : f32 to vector<2x16x16xf32>
    %672 = arith.maximumf %657, %671 : vector<2x16x16xf32>
    %c0_181 = arith.constant 0 : index
    %c1_182 = arith.constant 1 : index
    %c0_183 = arith.constant 0 : index
    %c0_184 = arith.constant 0 : index
    %673 = vector.load %arg4[%c0_181, %c1_182, %c0_183, %c0_184] : memref<2x4x16x16xf32, #tpu.memory_space<vmem>>, vector<2x1x16x16xf32>
    %674 = vector.shape_cast %673 : vector<2x1x16x16xf32> to vector<2x16x16xf32>
    %675 = vector.shape_cast %672 : vector<2x16x16xf32> to vector<2x1x16x16xf32>
    tpu.vector_store %arg4[%c0_181, %c1_182, %c0_183, %c0_184], %675 {strides = array<i32>} : memref<2x4x16x16xf32, #tpu.memory_space<vmem>>, vector<2x1x16x16xf32>,
    %cst_185 = arith.constant 0.000000e+00 : f32
    %676 = vector.broadcast %cst_185 : f32 to vector<2x16x16xf32>
    %677 = arith.maximumf %661, %676 : vector<2x16x16xf32>
    %c0_186 = arith.constant 0 : index
    %c2_187 = arith.constant 2 : index
    %c0_188 = arith.constant 0 : index
    %c0_189 = arith.constant 0 : index
    %678 = vector.load %arg4[%c0_186, %c2_187, %c0_188, %c0_189] : memref<2x4x16x16xf32, #tpu.memory_space<vmem>>, vector<2x1x16x16xf32>
    %679 = vector.shape_cast %678 : vector<2x1x16x16xf32> to vector<2x16x16xf32>
    %680 = vector.shape_cast %677 : vector<2x16x16xf32> to vector<2x1x16x16xf32>
    tpu.vector_store %arg4[%c0_186, %c2_187, %c0_188, %c0_189], %680 {strides = array<i32>} : memref<2x4x16x16xf32, #tpu.memory_space<vmem>>, vector<2x1x16x16xf32>,
    %cst_190 = arith.constant 0.000000e+00 : f32
    %681 = vector.broadcast %cst_190 : f32 to vector<2x16x16xf32>
    %682 = arith.maximumf %665, %681 : vector<2x16x16xf32>
    %c0_191 = arith.constant 0 : index
    %c3_192 = arith.constant 3 : index
    %c0_193 = arith.constant 0 : index
    %c0_194 = arith.constant 0 : index
    %683 = vector.load %arg4[%c0_191, %c3_192, %c0_193, %c0_194] : memref<2x4x16x16xf32, #tpu.memory_space<vmem>>, vector<2x1x16x16xf32>
    %684 = vector.shape_cast %683 : vector<2x1x16x16xf32> to vector<2x16x16xf32>
    %685 = vector.shape_cast %682 : vector<2x16x16xf32> to vector<2x1x16x16xf32>
    tpu.vector_store %arg4[%c0_191, %c3_192, %c0_193, %c0_194], %685 {strides = array<i32>} : memref<2x4x16x16xf32, #tpu.memory_space<vmem>>, vector<2x1x16x16xf32>,
    return
  }
  func.func @transform_0(%arg0: i32) -> (i32, i32, i32, i32) {
    %c0_i32 = arith.constant 0 : i32
    %c0_i32_0 = arith.constant 0 : i32
    %c0_i32_1 = arith.constant 0 : i32
    %c0_i32_2 = arith.constant 0 : i32
    %c0_i32_3 = arith.constant 0 : i32
    return %c0_i32, %c0_i32_0, %c0_i32_1, %c0_i32_2 : i32, i32, i32, i32
  }
  func.func @transform_1(%arg0: i32) -> i32 {
    %c0_i32 = arith.constant 0 : i32
    %c0_i32_0 = arith.constant 0 : i32
    return %c0_i32 : i32
  }
  func.func @transform_2(%arg0: i32) -> i32 {
    %c0_i32 = arith.constant 0 : i32
    %c0_i32_0 = arith.constant 0 : i32
    return %c0_i32 : i32
  }
  func.func @transform_3(%arg0: i32) -> (i32, i32, i32, i32) {
    %c0_i32 = arith.constant 0 : i32
    %c0_i32_0 = arith.constant 0 : i32
    %c0_i32_1 = arith.constant 0 : i32
    %c0_i32_2 = arith.constant 0 : i32
    %c0_i32_3 = arith.constant 0 : i32
    return %c0_i32, %c0_i32_0, %c0_i32_1, %c0_i32_2 : i32, i32, i32, i32
  }
}

</mosaic_0001>

<bundles_post_ra>
// kernel: tpu_custom_call.1
= control target key start
LH: loop header
LB: loop body
LE: loop exit
PB: predicated region body
PF: predicated region fallthrough
CT: control target
= control target key end

     0   :  { %8 = vsyncpa [#allocation4], 0  ;;  %s5934_s0 = inlined_call_operand.hbm [shape: f32[2,4,16,16], index: 0, kind: input, shape index: {}]   ;;  %s5935_s1 = inlined_call_operand.hbm [shape: f32[144], index: 1, kind: input, shape index: {}]   ;;  %s5936_s2 = inlined_call_operand.vmem [shape: f32[4], index: 2, kind: input, shape index: {}]   ;;  %s5937_s3 = inlined_call_operand.hbm [shape: f32[2,4,16,16], index: 3, kind: output, shape index: {}]  }
   0x1   :  { %9 = vsyncpa [#allocation6], 0 }
   0x2   :  { %10 = vsyncpa [#allocation7], 0 }
   0x3   :  { %11 = vsyncpa [#allocation5], 0  ;;  %s3532_s12 = smov [#allocation3]  }
   0x4   :  { %s17_s13 = sshll.u32 %s3532_s12, 4  ;;  %s18_s13 = int_to_ptr.vmem [resolvable:$true] %s17_s13 }
   0x5   :  { %s3472_s14 = scalar_lea.vmem %s18_s13, 2048  ;;  %p3477_p1 = scmp.lt.s32.totalorder %s18_s13, %s18_s13 }
   0x6   :  { %p3473_p0 = scmp.ne.s32.totalorder %s18_s13, %s3472_s14  ;;  %p3478_p2 = scmp.lt.s32.totalorder %s3472_s14, %s3472_s14 }
   0x8   :  { %p3479_p3 = por %p3478_p2, %p3477_p1 }
   0xa   :  { %p3480_p4 = pnand %p3479_p3, %p3473_p0 }
   0xc   :  { %3483 = shalt.err (!%p3480_p4)
}
   0xd   :  { %s3533_s15 = smov 128   ;;  %s3534_s16 = smov 8  }
   0xe   :  { %23 = dma.hbm_to_vmem [thread:$0]  %s5934_s0, 2048, %s18_s13, [#allocation4], %s3533_s15, %s3533_s15, %s3534_s16  }
   0xf   :  { %s3535_s19 = smov [#allocation8]   ;;  %s38_s24 = sshll.u32 %s5936_s2, 4  ;;  %s39_s24 = int_to_ptr.vmem [resolvable:$true] %s38_s24 }
  0x10   :  { %31 = dma.hbm_to_smem %s5935_s1, 32, %s3535_s19, [#allocation6]  }
  0x11   :  { %s3492_s25 = scalar_lea.vmem %s39_s24, 16  ;;  %p3497_p6 = scmp.lt.s32.totalorder %s39_s24, %s39_s24 }
  0x12   :  { %p3493_p5 = scmp.ne.s32.totalorder %s39_s24, %s3492_s25  ;;  %p3498_p7 = scmp.lt.s32.totalorder %s3492_s25, %s3492_s25 }
  0x14   :  { %p3499_p8 = por %p3498_p7, %p3497_p6 }
  0x16   :  { %p3500_p9 = pnand %p3499_p8, %p3493_p5 }
  0x18   :  { %3503 = shalt.err (!%p3500_p9)
}
  0x19   :  { %s3536_s26 = smov [#allocation9]  }
  0x1a   :  { %41 = dma.vmem_to_smem %s39_s24, 16, %s3536_s26, [#allocation7]  }
  0x1b   :  { %3524 = dma.done.wait [#allocation4], 2048  }
  0x1c   :  { %3525 = vsyncadd [#allocation4], 4294965248 }
  0x1d   :  { %3526 = dma.done.wait [#allocation6], 32  }
  0x1e   :  { %3527 = vsyncadd [#allocation6], 4294967264 }
  0x1f   :  { %3528 = dma.done.wait [#allocation7], 16  }
  0x20   :  { %3529 = vsyncadd [#allocation7], 4294967280 }
  0x21   :  { %51 = sfence }
  0x22   :  { %v123_v0 = vld [vmem:[#allocation3 + $0x10] sm:$0xff]  ;;  %v121_v1 = vld [vmem:[#allocation3] sm:$0xff]  ;;  %vm52_vm0 = vcmask 156672   ;;  %s3537_s0 = smov 2   ;;  %vm69_vm1 = vcmask 15360   ;;  %vm95_vm2 = vcmask 162960  }
  0x23   :  { %157 = vrot.lane.b32.xlu1 %v123_v0, %s3537_s0  ;;  %153 = vrot.lane.b32.xlu0 %v121_v1, %s3537_s0  ;;  %v3576_v2 = vld [vmem:[#allocation3 + $0x18] sm:$0xff]  ;;  %v3578_v3 = vld [vmem:[#allocation3 + $0x8] sm:$0xff]  ;;  %v3538_v4 = vmov 0.0   ;;  %vm72_vm3 = vcmask 11264   ;;  %vm98_vm4 = vcmask 158864   ;;  %v125_v6 = vld [vmem:[#allocation3 + $0x20] sm:$0xff] }
  0x24   :  { %54 = vst.msk [vmem:[#allocation2 + $0x18] sm:$0x3] %vm52_vm0, %v3538_v4  ;;  %53 = vst.msk [vmem:[#allocation2] sm:$0x3] %vm52_vm0, %v3538_v4  ;;  %v126_v5 = vld [vmem:[#allocation3 + $0x28] sm:$0xff]  ;;  %v128_v7 = vld [vmem:[#allocation3 + $0x38] sm:$0xff] }
  0x25   :  { %75 = vst.msk [vmem:[#allocation2 + $0x20] sm:$0xff] %vm69_vm1, %v3538_v4  ;;  %71 = vst.msk [vmem:[#allocation2 + $0x8] sm:$0xff] %vm69_vm1, %v3538_v4  ;;  %v127_v8 = vld [vmem:[#allocation3 + $0x30] sm:$0xff]  ;;  %v130_v9 = vld [vmem:[#allocation3 + $0x48] sm:$0xff]  ;;  %vm201_vm5 = vcmask 146448   ;;  %s3314_s1 = sld [smem:[#allocation8 + $0x1]] }
  0x26   :  { %55 = vst.msk [vmem:[#allocation2 + $0x30] sm:$0x3] %vm52_vm0, %v3538_v4  ;;  %56 = vst.msk [vmem:[#allocation2 + $0x48] sm:$0x3] %vm52_vm0, %v3538_v4  ;;  %v129_v10 = vld [vmem:[#allocation3 + $0x40] sm:$0xff]  ;;  %v131_v11 = vld [vmem:[#allocation3 + $0x50] sm:$0xff] }
  0x27   :  { %57 = vst.msk [vmem:[#allocation2 + $0x60] sm:$0x3] %vm52_vm0, %v3538_v4  ;;  %58 = vst.msk [vmem:[#allocation2 + $0x78] sm:$0x3] %vm52_vm0, %v3538_v4  ;;  %159 = vrot.lane.b32.xlu1 %v3576_v2, %s3537_s0  ;;  %155 = vrot.lane.b32.xlu0 %v3578_v3, %s3537_s0  ;;  %v132_v12 = vld [vmem:[#allocation3 + $0x58] sm:$0xff]  ;;  %v133_v13 = vld [vmem:[#allocation3 + $0x60] sm:$0xff] }
  0x28   :  { %59 = vst.msk [vmem:[#allocation2 + $0x90] sm:$0x3] %vm52_vm0, %v3538_v4  ;;  %60 = vst.msk [vmem:[#allocation2 + $0xa8] sm:$0x3] %vm52_vm0, %v3538_v4  ;;  %v134_v14 = vld [vmem:[#allocation3 + $0x68] sm:$0xff]  ;;  %v135_v15 = vld [vmem:[#allocation3 + $0x70] sm:$0xff] }
  0x29   :  { %61 = vst.msk [vmem:[#allocation2 + $0x12] sm:$0x3] %vm52_vm0, %v3538_v4  ;;  %62 = vst.msk [vmem:[#allocation2 + $0x2a] sm:$0x3] %vm52_vm0, %v3538_v4  ;;  %v136_v16 = vld [vmem:[#allocation3 + $0x78] sm:$0xff]  ;;  %s3539_s2 = smov 126  }
  0x2a   :  { %63 = vst.msk [vmem:[#allocation2 + $0x42] sm:$0x3] %vm52_vm0, %v3538_v4  ;;  %64 = vst.msk [vmem:[#allocation2 + $0x5a] sm:$0x3] %vm52_vm0, %v3538_v4  ;;  %s3315_s27 = sld [smem:[#allocation8 + $0x25]]  ;;  %s3540_s5 = smov 124  }
  0x2b   :  { %65 = vst.msk [vmem:[#allocation2 + $0x72] sm:$0x3] %vm52_vm0, %v3538_v4  ;;  %66 = vst.msk [vmem:[#allocation2 + $0x8a] sm:$0x3] %vm52_vm0, %v3538_v4  ;;  %163 = vrot.lane.b32.xlu1 %v126_v5, %s3537_s0  ;;  %161 = vrot.lane.b32.xlu0 %v125_v6, %s3537_s0  ;;  %v271_v21 = vstv %s3314_s1  ;;  %s3316_s28 = sld [smem:[#allocation8 + $0x49]]  ;;  %vm3257_vm6 = vcmask 130048  }
  0x2c   :  { %67 = vst.msk [vmem:[#allocation2 + $0xa2] sm:$0x3] %vm52_vm0, %v3538_v4  ;;  %68 = vst.msk [vmem:[#allocation2 + $0xba] sm:$0x3] %vm52_vm0, %v3538_v4  ;;  %s3317_s29 = sld [smem:[#allocation8 + $0x6d]] }
  0x2d   :  { %78 = vst.msk [vmem:[#allocation2 + $0x38] sm:$0xff] %vm69_vm1, %v3538_v4  ;;  %81 = vst.msk [vmem:[#allocation2 + $0x50] sm:$0xff] %vm69_vm1, %v3538_v4  ;;  %s3318_s30 = sld [smem:[#allocation8 + $0x2]] }
  0x2e   :  { %84 = vst.msk [vmem:[#allocation2 + $0x68] sm:$0xff] %vm69_vm1, %v3538_v4  ;;  %87 = vst.msk [vmem:[#allocation2 + $0x80] sm:$0xff] %vm69_vm1, %v3538_v4  ;;  %s3319_s4 = sld [smem:[#allocation8 + $0x26]] }
  0x2f   :  { %90 = vst.msk [vmem:[#allocation2 + $0x98] sm:$0xff] %vm69_vm1, %v3538_v4  ;;  %93 = vst.msk [vmem:[#allocation2 + $0xb0] sm:$0xff] %vm69_vm1, %v3538_v4  ;;  %167 = vrot.lane.b32.xlu1 %v128_v7, %s3537_s0  ;;  %165 = vrot.lane.b32.xlu0 %v127_v8, %s3537_s0  ;;  %s3320_s6 = sld [smem:[#allocation8 + $0x4a]] }
  0x30   :  { %74 = vst.msk [vmem:[#allocation2 + $0x18] sm:$0xff] %vm69_vm1, %v3538_v4  ;;  %70 = vst.msk [vmem:[#allocation2] sm:$0xff] %vm69_vm1, %v3538_v4  ;;  %v297_v40 = vstv %s3315_s27  ;;  %s3321_s7 = sld [smem:[#allocation8 + $0x6e]] }
  0x31   :  { %101 = vst.msk [vmem:[#allocation2 + $0x20] sm:$0xff] %vm95_vm2, %v3538_v4  ;;  %97 = vst.msk [vmem:[#allocation2 + $0x8] sm:$0xff] %vm95_vm2, %v3538_v4  ;;  %v323_v47 = vstv %s3316_s28  ;;  %s3326_s8 = sld [smem:[#allocation8 + $0x4]] }
  0x32   :  { %77 = vst.msk [vmem:[#allocation2 + $0x30] sm:$0xff] %vm69_vm1, %v3538_v4  ;;  %80 = vst.msk [vmem:[#allocation2 + $0x48] sm:$0xff] %vm69_vm1, %v3538_v4  ;;  %v349_v52 = vstv %s3317_s29  ;;  %s3327_s9 = sld [smem:[#allocation8 + $0x28]] }
  0x33   :  { %83 = vst.msk [vmem:[#allocation2 + $0x60] sm:$0xff] %vm69_vm1, %v3538_v4  ;;  %86 = vst.msk [vmem:[#allocation2 + $0x78] sm:$0xff] %vm69_vm1, %v3538_v4  ;;  %171 = vrot.lane.b32.xlu1 %v130_v9, %s3537_s0  ;;  %169 = vrot.lane.b32.xlu0 %v129_v10, %s3537_s0  ;;  %v375_v57 = vstv %s3318_s30  ;;  %s3328_s10 = sld [smem:[#allocation8 + $0x4c]] }
  0x34   :  { %89 = vst.msk [vmem:[#allocation2 + $0x90] sm:$0xff] %vm69_vm1, %v3538_v4  ;;  %92 = vst.msk [vmem:[#allocation2 + $0xa8] sm:$0xff] %vm69_vm1, %v3538_v4  ;;  %v401_v62 = vstv %s3319_s4  ;;  %s3329_s11 = sld [smem:[#allocation8 + $0x70]] }
  0x35   :  { %104 = vst.msk [vmem:[#allocation2 + $0x38] sm:$0xff] %vm95_vm2, %v3538_v4  ;;  %107 = vst.msk [vmem:[#allocation2 + $0x50] sm:$0xff] %vm95_vm2, %v3538_v4  ;;  %v427_v3 = vstv %s3320_s6  ;;  %s3330_s12 = sld [smem:[#allocation8 + $0x5]] }
  0x36   :  { %110 = vst.msk [vmem:[#allocation2 + $0x68] sm:$0xff] %vm95_vm2, %v3538_v4  ;;  %113 = vst.msk [vmem:[#allocation2 + $0x80] sm:$0xff] %vm95_vm2, %v3538_v4  ;;  %v453_v8 = vstv %s3321_s7  ;;  %s3331_s13 = sld [smem:[#allocation8 + $0x29]] }
  0x37   :  { %116 = vst.msk [vmem:[#allocation2 + $0x98] sm:$0xff] %vm95_vm2, %v3538_v4  ;;  %119 = vst.msk [vmem:[#allocation2 + $0xb0] sm:$0xff] %vm95_vm2, %v3538_v4  ;;  %173 = vrot.lane.b32.xlu0 %v131_v11, %s3537_s0  ;;  %175 = vrot.lane.b32.xlu1 %v132_v12, %s3537_s0  ;;  %s3332_s14 = sld [smem:[#allocation8 + $0x4d]] }
  0x38   :  { %76 = vst.msk [vmem:[#allocation2 + $0x28] sm:$0xf] %vm72_vm3, %v3538_v4  ;;  %73 = vst.msk [vmem:[#allocation2 + $0x10] sm:$0xf] %vm72_vm3, %v3538_v4  ;;  %s3333_s17 = sld [smem:[#allocation8 + $0x71]] }
  0x39   :  { %79 = vst.msk [vmem:[#allocation2 + $0x40] sm:$0xf] %vm72_vm3, %v3538_v4  ;;  %82 = vst.msk [vmem:[#allocation2 + $0x58] sm:$0xf] %vm72_vm3, %v3538_v4  ;;  %s3338_s18 = sld [smem:[#allocation8 + $0x7]] }
  0x3a   :  { %85 = vst.msk [vmem:[#allocation2 + $0x70] sm:$0xf] %vm72_vm3, %v3538_v4  ;;  %88 = vst.msk [vmem:[#allocation2 + $0x88] sm:$0xf] %vm72_vm3, %v3538_v4  ;;  %s3339_s19 = sld [smem:[#allocation8 + $0x2b]] }
  0x3b   :  { %91 = vst.msk [vmem:[#allocation2 + $0xa0] sm:$0xf] %vm72_vm3, %v3538_v4  ;;  %94 = vst.msk [vmem:[#allocation2 + $0xb8] sm:$0xf] %vm72_vm3, %v3538_v4  ;;  %177 = vrot.lane.b32.xlu0 %v133_v13, %s3537_s0  ;;  %179 = vrot.lane.b32.xlu1 %v134_v14, %s3537_s0  ;;  %v523_v14 = vstv %s3326_s8  ;;  %s230_s20 = sld [smem:[#allocation8]] }
  0x3c   :  { %100 = vst.msk [vmem:[#allocation2 + $0x18] sm:$0xff] %vm95_vm2, %v3538_v4  ;;  %96 = vst.msk [vmem:[#allocation2] sm:$0xff] %vm95_vm2, %v3538_v4  ;;  %s3340_s21 = sld [smem:[#allocation8 + $0x4f]] }
  0x3d   :  { %103 = vst.msk [vmem:[#allocation2 + $0x30] sm:$0xff] %vm95_vm2, %v3538_v4  ;;  %106 = vst.msk [vmem:[#allocation2 + $0x48] sm:$0xff] %vm95_vm2, %v3538_v4  ;;  %s218_s22 = sld [smem:[#allocation9]] }
  0x3e   :  { %109 = vst.msk [vmem:[#allocation2 + $0x60] sm:$0xff] %vm95_vm2, %v3538_v4  ;;  %112 = vst.msk [vmem:[#allocation2 + $0x78] sm:$0xff] %vm95_vm2, %v3538_v4  ;;  %s3311_s23 = sld [smem:[#allocation8 + $0x24]] }
  0x3f   :  { %115 = vst.msk [vmem:[#allocation2 + $0x90] sm:$0xff] %vm95_vm2, %v3538_v4  ;;  %118 = vst.msk [vmem:[#allocation2 + $0xa8] sm:$0xff] %vm95_vm2, %v3538_v4  ;;  %181 = vrot.lane.b32.xlu0 %v135_v15, %s3537_s0  ;;  %183 = vrot.lane.b32.xlu1 %v136_v16, %s3537_s0  ;;  %s3322_s24 = sld [smem:[#allocation8 + $0x3]] }
  0x40   :  { %102 = vst.msk [vmem:[#allocation2 + $0x28] sm:$0xf] %vm98_vm4, %v3538_v4  ;;  %99 = vst.msk [vmem:[#allocation2 + $0x10] sm:$0xf] %vm98_vm4, %v3538_v4  ;;  %s3308_s25 = sld [smem:[#allocation9 + $0x1]] }
  0x41   :  { %105 = vst.msk [vmem:[#allocation2 + $0x40] sm:$0xf] %vm98_vm4, %v3538_v4  ;;  %108 = vst.msk [vmem:[#allocation2 + $0x58] sm:$0xf] %vm98_vm4, %v3538_v4  ;;  %s3931_s26 = sld [smem:[#allocation8 + $0x73]] }
  0x42   :  { %111 = vst.msk [vmem:[#allocation2 + $0x70] sm:$0xf] %vm98_vm4, %v3538_v4  ;;  %114 = vst.msk [vmem:[#allocation2 + $0x88] sm:$0xf] %vm98_vm4, %v3538_v4  ;;  %s3938_s0 = sld [smem:[#allocation8 + $0x48]] }
  0x43   :  { %117 = vst.msk [vmem:[#allocation2 + $0xa0] sm:$0xf] %vm98_vm4, %v3538_v4  ;;  %120 = vst.msk [vmem:[#allocation2 + $0xb8] sm:$0xf] %vm98_vm4, %v3538_v4  ;;  %s3942_s1 = sld [smem:[#allocation8 + $0x27]] }
  0x44   :  { %s3952_s27 = sld [smem:[#allocation9 + $0x2]] }
  0x45   :  { %s3957_s28 = sld [smem:[#allocation8 + $0x8]] }
  0x46   :  { %s3966_s29 = sld [smem:[#allocation8 + $0x6c]] }
  0x47   :  { %s3976_s30 = sld [smem:[#allocation8 + $0x4b]] }
  0x48   :  { %s3986_s4 = sld [smem:[#allocation9 + $0x3]] }
  0x49   :  { %s3994_s6 = sld [smem:[#allocation8 + $0x2c]] }
  0x4a   :  { %s4014_s7 = sld [smem:[#allocation8 + $0x6f]] }
  0x4b   :  { %s4035_s8 = sld [smem:[#allocation8 + $0x50]] }
  0x95   :  { %v158_v17 = vpop.permute.xlu1 %157  ;;  %v154_v18 = vpop.permute.xlu0 %153 }
  0x96   :  { %204 = vst.msk [vmem:[#allocation2 + $0x1a] sm:$0xff] %vm201_vm5, %v158_v17  ;;  %202 = vst.msk [vmem:[#allocation2 + $0x2] sm:$0xff] %vm201_vm5, %v154_v18 }
  0x99   :  { %v160_v19 = vpop.permute.xlu1 %159  ;;  %v156_v20 = vpop.permute.xlu0 %155 }
  0x9a   :  { %205 = vst.msk [vmem:[#allocation2 + $0x22] sm:$0xff] %vm201_vm5, %v160_v19  ;;  %203 = vst.msk [vmem:[#allocation2 + $0xa] sm:$0xff] %vm201_vm5, %v156_v20 }
  0x9d   :  { %v3728_v22 = vld [vmem:[#allocation2] sm:$0xff]  ;;  %v164_v23 = vpop.permute.xlu1 %163  ;;  %v162_v24 = vpop.permute.xlu0 %161 }
  0x9e   :  { %207 = vst.msk [vmem:[#allocation2 + $0x3a] sm:$0xff] %vm201_vm5, %v164_v23  ;;  %206 = vst.msk [vmem:[#allocation2 + $0x32] sm:$0xff] %vm201_vm5, %v162_v24  ;;  %v272_v25 = vmul.f32 %v271_v21, %v3728_v22  ;;  %v298_v43 = vmul.f32 %v297_v40, %v3728_v22  ;;  %v324_v48 = vmul.f32 %v323_v47, %v3728_v22  ;;  %v3809_v12 = vld [vmem:[#allocation2 + $0x2] sm:$0xff]  ;;  %v549_v23 = vstv %s3327_s9  ;;  %s3345_s9 = sld [smem:[#allocation8 + $0x74]] }
  0x9f   :  { %v350_v53 = vmul.f32 %v349_v52, %v3728_v22  ;;  %v376_v58 = vmul.f32 %v375_v57, %v3728_v22  ;;  %v402_v63 = vmul.f32 %v401_v62, %v3728_v22  ;;  %v428_v4 = vmul.f32 %v427_v3, %v3728_v22 }
  0xa0   :  { %280 = vrot.lane.b32.xlu0 %v272_v25, %s3539_s2  ;;  %v454_v9 = vmul.f32 %v453_v8, %v3728_v22  ;;  %v524_v16 = vmul.f32 %v523_v14, %v3809_v12  ;;  %v550_v24 = vmul.f32 %v549_v23, %v3809_v12 }
  0xa1   :  { %v168_v26 = vpop.permute.xlu1 %167  ;;  %v166_v27 = vpop.permute.xlu0 %165  ;;  %v3734_v28 = vld [vmem:[#allocation2 + $0x8] sm:$0xff] }
  0xa2   :  { %209 = vst.msk [vmem:[#allocation2 + $0x52] sm:$0xff] %vm201_vm5, %v168_v26  ;;  %208 = vst.msk [vmem:[#allocation2 + $0x4a] sm:$0xff] %vm201_vm5, %v166_v27  ;;  %v273_v29 = vmul.f32 %v271_v21, %v3734_v28  ;;  %v299_v44 = vmul.f32 %v297_v40, %v3734_v28  ;;  %v325_v49 = vmul.f32 %v323_v47, %v3734_v28  ;;  %v3812_v15 = vld [vmem:[#allocation2 + $0xa] sm:$0xff] }
  0xa3   :  { %v351_v54 = vmul.f32 %v349_v52, %v3734_v28  ;;  %v377_v59 = vmul.f32 %v375_v57, %v3734_v28  ;;  %v403_v0 = vmul.f32 %v401_v62, %v3734_v28  ;;  %v429_v5 = vmul.f32 %v427_v3, %v3734_v28 }
  0xa4   :  { %282 = vrot.lane.b32.xlu1 %v273_v29, %s3539_s2  ;;  %v455_v10 = vmul.f32 %v453_v8, %v3734_v28  ;;  %v525_v18 = vmul.f32 %v523_v14, %v3812_v15  ;;  %v551_v25 = vmul.f32 %v549_v23, %v3812_v15  ;;  %v575_v29 = vstv %s3328_s10  ;;  %s3350_s10 = sld [smem:[#allocation8 + $0xa]] }
  0xa5   :  { %v172_v30 = vpop.permute.xlu1 %171  ;;  %v170_v31 = vpop.permute.xlu0 %169 }
  0xa6   :  { %211 = vst.msk [vmem:[#allocation2 + $0x6a] sm:$0xff] %vm201_vm5, %v172_v30  ;;  %210 = vst.msk [vmem:[#allocation2 + $0x62] sm:$0xff] %vm201_vm5, %v170_v31  ;;  %v576_v30 = vmul.f32 %v575_v29, %v3809_v12  ;;  %v577_v31 = vmul.f32 %v575_v29, %v3812_v15 }
  0xa9   :  { %v174_v32 = vpop.permute.xlu0 %173  ;;  %v176_v33 = vpop.permute.xlu1 %175 }
  0xaa   :  { %212 = vst.msk [vmem:[#allocation2 + $0x7a] sm:$0xff] %vm201_vm5, %v174_v32  ;;  %213 = vst.msk [vmem:[#allocation2 + $0x82] sm:$0xff] %vm201_vm5, %v176_v33 }
  0xad   :  { %v3744_v34 = vld [vmem:[#allocation2 + $0x60] sm:$0xff]  ;;  %v178_v35 = vpop.permute.xlu0 %177  ;;  %v180_v36 = vpop.permute.xlu1 %179  ;;  %v3746_v37 = vld [vmem:[#allocation2 + $0x68] sm:$0xff] }
  0xae   :  { %v274_v38 = vmul.f32 %v271_v21, %v3744_v34  ;;  %214 = vst.msk [vmem:[#allocation2 + $0x92] sm:$0xff] %vm201_vm5, %v178_v35  ;;  %215 = vst.msk [vmem:[#allocation2 + $0x9a] sm:$0xff] %vm201_vm5, %v180_v36  ;;  %v275_v39 = vmul.f32 %v271_v21, %v3746_v37  ;;  %v300_v45 = vmul.f32 %v297_v40, %v3744_v34  ;;  %v3817_v17 = vld [vmem:[#allocation2 + $0x62] sm:$0xff]  ;;  %v3820_v19 = vld [vmem:[#allocation2 + $0x6a] sm:$0xff]  ;;  %v601_v35 = vstv %s3329_s11  ;;  %s3351_s11 = sld [smem:[#allocation8 + $0x2e]] }
  0xaf   :  { %v301_v46 = vmul.f32 %v297_v40, %v3746_v37  ;;  %v326_v50 = vmul.f32 %v323_v47, %v3744_v34  ;;  %v327_v51 = vmul.f32 %v323_v47, %v3746_v37  ;;  %v352_v55 = vmul.f32 %v349_v52, %v3744_v34 }
  0xb0   :  { %284 = vrot.lane.b32.xlu0 %v274_v38, %s3539_s2  ;;  %286 = vrot.lane.b32.xlu1 %v275_v39, %s3539_s2  ;;  %v353_v56 = vmul.f32 %v349_v52, %v3746_v37  ;;  %v378_v60 = vmul.f32 %v375_v57, %v3744_v34  ;;  %v379_v61 = vmul.f32 %v375_v57, %v3746_v37 }
  0xb1   :  { %v182_v41 = vpop.permute.xlu0 %181  ;;  %v184_v42 = vpop.permute.xlu1 %183  ;;  %v404_v1 = vmul.f32 %v401_v62, %v3744_v34  ;;  %v405_v2 = vmul.f32 %v401_v62, %v3746_v37  ;;  %v430_v6 = vmul.f32 %v427_v3, %v3744_v34  ;;  %v431_v7 = vmul.f32 %v427_v3, %v3746_v37 }
  0xb2   :  { %216 = vst.msk [vmem:[#allocation2 + $0xaa] sm:$0xff] %vm201_vm5, %v182_v41  ;;  %217 = vst.msk [vmem:[#allocation2 + $0xb2] sm:$0xff] %vm201_vm5, %v184_v42  ;;  %v456_v11 = vmul.f32 %v453_v8, %v3744_v34  ;;  %v457_v13 = vmul.f32 %v453_v8, %v3746_v37  ;;  %v526_v20 = vmul.f32 %v523_v14, %v3817_v17  ;;  %v627_v41 = vstv %s3330_s12  ;;  %v3903_v8 = vld [vmem:[#allocation2 + $0x64] sm:$0xff]  ;;  %s3352_s12 = sld [smem:[#allocation8 + $0x52]] }
  0xb3   :  { %v527_v21 = vmul.f32 %v523_v14, %v3820_v19  ;;  %v552_v26 = vmul.f32 %v549_v23, %v3817_v17  ;;  %v553_v27 = vmul.f32 %v549_v23, %v3820_v19  ;;  %v578_v32 = vmul.f32 %v575_v29, %v3817_v17 }
  0xb4   :  { %306 = vrot.lane.b32.xlu0 %v298_v43, %s3539_s2  ;;  %308 = vrot.lane.b32.xlu1 %v299_v44, %s3539_s2  ;;  %v579_v33 = vmul.f32 %v575_v29, %v3820_v19  ;;  %v602_v36 = vmul.f32 %v601_v35, %v3809_v12  ;;  %v603_v38 = vmul.f32 %v601_v35, %v3812_v15 }
  0xb5   :  { %v604_v39 = vmul.f32 %v601_v35, %v3817_v17  ;;  %v605_v40 = vmul.f32 %v601_v35, %v3820_v19  ;;  %v628_v42 = vmul.f32 %v627_v41, %v3809_v12  ;;  %v629_v43 = vmul.f32 %v627_v41, %v3812_v15 }
  0xb6   :  { %v630_v44 = vmul.f32 %v627_v41, %v3817_v17  ;;  %v219_v35 = vstv %s218_s22  ;;  %s3356_s22 = sld [smem:[#allocation8 + $0x53]] }
  0xb8   :  { %310 = vrot.lane.b32.xlu0 %v300_v45, %s3539_s2  ;;  %312 = vrot.lane.b32.xlu1 %v301_v46, %s3539_s2  ;;  %v631_v45 = vmul.f32 %v627_v41, %v3820_v19  ;;  %v653_v46 = vstv %s3331_s13  ;;  %s3334_s13 = sld [smem:[#allocation8 + $0x6]] }
  0xb9   :  { %v654_v47 = vmul.f32 %v653_v46, %v3809_v12 }
  0xbc   :  { %332 = vrot.lane.b32.xlu0 %v324_v48, %s3539_s2  ;;  %334 = vrot.lane.b32.xlu1 %v325_v49, %s3539_s2  ;;  %v655_v48 = vmul.f32 %v653_v46, %v3812_v15  ;;  %v656_v49 = vmul.f32 %v653_v46, %v3817_v17 }
  0xc0   :  { %336 = vrot.lane.b32.xlu0 %v326_v50, %s3539_s2  ;;  %338 = vrot.lane.b32.xlu1 %v327_v51, %s3539_s2  ;;  %v657_v50 = vmul.f32 %v653_v46, %v3820_v19  ;;  %v679_v51 = vstv %s3332_s14  ;;  %s3353_s14 = sld [smem:[#allocation8 + $0x76]] }
  0xc1   :  { %v680_v52 = vmul.f32 %v679_v51, %v3809_v12  ;;  %v683_v57 = vmul.f32 %v679_v51, %v3820_v19 }
  0xc4   :  { %358 = vrot.lane.b32.xlu0 %v350_v53, %s3539_s2  ;;  %360 = vrot.lane.b32.xlu1 %v351_v54, %s3539_s2  ;;  %v681_v53 = vmul.f32 %v679_v51, %v3812_v15 }
  0xc8   :  { %362 = vrot.lane.b32.xlu0 %v352_v55, %s3539_s2  ;;  %364 = vrot.lane.b32.xlu1 %v353_v56, %s3539_s2  ;;  %v682_v55 = vmul.f32 %v679_v51, %v3817_v17 }
  0xcc   :  { %384 = vrot.lane.b32.xlu0 %v376_v58, %s3540_s5  ;;  %386 = vrot.lane.b32.xlu1 %v377_v59, %s3540_s5  ;;  %v705_v58 = vstv %s3333_s17  ;;  %s3335_s17 = sld [smem:[#allocation8 + $0x2a]] }
  0xcd   :  { %v707_v62 = vmul.f32 %v705_v58, %v3812_v15  ;;  %v709_v3 = vmul.f32 %v705_v58, %v3820_v19 }
  0xd0   :  { %388 = vrot.lane.b32.xlu0 %v378_v60, %s3540_s5  ;;  %390 = vrot.lane.b32.xlu1 %v379_v61, %s3540_s5  ;;  %v706_v60 = vmul.f32 %v705_v58, %v3809_v12 }
  0xd4   :  { %410 = vrot.lane.b32.xlu0 %v402_v63, %s3540_s5  ;;  %412 = vrot.lane.b32.xlu1 %v403_v0, %s3540_s5  ;;  %v708_v0 = vmul.f32 %v705_v58, %v3817_v17 }
  0xd8   :  { %414 = vrot.lane.b32.xlu0 %v404_v1, %s3540_s5  ;;  %416 = vrot.lane.b32.xlu1 %v405_v2, %s3540_s5  ;;  %v3891_v1 = vld [vmem:[#allocation2 + $0x4] sm:$0xff] }
  0xdc   :  { %436 = vrot.lane.b32.xlu0 %v428_v4, %s3540_s5  ;;  %438 = vrot.lane.b32.xlu1 %v429_v5, %s3540_s5  ;;  %v775_v4 = vstv %s3338_s18  ;;  %v3896_v5 = vld [vmem:[#allocation2 + $0xc] sm:$0xff]  ;;  %s4164_s18 = sld [smem:[#allocation8 + $0xb]] }
  0xdd   :  { %v778_v14 = vmul.f32 %v775_v4, %v3903_v8 }
  0xe0   :  { %440 = vrot.lane.b32.xlu0 %v430_v6, %s3540_s5  ;;  %442 = vrot.lane.b32.xlu1 %v431_v7, %s3540_s5  ;;  %v776_v7 = vmul.f32 %v775_v4, %v3891_v1 }
  0xe4   :  { %462 = vrot.lane.b32.xlu0 %v454_v9, %s3540_s5  ;;  %464 = vrot.lane.b32.xlu1 %v455_v10, %s3540_s5  ;;  %v777_v10 = vmul.f32 %v775_v4, %v3896_v5 }
  0xe8   :  { %466 = vrot.lane.b32.xlu0 %v456_v11, %s3540_s5  ;;  %468 = vrot.lane.b32.xlu1 %v457_v13, %s3540_s5  ;;  %v3908_v11 = vld [vmem:[#allocation2 + $0x6c] sm:$0xff] }
  0xec   :  { %532 = vrot.lane.b32.xlu0 %v524_v16, %s3539_s2  ;;  %534 = vrot.lane.b32.xlu1 %v525_v18, %s3539_s2  ;;  %v779_v18 = vmul.f32 %v775_v4, %v3908_v11 }
  0xf0   :  { %536 = vrot.lane.b32.xlu0 %v526_v20, %s3539_s2  ;;  %538 = vrot.lane.b32.xlu1 %v527_v21, %s3539_s2  ;;  %v801_v20 = vstv %s3339_s19  ;;  %s4183_s19 = sld [smem:[#allocation8 + $0x4e]] }
  0xf1   :  { %v802_v23 = vmul.f32 %v801_v20, %v3891_v1  ;;  %v804_v29 = vmul.f32 %v801_v20, %v3903_v8 }
  0xf4   :  { %558 = vrot.lane.b32.xlu0 %v550_v24, %s3539_s2  ;;  %560 = vrot.lane.b32.xlu1 %v551_v25, %s3539_s2  ;;  %v803_v25 = vmul.f32 %v801_v20, %v3896_v5 }
  0xf8   :  { %562 = vrot.lane.b32.xlu0 %v552_v26, %s3539_s2  ;;  %564 = vrot.lane.b32.xlu1 %v553_v27, %s3539_s2  ;;  %v231_v26 = vstv %s230_s20  ;;  %s4197_s20 = sld [smem:[#allocation8 + $0x2f]] }
  0xf9   :  { %v234_v41 = vmul.f32 %v231_v26, %v3744_v34  ;;  %v235_v46 = vmul.f32 %v231_v26, %v3746_v37 }
  0xfc   :  { %584 = vrot.lane.b32.xlu0 %v576_v30, %s3539_s2  ;;  %586 = vrot.lane.b32.xlu1 %v577_v31, %s3539_s2  ;;  %v232_v30 = vmul.f32 %v231_v26, %v3728_v22 }
 0x100   :  { %588 = vrot.lane.b32.xlu0 %v578_v32, %s3539_s2  ;;  %590 = vrot.lane.b32.xlu1 %v579_v33, %s3539_s2  ;;  %v805_v32 = vmul.f32 %v801_v20, %v3908_v11  ;;  %v827_v33 = vstv %s3340_s21  ;;  %s4217_s21 = sld [smem:[#allocation8 + $0x72]] }
 0x104   :  { %610 = vrot.lane.b32.xlu0 %v602_v36, %s3539_s2  ;;  %612 = vrot.lane.b32.xlu1 %v603_v38, %s3539_s2  ;;  %v233_v36 = vmul.f32 %v231_v26, %v3734_v28 }
 0x108   :  { %614 = vrot.lane.b32.xlu0 %v604_v39, %s3539_s2  ;;  %616 = vrot.lane.b32.xlu1 %v605_v40, %s3539_s2  ;;  %v828_v39 = vmul.f32 %v827_v33, %v3891_v1  ;;  %v236_v40 = vadd.f32 %v232_v30, %v219_v35 }
 0x10c   :  { %636 = vrot.lane.b32.xlu0 %v628_v42, %s3540_s5  ;;  %638 = vrot.lane.b32.xlu1 %v629_v43, %s3540_s5  ;;  %v241_v42 = vstv %s3311_s23  ;;  %s3357_s23 = sld [smem:[#allocation8 + $0x77]] }
 0x10d   :  { %v242_v51 = vmul.f32 %v241_v42, %v3728_v22 }
 0x110   :  { %640 = vrot.lane.b32.xlu0 %v630_v44, %s3540_s5  ;;  %642 = vrot.lane.b32.xlu1 %v631_v45, %s3540_s5  ;;  %v829_v44 = vmul.f32 %v827_v33, %v3896_v5  ;;  %v237_v45 = vadd.f32 %v233_v36, %v219_v35 }
 0x112   :  { %v3872_v54 = vpop.permute.xlu0 %280 }
 0x114   :  { %662 = vrot.lane.b32.xlu0 %v654_v47, %s3540_s5  ;;  %664 = vrot.lane.b32.xlu1 %v655_v48, %s3540_s5  ;;  %v483_v47 = vstv %s3322_s24  ;;  %v292_v48 = vadd.f32 %v3872_v54, %v236_v40  ;;  %v831_v54 = vmul.f32 %v827_v33, %v3908_v11  ;;  %s3362_s24 = sld [smem:[#allocation8 + $0xd]] }
 0x115   :  { %v485_v4 = vmul.f32 %v483_v47, %v3812_v15  ;;  %v487_v40 = vmul.f32 %v483_v47, %v3820_v19 }
 0x116   :  { %v3875_v56 = vpop.permute.xlu1 %282 }
 0x118   :  { %666 = vrot.lane.b32.xlu0 %v656_v49, %s3540_s5  ;;  %668 = vrot.lane.b32.xlu1 %v657_v50, %s3540_s5  ;;  %v221_v49 = vstv %s3308_s25  ;;  %v293_v50 = vadd.f32 %v3875_v56, %v237_v45  ;;  %v879_v45 = vstv %s3957_s28  ;;  %s3363_s25 = sld [smem:[#allocation8 + $0x31]] }
 0x119   :  { %s4357_s28 = sld [smem:[#allocation8 + $0xe]] }
 0x11c   :  { %688 = vrot.lane.b32.xlu0 %v680_v52, %s3540_s5  ;;  %690 = vrot.lane.b32.xlu1 %v681_v53, %s3540_s5  ;;  %v830_v53 = vmul.f32 %v827_v33, %v3903_v8 }
 0x120   :  { %692 = vrot.lane.b32.xlu0 %v682_v55, %s3540_s5  ;;  %694 = vrot.lane.b32.xlu1 %v683_v57, %s3540_s5  ;;  %v853_v55 = vstv %s3931_s26  ;;  %v238_v57 = vadd.f32 %v234_v41, %v219_v35  ;;  %s3364_s26 = sld [smem:[#allocation8 + $0x55]] }
 0x121   :  { %v854_v26 = vmul.f32 %v853_v55, %v3891_v1  ;;  %v855_v33 = vmul.f32 %v853_v55, %v3896_v5 }
 0x122   :  { %v3880_v59 = vpop.permute.xlu0 %284  ;;  %v3883_v61 = vpop.permute.xlu1 %286 }
 0x124   :  { %714 = vrot.lane.b32.xlu0 %v706_v60, %s3540_s5  ;;  %716 = vrot.lane.b32.xlu1 %v707_v62, %s3540_s5  ;;  %v484_v62 = vmul.f32 %v483_v47, %v3809_v12 }
 0x126   :  { %v3888_v63 = vpop.permute.xlu0 %306  ;;  %v3893_v2 = vpop.permute.xlu1 %308 }
 0x128   :  { %718 = vrot.lane.b32.xlu0 %v708_v0, %s3540_s5  ;;  %720 = vrot.lane.b32.xlu1 %v709_v3, %s3540_s5  ;;  %v239_v0 = vadd.f32 %v235_v46, %v219_v35  ;;  %v243_v3 = vmul.f32 %v241_v42, %v3734_v28  ;;  %v486_v35 = vmul.f32 %v483_v47, %v3817_v17 }
 0x12a   :  { %v3900_v6 = vpop.permute.xlu0 %310  ;;  %v3905_v9 = vpop.permute.xlu1 %312  ;;  %v295_v20 = vadd.f32 %v3883_v61, %v239_v0  ;;  %v247_v36 = vadd.f32 %v243_v3, %v221_v49  ;;  %v261_v3 = vstv %s3966_s29  ;;  %s4376_s29 = sld [smem:[#allocation8 + $0x51]] }
 0x12c   :  { %784 = vrot.lane.b32.xlu0 %v776_v7, %s3539_s2  ;;  %786 = vrot.lane.b32.xlu1 %v777_v10, %s3539_s2  ;;  %v294_v7 = vadd.f32 %v3880_v59, %v238_v57  ;;  %v251_v10 = vstv %s3938_s0  ;;  %v244_v59 = vmul.f32 %v241_v42, %v3744_v34  ;;  %v857_v57 = vmul.f32 %v853_v55, %v3908_v11  ;;  %s3346_s0 = sld [smem:[#allocation8 + $0x9]] }
 0x12e   :  { %v3912_v13 = vpop.permute.xlu0 %332  ;;  %v3915_v16 = vpop.permute.xlu1 %334 }
 0x130   :  { %788 = vrot.lane.b32.xlu0 %v778_v14, %s3539_s2  ;;  %790 = vrot.lane.b32.xlu1 %v779_v18, %s3539_s2  ;;  %v493_v18 = vstv %s3942_s1  ;;  %s3365_s1 = sld [smem:[#allocation8 + $0x79]] }
 0x132   :  { %v3920_v21 = vpop.permute.xlu0 %336  ;;  %v3923_v24 = vpop.permute.xlu1 %338 }
 0x134   :  { %810 = vrot.lane.b32.xlu0 %v802_v23, %s3539_s2  ;;  %812 = vrot.lane.b32.xlu1 %v803_v25, %s3539_s2  ;;  %v246_v23 = vadd.f32 %v242_v51, %v221_v49  ;;  %v856_v51 = vmul.f32 %v853_v55, %v3903_v8 }
 0x136   :  { %v3928_v27 = vpop.permute.xlu0 %358  ;;  %v3934_v31 = vpop.permute.xlu1 %360  ;;  %v318_v41 = vadd.f32 %v3888_v63, %v246_v23  ;;  %v248_v63 = vadd.f32 %v244_v59, %v221_v49  ;;  %v881_v59 = vmul.f32 %v879_v45, %v3896_v5 }
 0x138   :  { %814 = vrot.lane.b32.xlu0 %v804_v29, %s3539_s2  ;;  %816 = vrot.lane.b32.xlu1 %v805_v32, %s3539_s2  ;;  %v320_v0 = vadd.f32 %v3900_v6, %v248_v63  ;;  %v254_v6 = vmul.f32 %v251_v10, %v3744_v34  ;;  %v883_v63 = vmul.f32 %v879_v45, %v3908_v11 }
 0x13a   :  { %v3944_v38 = vpop.permute.xlu0 %362  ;;  %v3948_v43 = vpop.permute.xlu1 %364 }
 0x13c   :  { %836 = vrot.lane.b32.xlu0 %v828_v39, %s3539_s2  ;;  %838 = vrot.lane.b32.xlu1 %v829_v44, %s3539_s2  ;;  %v245_v39 = vmul.f32 %v241_v42, %v3746_v37  ;;  %v223_v44 = vstv %s3952_s27  ;;  %v252_v42 = vmul.f32 %v251_v10, %v3728_v22  ;;  %s3347_s27 = sld [smem:[#allocation8 + $0x2d]] }
 0x13e   :  { %v385_v52 = vpop.permute.xlu0 %384  ;;  %v387_v58 = vpop.permute.xlu1 %386 }
 0x13f   :  { %v396_v60 = vadd.f32 %v385_v52, %v292_v48  ;;  %v397_v56 = vadd.f32 %v387_v58, %v293_v50  ;;  %v319_v48 = vadd.f32 %v3893_v2, %v247_v36  ;;  %v494_v58 = vmul.f32 %v493_v18, %v3809_v12 }
 0x140   :  { %840 = vrot.lane.b32.xlu0 %v830_v53, %s3539_s2  ;;  %842 = vrot.lane.b32.xlu1 %v831_v54, %s3539_s2  ;;  %v253_v54 = vmul.f32 %v251_v10, %v3734_v28 }
 0x141   :  { %v3973_v14 = vadd.f32 %v484_v62, %v396_v60  ;;  %v3980_v29 = vadd.f32 %v485_v4, %v397_v56  ;;  %v249_v60 = vadd.f32 %v245_v39, %v221_v49  ;;  %v495_v62 = vmul.f32 %v493_v18, %v3812_v15 }
 0x142   :  { %v389_v25 = vpop.permute.xlu0 %388  ;;  %v391_v30 = vpop.permute.xlu1 %390  ;;  %v503_v4 = vstv %s3976_s30  ;;  %v256_v49 = vadd.f32 %v252_v42, %v223_v44  ;;  %v225_v39 = vstv %s3986_s4  ;;  %s4390_s30 = sld [smem:[#allocation8 + $0x32]] }
 0x143   :  { %v398_v32 = vadd.f32 %v389_v25, %v294_v7  ;;  %v399_v61 = vadd.f32 %v391_v30, %v295_v20  ;;  %v321_v55 = vadd.f32 %v3905_v9, %v249_v60  ;;  %v880_v20 = vmul.f32 %v879_v45, %v3891_v1  ;;  %s4410_s4 = sld [smem:[#allocation8 + $0x75]] }
 0x144   :  { %862 = vrot.lane.b32.xlu0 %v854_v26, %s3539_s2  ;;  %864 = vrot.lane.b32.xlu1 %v855_v33, %s3539_s2  ;;  %v496_v30 = vmul.f32 %v493_v18, %v3817_v17  ;;  %v255_v33 = vmul.f32 %v251_v10, %v3746_v37  ;;  %v344_v36 = vadd.f32 %v3912_v13, %v256_v49 }
 0x145   :  { %v3996_v46 = vadd.f32 %v486_v35, %v398_v32  ;;  %v4001_v47 = vadd.f32 %v487_v40, %v399_v61  ;;  %v257_v32 = vadd.f32 %v253_v54, %v223_v44  ;;  %v497_v35 = vmul.f32 %v493_v18, %v3820_v19 }
 0x146   :  { %v411_v50 = vpop.permute.xlu0 %410  ;;  %v413_v52 = vpop.permute.xlu1 %412  ;;  %v905_v61 = vstv %s3994_s6  ;;  %v882_v10 = vmul.f32 %v879_v45, %v3903_v8  ;;  %v258_v18 = vadd.f32 %v254_v6, %v223_v44  ;;  %v513_v54 = vstv %s4014_s7  ;;  %s3368_s6 = sld [smem:[#allocation8 + $0x56]] }
 0x147   :  { %v422_v53 = vadd.f32 %v411_v50, %v318_v41  ;;  %v423_v2 = vadd.f32 %v413_v52, %v319_v48  ;;  %v345_v41 = vadd.f32 %v3915_v16, %v257_v32  ;;  %v262_v48 = vmul.f32 %v261_v3, %v3728_v22  ;;  %s3369_s7 = sld [smem:[#allocation8 + $0x7a]] }
 0x148   :  { %866 = vrot.lane.b32.xlu0 %v856_v51, %s3539_s2  ;;  %868 = vrot.lane.b32.xlu1 %v857_v57, %s3539_s2  ;;  %v504_v52 = vmul.f32 %v503_v4, %v3809_v12  ;;  %v263_v16 = vmul.f32 %v261_v3, %v3734_v28  ;;  %v505_v22 = vmul.f32 %v503_v4, %v3812_v15 }
 0x149   :  { %v4011_v56 = vadd.f32 %v494_v58, %v422_v53  ;;  %v4018_v23 = vadd.f32 %v495_v62, %v423_v2  ;;  %v259_v53 = vadd.f32 %v255_v33, %v223_v44  ;;  %v346_v58 = vadd.f32 %v3920_v21, %v258_v18 }
 0x14a   :  { %v415_v7 = vpop.permute.xlu0 %414  ;;  %v417_v25 = vpop.permute.xlu1 %416  ;;  %v266_v45 = vadd.f32 %v262_v48, %v225_v39  ;;  %v906_v44 = vmul.f32 %v905_v61, %v3891_v1  ;;  %v264_v28 = vmul.f32 %v261_v3, %v3744_v34  ;;  %v907_v21 = vmul.f32 %v905_v61, %v3896_v5 }
 0x14b   :  { %v424_v26 = vadd.f32 %v415_v7, %v320_v0  ;;  %v425_v9 = vadd.f32 %v417_v25, %v321_v55  ;;  %v347_v2 = vadd.f32 %v3923_v24, %v259_v53  ;;  %v506_v7 = vmul.f32 %v503_v4, %v3817_v17 }
 0x14c   :  { %888 = vrot.lane.b32.xlu0 %v880_v20, %s3540_s5  ;;  %890 = vrot.lane.b32.xlu1 %v881_v59, %s3540_s5  ;;  %v267_v20 = vadd.f32 %v263_v16, %v225_v39  ;;  %v265_v6 = vmul.f32 %v261_v3, %v3746_v37  ;;  %v507_v24 = vmul.f32 %v503_v4, %v3820_v19  ;;  %v931_v33 = vstv %s4035_s8  ;;  %s3374_s8 = sld [smem:[#allocation8 + $0x10]] }
 0x14d   :  { %v4030_v40 = vadd.f32 %v496_v30, %v424_v26  ;;  %v4037_v50 = vadd.f32 %v497_v35, %v425_v9  ;;  %v370_v26 = vadd.f32 %v3928_v27, %v266_v45  ;;  %v908_v32 = vmul.f32 %v905_v61, %v3903_v8 }
 0x14e   :  { %v437_v42 = vpop.permute.xlu0 %436  ;;  %v439_v13 = vpop.permute.xlu1 %438  ;;  %v371_v59 = vadd.f32 %v3934_v31, %v267_v20  ;;  %v268_v37 = vadd.f32 %v264_v28, %v225_v39  ;;  %v514_v27 = vmul.f32 %v513_v54, %v3809_v12  ;;  %v269_v4 = vadd.f32 %v265_v6, %v225_v39  ;;  %v4118_v6 = vld [vmem:[#allocation2 + $0x78] sm:$0xff] }
 0x14f   :  { %v448_v51 = vadd.f32 %v437_v42, %v344_v36  ;;  %v449_v57 = vadd.f32 %v439_v13, %v345_v41  ;;  %v909_v36 = vmul.f32 %v905_v61, %v3908_v11  ;;  %v515_v31 = vmul.f32 %v513_v54, %v3812_v15 }
 0x150   :  { %892 = vrot.lane.b32.xlu0 %v882_v10, %s3540_s5  ;;  %894 = vrot.lane.b32.xlu1 %v883_v63, %s3540_s5  ;;  %v372_v48 = vadd.f32 %v3944_v38, %v268_v37  ;;  %v373_v10 = vadd.f32 %v3948_v43, %v269_v4  ;;  %v932_v61 = vmul.f32 %v931_v33, %v3891_v1  ;;  %v1054_v37 = vstv %s3351_s11  ;;  %s3358_s11 = sld [smem:[#allocation8 + $0xc]] }
 0x151   :  { %v4046_v60 = vadd.f32 %v504_v52, %v448_v51  ;;  %v4051_v0 = vadd.f32 %v505_v22, %v449_v57  ;;  %v933_v51 = vmul.f32 %v931_v33, %v3896_v5  ;;  %v516_v63 = vmul.f32 %v513_v54, %v3817_v17 }
 0x152   :  { %v441_v62 = vpop.permute.xlu0 %440  ;;  %v443_v55 = vpop.permute.xlu1 %442  ;;  %v517_v38 = vmul.f32 %v513_v54, %v3820_v19  ;;  %v934_v53 = vmul.f32 %v931_v33, %v3903_v8  ;;  %v935_v22 = vmul.f32 %v931_v33, %v3908_v11 }
 0x153   :  { %v450_v49 = vadd.f32 %v441_v62, %v346_v58  ;;  %v451_v25 = vadd.f32 %v443_v55, %v347_v2  ;;  %v957_v58 = vstv %s3345_s9  ;;  %s3375_s9 = sld [smem:[#allocation8 + $0x34]] }
 0x154   :  { %914 = vrot.lane.b32.xlu0 %v906_v44, %s3540_s5  ;;  %916 = vrot.lane.b32.xlu1 %v907_v21, %s3540_s5  ;;  %v958_v19 = vmul.f32 %v957_v58, %v3891_v1  ;;  %v959_v2 = vmul.f32 %v957_v58, %v3896_v5  ;;  %v960_v62 = vmul.f32 %v957_v58, %v3903_v8  ;;  %v4106_v44 = vld [vmem:[#allocation2 + $0x18] sm:$0xff]  ;;  %v4111_v21 = vld [vmem:[#allocation2 + $0x20] sm:$0xff] }
 0x155   :  { %v4061_v34 = vadd.f32 %v506_v7, %v450_v49  ;;  %v4066_v9 = vadd.f32 %v507_v24, %v451_v25  ;;  %v961_v55 = vmul.f32 %v957_v58, %v3908_v11  ;;  %v1028_v49 = vstv %s3350_s10  ;;  %s3376_s10 = sld [smem:[#allocation8 + $0x58]] }
 0x156   :  { %v463_v30 = vpop.permute.xlu0 %462  ;;  %v465_v3 = vpop.permute.xlu1 %464  ;;  %v1029_v20 = vmul.f32 %v1028_v49, %v4106_v44  ;;  %v1030_v24 = vmul.f32 %v1028_v49, %v4111_v21 }
 0x157   :  { %v474_v35 = vadd.f32 %v463_v30, %v370_v26  ;;  %v475_v41 = vadd.f32 %v465_v3, %v371_v59  ;;  %v4123_v26 = vld [vmem:[#allocation2 + $0x80] sm:$0xff]  ;;  %v1031_v30 = vmul.f32 %v1028_v49, %v4118_v6 }
 0x158   :  { %918 = vrot.lane.b32.xlu0 %v908_v32, %s3540_s5  ;;  %920 = vrot.lane.b32.xlu1 %v909_v36, %s3540_s5  ;;  %v1032_v33 = vmul.f32 %v1028_v49, %v4123_v26 }
 0x159   :  { %v4074_v42 = vadd.f32 %v514_v27, %v474_v35  ;;  %v4078_v13 = vadd.f32 %v515_v31, %v475_v41  ;;  %v1055_v35 = vmul.f32 %v1054_v37, %v4106_v44  ;;  %v1056_v27 = vmul.f32 %v1054_v37, %v4111_v21 }
 0x15a   :  { %v467_v18 = vpop.permute.xlu0 %466  ;;  %v469_v12 = vpop.permute.xlu1 %468  ;;  %v1057_v41 = vmul.f32 %v1054_v37, %v4118_v6 }
 0x15b   :  { %v476_v39 = vadd.f32 %v467_v18, %v372_v48  ;;  %v477_v15 = vadd.f32 %v469_v12, %v373_v10  ;;  %v1058_v48 = vmul.f32 %v1054_v37, %v4123_v26  ;;  %v1080_v10 = vstv %s3352_s12  ;;  %s3377_s12 = sld [smem:[#allocation8 + $0x7c]] }
 0x15c   :  { %940 = vrot.lane.b32.xlu0 %v932_v61, %s3540_s5  ;;  %942 = vrot.lane.b32.xlu1 %v933_v51, %s3540_s5  ;;  %v1081_v61 = vmul.f32 %v1080_v10, %v4106_v44  ;;  %v735_v51 = vstv %s3334_s13  ;;  %s3359_s13 = sld [smem:[#allocation8 + $0x30]] }
 0x15d   :  { %v4085_v52 = vadd.f32 %v516_v63, %v476_v39  ;;  %v4090_v16 = vadd.f32 %v517_v38, %v477_v15  ;;  %v1082_v39 = vmul.f32 %v1080_v10, %v4111_v21 }
 0x15e   :  { %v4087_v43 = vpop.permute.xlu0 %532  ;;  %v535_v57 = vpop.permute.xlu1 %534 }
 0x15f   :  { %v544_v63 = vadd.f32 %v4087_v43, %v3973_v14  ;;  %v545_v15 = vadd.f32 %v535_v57, %v3980_v29  ;;  %v737_v14 = vmul.f32 %v735_v51, %v3896_v5 }
 0x160   :  { %944 = vrot.lane.b32.xlu0 %v934_v53, %s3540_s5  ;;  %946 = vrot.lane.b32.xlu1 %v935_v22, %s3540_s5  ;;  %v1083_v53 = vmul.f32 %v1080_v10, %v4118_v6 }
 0x162   :  { %v4095_v17 = vpop.permute.xlu0 %536  ;;  %v4098_v54 = vpop.permute.xlu1 %538 }
 0x163   :  { %v546_v29 = vadd.f32 %v4095_v17, %v3996_v46  ;;  %v547_v57 = vadd.f32 %v4098_v54, %v4001_v47  ;;  %v739_v17 = vmul.f32 %v735_v51, %v3908_v11 }
 0x164   :  { %966 = vrot.lane.b32.xlu0 %v958_v19, %s3540_s5  ;;  %968 = vrot.lane.b32.xlu1 %v959_v2, %s3540_s5  ;;  %v1084_v19 = vmul.f32 %v1080_v10, %v4123_v26  ;;  %v1106_v2 = vstv %s3353_s14  ;;  %s4550_s14 = sld [smem:[#allocation8 + $0x11]] }
 0x165   :  { %v1108_v37 = vmul.f32 %v1106_v2, %v4111_v21  ;;  %v1109_v10 = vmul.f32 %v1106_v2, %v4118_v6 }
 0x166   :  { %v4103_v45 = vpop.permute.xlu0 %558  ;;  %v4108_v28 = vpop.permute.xlu1 %560 }
 0x167   :  { %v570_v47 = vadd.f32 %v4103_v45, %v4011_v56 }
 0x168   :  { %970 = vrot.lane.b32.xlu0 %v960_v62, %s3540_s5  ;;  %972 = vrot.lane.b32.xlu1 %v961_v55, %s3540_s5  ;;  %v736_v62 = vmul.f32 %v735_v51, %v3891_v1 }
 0x16a   :  { %v4115_v7 = vpop.permute.xlu0 %562  ;;  %v4120_v25 = vpop.permute.xlu1 %564 }
 0x16c   :  { %1037 = vrot.lane.b32.xlu0 %v1029_v20, %s3539_s2  ;;  %1039 = vrot.lane.b32.xlu1 %v1030_v24, %s3539_s2  ;;  %v1107_v20 = vmul.f32 %v1106_v2, %v4106_v44 }
 0x16e   :  { %v4127_v59 = vpop.permute.xlu0 %584  ;;  %v4130_v32 = vpop.permute.xlu1 %586 }
 0x170   :  { %1041 = vrot.lane.b32.xlu0 %v1031_v30, %s3539_s2  ;;  %1043 = vrot.lane.b32.xlu1 %v1032_v33, %s3539_s2 }
 0x172   :  { %v4135_v3 = vpop.permute.xlu0 %588  ;;  %v4138_v36 = vpop.permute.xlu1 %590 }
 0x174   :  { %1063 = vrot.lane.b32.xlu0 %v1055_v35, %s3539_s2  ;;  %1065 = vrot.lane.b32.xlu1 %v1056_v27, %s3539_s2  ;;  %v738_v35 = vmul.f32 %v735_v51, %v3903_v8  ;;  %v745_v27 = vstv %s3335_s17  ;;  %s4569_s17 = sld [smem:[#allocation8 + $0x54]] }
 0x175   :  { %v746_v56 = vmul.f32 %v745_v27, %v3891_v1 }
 0x176   :  { %v4143_v4 = vpop.permute.xlu0 %610  ;;  %v4146_v31 = vpop.permute.xlu1 %612 }
 0x178   :  { %1067 = vrot.lane.b32.xlu0 %v1057_v41, %s3539_s2  ;;  %1069 = vrot.lane.b32.xlu1 %v1058_v48, %s3539_s2  ;;  %v571_v41 = vadd.f32 %v4108_v28, %v4018_v23  ;;  %v747_v23 = vmul.f32 %v745_v27, %v3896_v5  ;;  %v572_v28 = vadd.f32 %v4115_v7, %v4030_v40 }
 0x179   :  { %v749_v7 = vmul.f32 %v745_v27, %v3908_v11 }
 0x17a   :  { %v4151_v18 = vpop.permute.xlu0 %614  ;;  %v4154_v12 = vpop.permute.xlu1 %616 }
 0x17c   :  { %1089 = vrot.lane.b32.xlu0 %v1081_v61, %s3539_s2  ;;  %1091 = vrot.lane.b32.xlu1 %v1082_v39, %s3539_s2 }
 0x17e   :  { %v637_v38 = vpop.permute.xlu0 %636  ;;  %v639_v22 = vpop.permute.xlu1 %638 }
 0x17f   :  { %v648_v58 = vadd.f32 %v637_v38, %v544_v63  ;;  %v649_v55 = vadd.f32 %v639_v22, %v545_v15  ;;  %v1110_v63 = vmul.f32 %v1106_v2, %v4123_v26  ;;  %v1132_v15 = vstv %s4164_s18  ;;  %s4583_s18 = sld [smem:[#allocation8 + $0x35]] }
 0x180   :  { %1093 = vrot.lane.b32.xlu0 %v1083_v53, %s3539_s2  ;;  %1095 = vrot.lane.b32.xlu1 %v1084_v19, %s3539_s2  ;;  %v573_v53 = vadd.f32 %v4120_v25, %v4037_v50  ;;  %v596_v50 = vadd.f32 %v4127_v59, %v4046_v60 }
 0x181   :  { %v4172_v43 = vadd.f32 %v736_v62, %v648_v58  ;;  %v4177_v24 = vadd.f32 %v737_v14, %v649_v55  ;;  %v1133_v58 = vmul.f32 %v1132_v15, %v4106_v44  ;;  %v1134_v55 = vmul.f32 %v1132_v15, %v4111_v21 }
 0x182   :  { %v641_v49 = vpop.permute.xlu0 %640  ;;  %v643_v30 = vpop.permute.xlu1 %642  ;;  %v748_v14 = vmul.f32 %v745_v27, %v3903_v8  ;;  %v599_v27 = vadd.f32 %v4138_v36, %v4066_v9  ;;  %v622_v9 = vadd.f32 %v4143_v4, %v4074_v42 }
 0x183   :  { %v650_v33 = vadd.f32 %v641_v49, %v546_v29  ;;  %v651_v46 = vadd.f32 %v643_v30, %v547_v57  ;;  %v755_v29 = vstv %s4183_s19  ;;  %v597_v57 = vadd.f32 %v4130_v32, %v4051_v0  ;;  %s4603_s19 = sld [smem:[#allocation8 + $0x78]] }
 0x184   :  { %1115 = vrot.lane.b32.xlu0 %v1107_v20, %s3539_s2  ;;  %1117 = vrot.lane.b32.xlu1 %v1108_v37, %s3539_s2  ;;  %v1135_v20 = vmul.f32 %v1132_v15, %v4118_v6  ;;  %v756_v60 = vmul.f32 %v755_v29, %v3891_v1  ;;  %v598_v0 = vadd.f32 %v4135_v3, %v4061_v34  ;;  %v765_v3 = vstv %s4217_s21  ;;  %s3381_s21 = sld [smem:[#allocation8 + $0x7d]] }
 0x185   :  { %v4188_v54 = vadd.f32 %v738_v35, %v650_v33  ;;  %v4193_v61 = vadd.f32 %v739_v17, %v651_v46  ;;  %v1136_v35 = vmul.f32 %v1132_v15, %v4123_v26  ;;  %v1158_v46 = vstv %s4197_s20  ;;  %s3380_s20 = sld [smem:[#allocation8 + $0x59]] }
 0x186   :  { %v663_v48 = vpop.permute.xlu0 %662  ;;  %v665_v39 = vpop.permute.xlu1 %664  ;;  %v757_v17 = vmul.f32 %v755_v29, %v3896_v5  ;;  %v759_v34 = vmul.f32 %v755_v29, %v3908_v11  ;;  %v766_v42 = vmul.f32 %v765_v3, %v3891_v1 }
 0x187   :  { %v674_v51 = vadd.f32 %v663_v48, %v570_v47  ;;  %v675_v45 = vadd.f32 %v665_v39, %v571_v41  ;;  %v1159_v41 = vmul.f32 %v1158_v46, %v4106_v44 }
 0x188   :  { %1119 = vrot.lane.b32.xlu0 %v1109_v10, %s3539_s2  ;;  %1121 = vrot.lane.b32.xlu1 %v1110_v63, %s3539_s2  ;;  %v758_v63 = vmul.f32 %v755_v29, %v3903_v8 }
 0x189   :  { %v4205_v38 = vadd.f32 %v746_v56, %v674_v51  ;;  %v4210_v19 = vadd.f32 %v747_v23, %v675_v45  ;;  %v1160_v51 = vmul.f32 %v1158_v46, %v4111_v21  ;;  %v623_v56 = vadd.f32 %v4146_v31, %v4078_v13 }
 0x18a   :  { %v667_v22 = vpop.permute.xlu0 %666  ;;  %v669_v2 = vpop.permute.xlu1 %668  ;;  %v1161_v23 = vmul.f32 %v1158_v46, %v4118_v6  ;;  %v624_v13 = vadd.f32 %v4151_v18, %v4085_v52  ;;  %v769_v52 = vmul.f32 %v765_v3, %v3908_v11 }
 0x18b   :  { %v676_v62 = vadd.f32 %v667_v22, %v572_v28  ;;  %v677_v40 = vadd.f32 %v669_v2, %v573_v53  ;;  %v1184_v2 = vstv %s3356_s22  ;;  %s3386_s22 = sld [smem:[#allocation8 + $0x13]] }
 0x18c   :  { %1141 = vrot.lane.b32.xlu0 %v1133_v58, %s3540_s5  ;;  %1143 = vrot.lane.b32.xlu1 %v1134_v55, %s3540_s5  ;;  %v1162_v58 = vmul.f32 %v1158_v46, %v4123_v26  ;;  %v625_v55 = vadd.f32 %v4154_v12, %v4090_v16  ;;  %v1187_v12 = vmul.f32 %v1184_v2, %v4118_v6 }
 0x18d   :  { %v4222_v25 = vadd.f32 %v748_v14, %v676_v62  ;;  %v4227_v30 = vadd.f32 %v749_v7, %v677_v40  ;;  %v767_v62 = vmul.f32 %v765_v3, %v3896_v5  ;;  %v1185_v40 = vmul.f32 %v1184_v2, %v4106_v44 }
 0x18e   :  { %v689_v49 = vpop.permute.xlu0 %688  ;;  %v691_v33 = vpop.permute.xlu1 %690  ;;  %v768_v5 = vmul.f32 %v765_v3, %v3903_v8 }
 0x18f   :  { %v700_v37 = vadd.f32 %v689_v49, %v596_v50  ;;  %v701_v59 = vadd.f32 %v691_v33, %v597_v57  ;;  %v1186_v50 = vmul.f32 %v1184_v2, %v4111_v21  ;;  %v1188_v33 = vmul.f32 %v1184_v2, %v4123_v26 }
 0x190   :  { %1145 = vrot.lane.b32.xlu0 %v1135_v20, %s3540_s5  ;;  %1147 = vrot.lane.b32.xlu1 %v1136_v35, %s3540_s5 }
 0x191   :  { %v4237_v32 = vadd.f32 %v756_v60, %v700_v37  ;;  %v4242_v48 = vadd.f32 %v757_v17, %v701_v59  ;;  %v1210_v37 = vstv %s3357_s23  ;;  %v4299_v17 = vld [vmem:[#allocation2 + $0x1a] sm:$0xff]  ;;  %s3387_s23 = sld [smem:[#allocation8 + $0x37]] }
 0x192   :  { %v693_v47 = vpop.permute.xlu0 %692  ;;  %v695_v10 = vpop.permute.xlu1 %694  ;;  %v1211_v11 = vmul.f32 %v1210_v37, %v4106_v44  ;;  %v1212_v46 = vmul.f32 %v1210_v37, %v4111_v21  ;;  %v1213_v59 = vmul.f32 %v1210_v37, %v4118_v6 }
 0x193   :  { %v702_v39 = vadd.f32 %v693_v47, %v598_v0  ;;  %v703_v15 = vadd.f32 %v695_v10, %v599_v27  ;;  %v1214_v27 = vmul.f32 %v1210_v37, %v4123_v26  ;;  %v1280_v47 = vstv %s3362_s24  ;;  %s3388_s24 = sld [smem:[#allocation8 + $0x5b]] }
 0x194   :  { %1167 = vrot.lane.b32.xlu0 %v1159_v41, %s3540_s5  ;;  %1169 = vrot.lane.b32.xlu1 %v1160_v51, %s3540_s5  ;;  %v4304_v41 = vld [vmem:[#allocation2 + $0x22] sm:$0xff]  ;;  %v4311_v51 = vld [vmem:[#allocation2 + $0x7a] sm:$0xff] }
 0x195   :  { %v4252_v36 = vadd.f32 %v758_v63, %v702_v39  ;;  %v4257_v28 = vadd.f32 %v759_v34, %v703_v15  ;;  %v1281_v39 = vmul.f32 %v1280_v47, %v4299_v17  ;;  %v1282_v15 = vmul.f32 %v1280_v47, %v4304_v41  ;;  %v4316_v34 = vld [vmem:[#allocation2 + $0x82] sm:$0xff] }
 0x196   :  { %v715_v45 = vpop.permute.xlu0 %714  ;;  %v717_v53 = vpop.permute.xlu1 %716 }
 0x197   :  { %v726_v22 = vadd.f32 %v715_v45, %v622_v9  ;;  %v727_v4 = vadd.f32 %v717_v53, %v623_v56  ;;  %v1283_v9 = vmul.f32 %v1280_v47, %v4311_v51  ;;  %v1284_v45 = vmul.f32 %v1280_v47, %v4316_v34 }
 0x198   :  { %1171 = vrot.lane.b32.xlu0 %v1161_v23, %s3540_s5  ;;  %1173 = vrot.lane.b32.xlu1 %v1162_v58, %s3540_s5  ;;  %v1306_v23 = vstv %s3363_s25  ;;  %s3370_s25 = sld [smem:[#allocation8 + $0xf]] }
 0x199   :  { %v4266_v31 = vadd.f32 %v766_v42, %v726_v22  ;;  %v4271_v7 = vadd.f32 %v767_v62, %v727_v4  ;;  %v1307_v22 = vmul.f32 %v1306_v23, %v4299_v17  ;;  %v1308_v2 = vmul.f32 %v1306_v23, %v4304_v41 }
 0x19a   :  { %v719_v14 = vpop.permute.xlu0 %718  ;;  %v721_v1 = vpop.permute.xlu1 %720  ;;  %v1309_v4 = vmul.f32 %v1306_v23, %v4311_v51 }
 0x19b   :  { %v728_v29 = vadd.f32 %v719_v14, %v624_v13  ;;  %v729_v57 = vadd.f32 %v721_v1, %v625_v55  ;;  %v1310_v13 = vmul.f32 %v1306_v23, %v4316_v34  ;;  %v1332_v55 = vstv %s3364_s26  ;;  %s3389_s26 = sld [smem:[#allocation8 + $0x7f]] }
 0x19c   :  { %1193 = vrot.lane.b32.xlu0 %v1185_v40, %s3540_s5  ;;  %1195 = vrot.lane.b32.xlu1 %v1186_v50, %s3540_s5  ;;  %v1333_v40 = vmul.f32 %v1332_v55, %v4299_v17  ;;  %v988_v50 = vstv %s3346_s0  ;;  %s3371_s0 = sld [smem:[#allocation8 + $0x33]] }
 0x19d   :  { %v4278_v18 = vadd.f32 %v768_v5, %v728_v29  ;;  %v4283_v49 = vadd.f32 %v769_v52, %v729_v57  ;;  %v1334_v29 = vmul.f32 %v1332_v55, %v4304_v41 }
 0x19e   :  { %v4280_v16 = vpop.permute.xlu0 %784  ;;  %v787_v20 = vpop.permute.xlu1 %786 }
 0x19f   :  { %v796_v5 = vadd.f32 %v4280_v16, %v4172_v43  ;;  %v797_v57 = vadd.f32 %v787_v20, %v4177_v24  ;;  %v990_v43 = vmul.f32 %v988_v50, %v4111_v21 }
 0x1a0   :  { %1197 = vrot.lane.b32.xlu0 %v1187_v12, %s3540_s5  ;;  %1199 = vrot.lane.b32.xlu1 %v1188_v33, %s3540_s5  ;;  %v1335_v12 = vmul.f32 %v1332_v55, %v4311_v51 }
 0x1a2   :  { %v4288_v8 = vpop.permute.xlu0 %788  ;;  %v4291_v35 = vpop.permute.xlu1 %790 }
 0x1a3   :  { %v798_v24 = vadd.f32 %v4288_v8, %v4188_v54  ;;  %v799_v20 = vadd.f32 %v4291_v35, %v4193_v61  ;;  %v992_v8 = vmul.f32 %v988_v50, %v4123_v26 }
 0x1a4   :  { %1219 = vrot.lane.b32.xlu0 %v1211_v11, %s3540_s5  ;;  %1221 = vrot.lane.b32.xlu1 %v1212_v46, %s3540_s5  ;;  %v1336_v11 = vmul.f32 %v1332_v55, %v4316_v34  ;;  %v1358_v46 = vstv %s3365_s1  ;;  %s4743_s1 = sld [smem:[#allocation8 + $0x14]] }
 0x1a5   :  { %v1360_v23 = vmul.f32 %v1358_v46, %v4304_v41  ;;  %v1361_v55 = vmul.f32 %v1358_v46, %v4311_v51 }
 0x1a6   :  { %v4296_v60 = vpop.permute.xlu0 %810  ;;  %v4301_v0 = vpop.permute.xlu1 %812 }
 0x1a7   :  { %v822_v61 = vadd.f32 %v4296_v60, %v4205_v38 }
 0x1a8   :  { %1223 = vrot.lane.b32.xlu0 %v1213_v59, %s3540_s5  ;;  %1225 = vrot.lane.b32.xlu1 %v1214_v27, %s3540_s5  ;;  %v989_v59 = vmul.f32 %v988_v50, %v4106_v44 }
 0x1aa   :  { %v4308_v10 = vpop.permute.xlu0 %814  ;;  %v4313_v63 = vpop.permute.xlu1 %816 }
 0x1ac   :  { %1289 = vrot.lane.b32.xlu0 %v1281_v39, %s3539_s2  ;;  %1291 = vrot.lane.b32.xlu1 %v1282_v15, %s3539_s2  ;;  %v1359_v39 = vmul.f32 %v1358_v46, %v4299_v17 }
 0x1ae   :  { %v4320_v3 = vpop.permute.xlu0 %836  ;;  %v4323_v56 = vpop.permute.xlu1 %838 }
 0x1b0   :  { %1293 = vrot.lane.b32.xlu0 %v1283_v9, %s3539_s2  ;;  %1295 = vrot.lane.b32.xlu1 %v1284_v45, %s3539_s2 }
 0x1b2   :  { %v4328_v53 = vpop.permute.xlu0 %840  ;;  %v4331_v58 = vpop.permute.xlu1 %842 }
 0x1b4   :  { %1315 = vrot.lane.b32.xlu0 %v1307_v22, %s3539_s2  ;;  %1317 = vrot.lane.b32.xlu1 %v1308_v2, %s3539_s2  ;;  %v991_v22 = vmul.f32 %v988_v50, %v4118_v6  ;;  %v998_v2 = vstv %s3347_s27  ;;  %s4762_s27 = sld [smem:[#allocation8 + $0x57]] }
 0x1b5   :  { %v999_v38 = vmul.f32 %v998_v2, %v4106_v44 }
 0x1b6   :  { %v4336_v42 = vpop.permute.xlu0 %862  ;;  %v4339_v62 = vpop.permute.xlu1 %864 }
 0x1b8   :  { %1319 = vrot.lane.b32.xlu0 %v1309_v4, %s3539_s2  ;;  %1321 = vrot.lane.b32.xlu1 %v1310_v13, %s3539_s2  ;;  %v823_v4 = vadd.f32 %v4301_v0, %v4210_v19  ;;  %v1000_v19 = vmul.f32 %v998_v2, %v4111_v21  ;;  %v824_v0 = vadd.f32 %v4308_v10, %v4222_v25 }
 0x1b9   :  { %v1002_v10 = vmul.f32 %v998_v2, %v4123_v26 }
 0x1ba   :  { %v4344_v14 = vpop.permute.xlu0 %866  ;;  %v4347_v1 = vpop.permute.xlu1 %868 }
 0x1bc   :  { %1341 = vrot.lane.b32.xlu0 %v1333_v40, %s3539_s2  ;;  %1343 = vrot.lane.b32.xlu1 %v1334_v29, %s3539_s2 }
 0x1be   :  { %v889_v52 = vpop.permute.xlu0 %888  ;;  %v891_v33 = vpop.permute.xlu1 %890 }
 0x1bf   :  { %v900_v37 = vadd.f32 %v889_v52, %v796_v5  ;;  %v901_v27 = vadd.f32 %v891_v33, %v797_v57  ;;  %v1362_v5 = vmul.f32 %v1358_v46, %v4316_v34  ;;  %v1384_v57 = vstv %s4357_s28  ;;  %s4776_s28 = sld [smem:[#allocation8 + $0x38]] }
 0x1c0   :  { %1345 = vrot.lane.b32.xlu0 %v1335_v12, %s3539_s2  ;;  %1347 = vrot.lane.b32.xlu1 %v1336_v11, %s3539_s2  ;;  %v825_v12 = vadd.f32 %v4313_v63, %v4227_v30  ;;  %v848_v30 = vadd.f32 %v4320_v3, %v4237_v32 }
 0x1c1   :  { %v4365_v16 = vadd.f32 %v989_v59, %v900_v37  ;;  %v4370_v15 = vadd.f32 %v990_v43, %v901_v27  ;;  %v1385_v37 = vmul.f32 %v1384_v57, %v4299_v17  ;;  %v1386_v27 = vmul.f32 %v1384_v57, %v4304_v41 }
 0x1c2   :  { %v893_v47 = vpop.permute.xlu0 %892  ;;  %v895_v9 = vpop.permute.xlu1 %894  ;;  %v1001_v43 = vmul.f32 %v998_v2, %v4118_v6  ;;  %v851_v2 = vadd.f32 %v4331_v58, %v4257_v28  ;;  %v874_v28 = vadd.f32 %v4336_v42, %v4266_v31 }
 0x1c3   :  { %v902_v45 = vadd.f32 %v893_v47, %v798_v24  ;;  %v903_v54 = vadd.f32 %v895_v9, %v799_v20  ;;  %v1008_v24 = vstv %s4376_s29  ;;  %v849_v20 = vadd.f32 %v4323_v56, %v4242_v48  ;;  %s4796_s29 = sld [smem:[#allocation8 + $0x7b]] }
 0x1c4   :  { %1367 = vrot.lane.b32.xlu0 %v1359_v39, %s3539_s2  ;;  %1369 = vrot.lane.b32.xlu1 %v1360_v23, %s3539_s2  ;;  %v1387_v39 = vmul.f32 %v1384_v57, %v4311_v51  ;;  %v1009_v32 = vmul.f32 %v1008_v24, %v4106_v44  ;;  %v850_v48 = vadd.f32 %v4328_v53, %v4252_v36  ;;  %v1018_v53 = vstv %s4410_s4  ;;  %s3393_s4 = sld [smem:[#allocation8 + $0x80]] }
 0x1c5   :  { %v4381_v35 = vadd.f32 %v991_v22, %v902_v45  ;;  %v4386_v40 = vadd.f32 %v992_v8, %v903_v54  ;;  %v1388_v22 = vmul.f32 %v1384_v57, %v4316_v34  ;;  %v1410_v54 = vstv %s4390_s30  ;;  %s3392_s30 = sld [smem:[#allocation8 + $0x5c]] }
 0x1c6   :  { %v915_v13 = vpop.permute.xlu0 %914  ;;  %v917_v29 = vpop.permute.xlu1 %916  ;;  %v1010_v8 = vmul.f32 %v1008_v24, %v4111_v21  ;;  %v1012_v36 = vmul.f32 %v1008_v24, %v4123_v26  ;;  %v1019_v31 = vmul.f32 %v1018_v53, %v4106_v44 }
 0x1c7   :  { %v926_v50 = vadd.f32 %v915_v13, %v822_v61  ;;  %v927_v60 = vadd.f32 %v917_v29, %v823_v4  ;;  %v1411_v4 = vmul.f32 %v1410_v54, %v4299_v17 }
 0x1c8   :  { %1371 = vrot.lane.b32.xlu0 %v1361_v55, %s3539_s2  ;;  %1373 = vrot.lane.b32.xlu1 %v1362_v5, %s3539_s2  ;;  %v1011_v5 = vmul.f32 %v1008_v24, %v4118_v6 }
 0x1c9   :  { %v4398_v52 = vadd.f32 %v999_v38, %v926_v50  ;;  %v4403_v11 = vadd.f32 %v1000_v19, %v927_v60  ;;  %v1412_v50 = vmul.f32 %v1410_v54, %v4304_v41  ;;  %v875_v38 = vadd.f32 %v4339_v62, %v4271_v7 }
 0x1ca   :  { %v919_v33 = vpop.permute.xlu0 %918  ;;  %v921_v46 = vpop.permute.xlu1 %920  ;;  %v1413_v19 = vmul.f32 %v1410_v54, %v4311_v51  ;;  %v876_v7 = vadd.f32 %v4344_v14, %v4278_v18  ;;  %v1022_v18 = vmul.f32 %v1018_v53, %v4123_v26 }
 0x1cb   :  { %v928_v59 = vadd.f32 %v919_v33, %v824_v0  ;;  %v929_v25 = vadd.f32 %v921_v46, %v825_v12  ;;  %v1436_v46 = vstv %s3368_s6  ;;  %s3398_s6 = sld [smem:[#allocation8 + $0x16]] }
 0x1cc   :  { %1393 = vrot.lane.b32.xlu0 %v1385_v37, %s3540_s5  ;;  %1395 = vrot.lane.b32.xlu1 %v1386_v27, %s3540_s5  ;;  %v1414_v37 = vmul.f32 %v1410_v54, %v4316_v34  ;;  %v877_v27 = vadd.f32 %v4347_v1, %v4283_v49  ;;  %v1439_v1 = vmul.f32 %v1436_v46, %v4311_v51 }
 0x1cd   :  { %v4415_v63 = vadd.f32 %v1001_v43, %v928_v59  ;;  %v4420_v9 = vadd.f32 %v1002_v10, %v929_v25  ;;  %v1020_v59 = vmul.f32 %v1018_v53, %v4111_v21  ;;  %v1437_v25 = vmul.f32 %v1436_v46, %v4299_v17 }
 0x1ce   :  { %v941_v47 = vpop.permute.xlu0 %940  ;;  %v943_v45 = vpop.permute.xlu1 %942  ;;  %v1021_v21 = vmul.f32 %v1018_v53, %v4118_v6 }
 0x1cf   :  { %v952_v23 = vadd.f32 %v941_v47, %v848_v30  ;;  %v953_v3 = vadd.f32 %v943_v45, %v849_v20  ;;  %v1438_v30 = vmul.f32 %v1436_v46, %v4304_v41  ;;  %v1440_v45 = vmul.f32 %v1436_v46, %v4316_v34 }
 0x1d0   :  { %1397 = vrot.lane.b32.xlu0 %v1387_v39, %s3540_s5  ;;  %1399 = vrot.lane.b32.xlu1 %v1388_v22, %s3540_s5 }
 0x1d1   :  { %v4430_v56 = vadd.f32 %v1009_v32, %v952_v23  ;;  %v4435_v13 = vadd.f32 %v1010_v8, %v953_v3  ;;  %v1462_v23 = vstv %s3369_s7  ;;  %v4492_v8 = vld [vmem:[#allocation2 + $0x1c] sm:$0xff]  ;;  %s3399_s7 = sld [smem:[#allocation8 + $0x3a]] }
 0x1d2   :  { %v945_v61 = vpop.permute.xlu0 %944  ;;  %v947_v55 = vpop.permute.xlu1 %946  ;;  %v1463_v26 = vmul.f32 %v1462_v23, %v4299_v17  ;;  %v1464_v54 = vmul.f32 %v1462_v23, %v4304_v41  ;;  %v1465_v3 = vmul.f32 %v1462_v23, %v4311_v51 }
 0x1d3   :  { %v954_v29 = vadd.f32 %v945_v61, %v850_v48  ;;  %v955_v57 = vadd.f32 %v947_v55, %v851_v2  ;;  %v1466_v2 = vmul.f32 %v1462_v23, %v4316_v34  ;;  %v1532_v61 = vstv %s3374_s8  ;;  %s3400_s8 = sld [smem:[#allocation8 + $0x5e]] }
 0x1d4   :  { %1419 = vrot.lane.b32.xlu0 %v1411_v4, %s3540_s5  ;;  %1421 = vrot.lane.b32.xlu1 %v1412_v50, %s3540_s5  ;;  %v4497_v4 = vld [vmem:[#allocation2 + $0x24] sm:$0xff]  ;;  %v4504_v50 = vld [vmem:[#allocation2 + $0x7c] sm:$0xff] }
 0x1d5   :  { %v4445_v58 = vadd.f32 %v1011_v5, %v954_v29  ;;  %v4450_v0 = vadd.f32 %v1012_v36, %v955_v57  ;;  %v1533_v29 = vmul.f32 %v1532_v61, %v4492_v8  ;;  %v1534_v57 = vmul.f32 %v1532_v61, %v4497_v4  ;;  %v4509_v36 = vld [vmem:[#allocation2 + $0x84] sm:$0xff] }
 0x1d6   :  { %v967_v60 = vpop.permute.xlu0 %966  ;;  %v969_v12 = vpop.permute.xlu1 %968 }
 0x1d7   :  { %v978_v33 = vadd.f32 %v967_v60, %v874_v28  ;;  %v979_v42 = vadd.f32 %v969_v12, %v875_v38  ;;  %v1535_v28 = vmul.f32 %v1532_v61, %v4504_v50  ;;  %v1536_v60 = vmul.f32 %v1532_v61, %v4509_v36 }
 0x1d8   :  { %1423 = vrot.lane.b32.xlu0 %v1413_v19, %s3540_s5  ;;  %1425 = vrot.lane.b32.xlu1 %v1414_v37, %s3540_s5  ;;  %v1558_v19 = vstv %s3375_s9  ;;  %s3382_s9 = sld [smem:[#allocation8 + $0x12]] }
 0x1d9   :  { %v4459_v62 = vadd.f32 %v1019_v31, %v978_v33  ;;  %v4464_v10 = vadd.f32 %v1020_v59, %v979_v42  ;;  %v1559_v33 = vmul.f32 %v1558_v19, %v4492_v8  ;;  %v1560_v46 = vmul.f32 %v1558_v19, %v4497_v4 }
 0x1da   :  { %v971_v43 = vpop.permute.xlu0 %970  ;;  %v973_v44 = vpop.permute.xlu1 %972  ;;  %v1561_v42 = vmul.f32 %v1558_v19, %v4504_v50 }
 0x1db   :  { %v980_v24 = vadd.f32 %v971_v43, %v876_v7  ;;  %v981_v20 = vadd.f32 %v973_v44, %v877_v27  ;;  %v1562_v7 = vmul.f32 %v1558_v19, %v4509_v36  ;;  %v1584_v27 = vstv %s3376_s10  ;;  %s3401_s10 = sld [smem:[#allocation8 + $0x82]] }
 0x1dc   :  { %1445 = vrot.lane.b32.xlu0 %v1437_v25, %s3540_s5  ;;  %1447 = vrot.lane.b32.xlu1 %v1438_v30, %s3540_s5  ;;  %v1585_v25 = vmul.f32 %v1584_v27, %v4492_v8  ;;  %v1240_v30 = vstv %s3358_s11  ;;  %s3383_s11 = sld [smem:[#allocation8 + $0x36]] }
 0x1dd   :  { %v4471_v14 = vadd.f32 %v1021_v21, %v980_v24  ;;  %v4476_v47 = vadd.f32 %v1022_v18, %v981_v20  ;;  %v1586_v24 = vmul.f32 %v1584_v27, %v4497_v4 }
 0x1de   :  { %v4473_v49 = vpop.permute.xlu0 %1037  ;;  %v1040_v39 = vpop.permute.xlu1 %1039 }
 0x1df   :  { %v1049_v21 = vadd.f32 %v4473_v49, %v4365_v16  ;;  %v1050_v20 = vadd.f32 %v1040_v39, %v4370_v15  ;;  %v1242_v16 = vmul.f32 %v1240_v30, %v4304_v41 }
 0x1e0   :  { %1449 = vrot.lane.b32.xlu0 %v1439_v1, %s3540_s5  ;;  %1451 = vrot.lane.b32.xlu1 %v1440_v45, %s3540_s5  ;;  %v1587_v1 = vmul.f32 %v1584_v27, %v4504_v50 }
 0x1e2   :  { %v4481_v6 = vpop.permute.xlu0 %1041  ;;  %v4484_v22 = vpop.permute.xlu1 %1043 }
 0x1e3   :  { %v1051_v15 = vadd.f32 %v4481_v6, %v4381_v35  ;;  %v1052_v39 = vadd.f32 %v4484_v22, %v4386_v40  ;;  %v1244_v6 = vmul.f32 %v1240_v30, %v4316_v34 }
 0x1e4   :  { %1471 = vrot.lane.b32.xlu0 %v1463_v26, %s3540_s5  ;;  %1473 = vrot.lane.b32.xlu1 %v1464_v54, %s3540_s5  ;;  %v1588_v26 = vmul.f32 %v1584_v27, %v4509_v36  ;;  %v1610_v54 = vstv %s3377_s12  ;;  %s4936_s12 = sld [smem:[#allocation8 + $0x17]] }
 0x1e5   :  { %v1612_v19 = vmul.f32 %v1610_v54, %v4497_v4  ;;  %v1613_v27 = vmul.f32 %v1610_v54, %v4504_v50 }
 0x1e6   :  { %v4489_v32 = vpop.permute.xlu0 %1063  ;;  %v4494_v48 = vpop.permute.xlu1 %1065 }
 0x1e7   :  { %v1075_v40 = vadd.f32 %v4489_v32, %v4398_v52 }
 0x1e8   :  { %1475 = vrot.lane.b32.xlu0 %v1465_v3, %s3540_s5  ;;  %1477 = vrot.lane.b32.xlu1 %v1466_v2, %s3540_s5  ;;  %v1241_v3 = vmul.f32 %v1240_v30, %v4299_v17 }
 0x1ea   :  { %v4501_v55 = vpop.permute.xlu0 %1067  ;;  %v4506_v5 = vpop.permute.xlu1 %1069 }
 0x1ec   :  { %1541 = vrot.lane.b32.xlu0 %v1533_v29, %s3539_s2  ;;  %1543 = vrot.lane.b32.xlu1 %v1534_v57, %s3539_s2  ;;  %v1611_v29 = vmul.f32 %v1610_v54, %v4492_v8 }
 0x1ee   :  { %v4513_v53 = vpop.permute.xlu0 %1089  ;;  %v4516_v38 = vpop.permute.xlu1 %1091 }
 0x1f0   :  { %1545 = vrot.lane.b32.xlu0 %v1535_v28, %s3539_s2  ;;  %1547 = vrot.lane.b32.xlu1 %v1536_v60, %s3539_s2 }
 0x1f2   :  { %v4521_v12 = vpop.permute.xlu0 %1093  ;;  %v4524_v37 = vpop.permute.xlu1 %1095 }
 0x1f4   :  { %1567 = vrot.lane.b32.xlu0 %v1559_v33, %s3539_s2  ;;  %1569 = vrot.lane.b32.xlu1 %v1560_v46, %s3539_s2  ;;  %v1243_v33 = vmul.f32 %v1240_v30, %v4311_v51  ;;  %v1250_v46 = vstv %s3359_s13  ;;  %s4955_s13 = sld [smem:[#allocation8 + $0x5a]] }
 0x1f5   :  { %v1251_v52 = vmul.f32 %v1250_v46, %v4299_v17 }
 0x1f6   :  { %v4529_v31 = vpop.permute.xlu0 %1115  ;;  %v4532_v59 = vpop.permute.xlu1 %1117 }
 0x1f8   :  { %1571 = vrot.lane.b32.xlu0 %v1561_v42, %s3539_s2  ;;  %1573 = vrot.lane.b32.xlu1 %v1562_v7, %s3539_s2  ;;  %v1076_v42 = vadd.f32 %v4494_v48, %v4403_v11  ;;  %v1252_v11 = vmul.f32 %v1250_v46, %v4304_v41  ;;  %v1077_v48 = vadd.f32 %v4501_v55, %v4415_v63 }
 0x1f9   :  { %v1254_v55 = vmul.f32 %v1250_v46, %v4316_v34 }
 0x1fa   :  { %v4537_v43 = vpop.permute.xlu0 %1119  ;;  %v4540_v44 = vpop.permute.xlu1 %1121 }
 0x1fc   :  { %1593 = vrot.lane.b32.xlu0 %v1585_v25, %s3539_s2  ;;  %1595 = vrot.lane.b32.xlu1 %v1586_v24, %s3539_s2 }
 0x1fe   :  { %v1142_v18 = vpop.permute.xlu0 %1141  ;;  %v1144_v45 = vpop.permute.xlu1 %1143 }
 0x1ff   :  { %v1153_v23 = vadd.f32 %v1142_v18, %v1049_v21  ;;  %v1154_v2 = vadd.f32 %v1144_v45, %v1050_v20  ;;  %v1614_v21 = vmul.f32 %v1610_v54, %v4509_v36  ;;  %v1636_v20 = vstv %s4550_s14  ;;  %s4969_s14 = sld [smem:[#allocation8 + $0x3b]] }
 0x200   :  { %1597 = vrot.lane.b32.xlu0 %v1587_v1, %s3539_s2  ;;  %1599 = vrot.lane.b32.xlu1 %v1588_v26, %s3539_s2  ;;  %v1078_v1 = vadd.f32 %v4506_v5, %v4420_v9  ;;  %v1101_v9 = vadd.f32 %v4513_v53, %v4430_v56 }
 0x201   :  { %v4558_v49 = vadd.f32 %v1241_v3, %v1153_v23  ;;  %v4563_v57 = vadd.f32 %v1242_v16, %v1154_v2  ;;  %v1637_v23 = vmul.f32 %v1636_v20, %v4492_v8  ;;  %v1638_v2 = vmul.f32 %v1636_v20, %v4497_v4 }
 0x202   :  { %v1146_v61 = vpop.permute.xlu0 %1145  ;;  %v1148_v28 = vpop.permute.xlu1 %1147  ;;  %v1253_v16 = vmul.f32 %v1250_v46, %v4311_v51  ;;  %v1104_v46 = vadd.f32 %v4524_v37, %v4450_v0  ;;  %v1127_v0 = vadd.f32 %v4529_v31, %v4459_v62 }
 0x203   :  { %v1155_v60 = vadd.f32 %v1146_v61, %v1051_v15  ;;  %v1156_v35 = vadd.f32 %v1148_v28, %v1052_v39  ;;  %v1260_v15 = vstv %s4569_s17  ;;  %v1102_v39 = vadd.f32 %v4516_v38, %v4435_v13  ;;  %s4989_s17 = sld [smem:[#allocation8 + $0x7e]] }
 0x204   :  { %1619 = vrot.lane.b32.xlu0 %v1611_v29, %s3539_s2  ;;  %1621 = vrot.lane.b32.xlu1 %v1612_v19, %s3539_s2  ;;  %v1639_v29 = vmul.f32 %v1636_v20, %v4504_v50  ;;  %v1261_v56 = vmul.f32 %v1260_v15, %v4299_v17  ;;  %v1103_v13 = vadd.f32 %v4521_v12, %v4445_v58  ;;  %v1270_v12 = vstv %s4603_s19  ;;  %s3405_s19 = sld [smem:[#allocation8 + $0x83]] }
 0x205   :  { %v4574_v22 = vadd.f32 %v1243_v33, %v1155_v60  ;;  %v4579_v25 = vadd.f32 %v1244_v6, %v1156_v35  ;;  %v1640_v33 = vmul.f32 %v1636_v20, %v4509_v36  ;;  %v1662_v35 = vstv %s4583_s18  ;;  %s3404_s18 = sld [smem:[#allocation8 + $0x5f]] }
 0x206   :  { %v1168_v7 = vpop.permute.xlu0 %1167  ;;  %v1170_v24 = vpop.permute.xlu1 %1169  ;;  %v1262_v6 = vmul.f32 %v1260_v15, %v4304_v41  ;;  %v1264_v58 = vmul.f32 %v1260_v15, %v4316_v34  ;;  %v1271_v62 = vmul.f32 %v1270_v12, %v4299_v17 }
 0x207   :  { %v1179_v30 = vadd.f32 %v1168_v7, %v1075_v40  ;;  %v1180_v32 = vadd.f32 %v1170_v24, %v1076_v42  ;;  %v1663_v42 = vmul.f32 %v1662_v35, %v4492_v8 }
 0x208   :  { %1623 = vrot.lane.b32.xlu0 %v1613_v27, %s3539_s2  ;;  %1625 = vrot.lane.b32.xlu1 %v1614_v21, %s3539_s2  ;;  %v1263_v21 = vmul.f32 %v1260_v15, %v4311_v51 }
 0x209   :  { %v4591_v18 = vadd.f32 %v1251_v52, %v1179_v30  ;;  %v4596_v26 = vadd.f32 %v1252_v11, %v1180_v32  ;;  %v1664_v30 = vmul.f32 %v1662_v35, %v4497_v4  ;;  %v1128_v52 = vadd.f32 %v4532_v59, %v4464_v10 }
 0x20a   :  { %v1172_v45 = vpop.permute.xlu0 %1171  ;;  %v1174_v54 = vpop.permute.xlu1 %1173  ;;  %v1665_v11 = vmul.f32 %v1662_v35, %v4504_v50  ;;  %v1129_v10 = vadd.f32 %v4537_v43, %v4471_v14  ;;  %v1274_v14 = vmul.f32 %v1270_v12, %v4316_v34 }
 0x20b   :  { %v1181_v3 = vadd.f32 %v1172_v45, %v1077_v48  ;;  %v1182_v63 = vadd.f32 %v1174_v54, %v1078_v1  ;;  %v1688_v54 = vstv %s3380_s20  ;;  %s3410_s20 = sld [smem:[#allocation8 + $0x19]] }
 0x20c   :  { %1645 = vrot.lane.b32.xlu0 %v1637_v23, %s3540_s5  ;;  %1647 = vrot.lane.b32.xlu1 %v1638_v2, %s3540_s5  ;;  %v1666_v23 = vmul.f32 %v1662_v35, %v4509_v36  ;;  %v1130_v2 = vadd.f32 %v4540_v44, %v4476_v47  ;;  %v1691_v44 = vmul.f32 %v1688_v54, %v4504_v50 }
 0x20d   :  { %v4608_v5 = vadd.f32 %v1253_v16, %v1181_v3  ;;  %v4613_v28 = vadd.f32 %v1254_v55, %v1182_v63  ;;  %v1272_v3 = vmul.f32 %v1270_v12, %v4304_v41  ;;  %v1689_v63 = vmul.f32 %v1688_v54, %v4492_v8 }
 0x20e   :  { %v1194_v61 = vpop.permute.xlu0 %1193  ;;  %v1196_v60 = vpop.permute.xlu1 %1195  ;;  %v1273_v41 = vmul.f32 %v1270_v12, %v4311_v51 }
 0x20f   :  { %v1205_v19 = vadd.f32 %v1194_v61, %v1101_v9  ;;  %v1206_v53 = vadd.f32 %v1196_v60, %v1102_v39  ;;  %v1690_v9 = vmul.f32 %v1688_v54, %v4497_v4  ;;  %v1692_v60 = vmul.f32 %v1688_v54, %v4509_v36 }
 0x210   :  { %1649 = vrot.lane.b32.xlu0 %v1639_v29, %s3540_s5  ;;  %1651 = vrot.lane.b32.xlu1 %v1640_v33, %s3540_s5 }
 0x211   :  { %v4623_v38 = vadd.f32 %v1261_v56, %v1205_v19  ;;  %v4628_v7 = vadd.f32 %v1262_v6, %v1206_v53  ;;  %v1714_v19 = vstv %s3381_s21  ;;  %v4685_v6 = vld [vmem:[#allocation2 + $0x30] sm:$0xff]  ;;  %s3411_s21 = sld [smem:[#allocation8 + $0x3d]] }
 0x212   :  { %v1198_v40 = vpop.permute.xlu0 %1197  ;;  %v1200_v27 = vpop.permute.xlu1 %1199  ;;  %v1715_v34 = vmul.f32 %v1714_v19, %v4492_v8  ;;  %v1716_v35 = vmul.f32 %v1714_v19, %v4497_v4  ;;  %v1717_v53 = vmul.f32 %v1714_v19, %v4504_v50 }
 0x213   :  { %v1207_v24 = vadd.f32 %v1198_v40, %v1103_v13  ;;  %v1208_v20 = vadd.f32 %v1200_v27, %v1104_v46  ;;  %v1718_v46 = vmul.f32 %v1714_v19, %v4509_v36  ;;  %v1785_v40 = vstv %s3386_s22  ;;  %s3412_s22 = sld [smem:[#allocation8 + $0x61]] }
 0x214   :  { %1671 = vrot.lane.b32.xlu0 %v1663_v42, %s3540_s5  ;;  %1673 = vrot.lane.b32.xlu1 %v1664_v30, %s3540_s5  ;;  %v4690_v42 = vld [vmem:[#allocation2 + $0x38] sm:$0xff]  ;;  %v4697_v30 = vld [vmem:[#allocation2 + $0x90] sm:$0xff] }
 0x215   :  { %v4638_v37 = vadd.f32 %v1263_v21, %v1207_v24  ;;  %v4643_v48 = vadd.f32 %v1264_v58, %v1208_v20  ;;  %v1786_v24 = vmul.f32 %v1785_v40, %v4685_v6  ;;  %v1787_v20 = vmul.f32 %v1785_v40, %v4690_v42  ;;  %v4702_v58 = vld [vmem:[#allocation2 + $0x98] sm:$0xff] }
 0x216   :  { %v1220_v32 = vpop.permute.xlu0 %1219  ;;  %v1222_v1 = vpop.permute.xlu1 %1221 }
 0x217   :  { %v1231_v45 = vadd.f32 %v1220_v32, %v1127_v0  ;;  %v1232_v31 = vadd.f32 %v1222_v1, %v1128_v52  ;;  %v1788_v0 = vmul.f32 %v1785_v40, %v4697_v30  ;;  %v1789_v32 = vmul.f32 %v1785_v40, %v4702_v58 }
 0x218   :  { %1675 = vrot.lane.b32.xlu0 %v1665_v11, %s3540_s5  ;;  %1677 = vrot.lane.b32.xlu1 %v1666_v23, %s3540_s5  ;;  %v1811_v11 = vstv %s3387_s23  ;;  %s3394_s23 = sld [smem:[#allocation8 + $0x15]] }
 0x219   :  { %v4652_v59 = vadd.f32 %v1271_v62, %v1231_v45  ;;  %v4657_v55 = vadd.f32 %v1272_v3, %v1232_v31  ;;  %v1812_v45 = vmul.f32 %v1811_v11, %v4685_v6  ;;  %v1813_v54 = vmul.f32 %v1811_v11, %v4690_v42 }
 0x21a   :  { %v1224_v16 = vpop.permute.xlu0 %1223  ;;  %v1226_v17 = vpop.permute.xlu1 %1225  ;;  %v1814_v31 = vmul.f32 %v1811_v11, %v4697_v30 }
 0x21b   :  { %v1233_v15 = vadd.f32 %v1224_v16, %v1129_v10  ;;  %v1234_v39 = vadd.f32 %v1226_v17, %v1130_v2  ;;  %v1815_v10 = vmul.f32 %v1811_v11, %v4702_v58  ;;  %v1837_v2 = vstv %s3388_s24  ;;  %s3413_s24 = sld [smem:[#allocation8 + $0x85]] }
 0x21c   :  { %1697 = vrot.lane.b32.xlu0 %v1689_v63, %s3540_s5  ;;  %1699 = vrot.lane.b32.xlu1 %v1690_v9, %s3540_s5  ;;  %v1838_v63 = vmul.f32 %v1837_v2, %v4685_v6  ;;  %v1492_v9 = vstv %s3370_s25  ;;  %s3395_s25 = sld [smem:[#allocation8 + $0x39]] }
 0x21d   :  { %v4664_v43 = vadd.f32 %v1273_v41, %v1233_v15  ;;  %v4669_v61 = vadd.f32 %v1274_v14, %v1234_v39  ;;  %v1839_v15 = vmul.f32 %v1837_v2, %v4690_v42 }
 0x21e   :  { %v4666_v47 = vpop.permute.xlu0 %1289  ;;  %v1292_v29 = vpop.permute.xlu1 %1291 }
 0x21f   :  { %v1301_v41 = vadd.f32 %v4666_v47, %v4558_v49  ;;  %v1302_v39 = vadd.f32 %v1292_v29, %v4563_v57  ;;  %v1494_v49 = vmul.f32 %v1492_v9, %v4497_v4 }
 0x220   :  { %1701 = vrot.lane.b32.xlu0 %v1691_v44, %s3540_s5  ;;  %1703 = vrot.lane.b32.xlu1 %v1692_v60, %s3540_s5  ;;  %v1840_v44 = vmul.f32 %v1837_v2, %v4697_v30 }
 0x222   :  { %v4674_v51 = vpop.permute.xlu0 %1293  ;;  %v4677_v33 = vpop.permute.xlu1 %1295 }
 0x223   :  { %v1303_v57 = vadd.f32 %v4674_v51, %v4574_v22  ;;  %v1304_v29 = vadd.f32 %v4677_v33, %v4579_v25  ;;  %v1496_v51 = vmul.f32 %v1492_v9, %v4509_v36 }
 0x224   :  { %1723 = vrot.lane.b32.xlu0 %v1715_v34, %s3540_s5  ;;  %1725 = vrot.lane.b32.xlu1 %v1716_v35, %s3540_s5  ;;  %v1841_v34 = vmul.f32 %v1837_v2, %v4702_v58  ;;  %v1863_v35 = vstv %s3389_s26  ;;  %s5129_s26 = sld [smem:[#allocation8 + $0x1a]] }
 0x225   :  { %v1865_v11 = vmul.f32 %v1863_v35, %v4690_v42  ;;  %v1866_v2 = vmul.f32 %v1863_v35, %v4697_v30 }
 0x226   :  { %v4682_v56 = vpop.permute.xlu0 %1315  ;;  %v4687_v13 = vpop.permute.xlu1 %1317 }
 0x227   :  { %v1327_v25 = vadd.f32 %v4682_v56, %v4591_v18 }
 0x228   :  { %1727 = vrot.lane.b32.xlu0 %v1717_v53, %s3540_s5  ;;  %1729 = vrot.lane.b32.xlu1 %v1718_v46, %s3540_s5  ;;  %v1493_v53 = vmul.f32 %v1492_v9, %v4492_v8 }
 0x22a   :  { %v4694_v27 = vpop.permute.xlu0 %1319  ;;  %v4699_v21 = vpop.permute.xlu1 %1321 }
 0x22c   :  { %1794 = vrot.lane.b32.xlu0 %v1786_v24, %s3539_s2  ;;  %1796 = vrot.lane.b32.xlu1 %v1787_v20, %s3539_s2  ;;  %v1864_v24 = vmul.f32 %v1863_v35, %v4685_v6 }
 0x22e   :  { %v4706_v12 = vpop.permute.xlu0 %1341  ;;  %v4709_v52 = vpop.permute.xlu1 %1343 }
 0x230   :  { %1798 = vrot.lane.b32.xlu0 %v1788_v0, %s3539_s2  ;;  %1800 = vrot.lane.b32.xlu1 %v1789_v32, %s3539_s2 }
 0x232   :  { %v4714_v1 = vpop.permute.xlu0 %1345  ;;  %v4717_v23 = vpop.permute.xlu1 %1347 }
 0x234   :  { %1820 = vrot.lane.b32.xlu0 %v1812_v45, %s3539_s2  ;;  %1822 = vrot.lane.b32.xlu1 %v1813_v54, %s3539_s2  ;;  %v1495_v45 = vmul.f32 %v1492_v9, %v4504_v50  ;;  %v1502_v54 = vstv %s3371_s0  ;;  %s5148_s0 = sld [smem:[#allocation8 + $0x5d]] }
 0x235   :  { %v1503_v18 = vmul.f32 %v1502_v54, %v4492_v8 }
 0x236   :  { %v4722_v62 = vpop.permute.xlu0 %1367  ;;  %v4725_v3 = vpop.permute.xlu1 %1369 }
 0x238   :  { %1824 = vrot.lane.b32.xlu0 %v1814_v31, %s3539_s2  ;;  %1826 = vrot.lane.b32.xlu1 %v1815_v10, %s3539_s2  ;;  %v1328_v31 = vadd.f32 %v4687_v13, %v4596_v26  ;;  %v1504_v26 = vmul.f32 %v1502_v54, %v4497_v4  ;;  %v1329_v13 = vadd.f32 %v4694_v27, %v4608_v5 }
 0x239   :  { %v1506_v27 = vmul.f32 %v1502_v54, %v4509_v36 }
 0x23a   :  { %v4730_v16 = vpop.permute.xlu0 %1371  ;;  %v4733_v17 = vpop.permute.xlu1 %1373 }
 0x23c   :  { %1846 = vrot.lane.b32.xlu0 %v1838_v63, %s3539_s2  ;;  %1848 = vrot.lane.b32.xlu1 %v1839_v15, %s3539_s2 }
 0x23e   :  { %v1394_v14 = vpop.permute.xlu0 %1393  ;;  %v1396_v60 = vpop.permute.xlu1 %1395 }
 0x23f   :  { %v1405_v19 = vadd.f32 %v1394_v14, %v1301_v41  ;;  %v1406_v46 = vadd.f32 %v1396_v60, %v1302_v39  ;;  %v1867_v41 = vmul.f32 %v1863_v35, %v4702_v58  ;;  %v1889_v39 = vstv %s4743_s1  ;;  %s5162_s1 = sld [smem:[#allocation8 + $0x3e]] }
 0x240   :  { %1850 = vrot.lane.b32.xlu0 %v1840_v44, %s3539_s2  ;;  %1852 = vrot.lane.b32.xlu1 %v1841_v34, %s3539_s2  ;;  %v1330_v44 = vadd.f32 %v4699_v21, %v4613_v28  ;;  %v1353_v28 = vadd.f32 %v4706_v12, %v4623_v38 }
 0x241   :  { %v4751_v47 = vadd.f32 %v1493_v53, %v1405_v19  ;;  %v4756_v20 = vadd.f32 %v1494_v49, %v1406_v46  ;;  %v1890_v19 = vmul.f32 %v1889_v39, %v4685_v6  ;;  %v1891_v46 = vmul.f32 %v1889_v39, %v4690_v42 }
 0x242   :  { %v1398_v40 = vpop.permute.xlu0 %1397  ;;  %v1400_v0 = vpop.permute.xlu1 %1399  ;;  %v1505_v49 = vmul.f32 %v1502_v54, %v4504_v50  ;;  %v1356_v54 = vadd.f32 %v4717_v23, %v4643_v48  ;;  %v1379_v48 = vadd.f32 %v4722_v62, %v4652_v59 }
 0x243   :  { %v1407_v32 = vadd.f32 %v1398_v40, %v1303_v57  ;;  %v1408_v22 = vadd.f32 %v1400_v0, %v1304_v29  ;;  %v1512_v57 = vstv %s4762_s27  ;;  %v1354_v29 = vadd.f32 %v4709_v52, %v4628_v7  ;;  %s5182_s27 = sld [smem:[#allocation8 + $0x81]] }
 0x244   :  { %1872 = vrot.lane.b32.xlu0 %v1864_v24, %s3539_s2  ;;  %1874 = vrot.lane.b32.xlu1 %v1865_v11, %s3539_s2  ;;  %v1892_v24 = vmul.f32 %v1889_v39, %v4697_v30  ;;  %v1513_v38 = vmul.f32 %v1512_v57, %v4492_v8  ;;  %v1355_v7 = vadd.f32 %v4714_v1, %v4638_v37  ;;  %v1522_v1 = vstv %s4796_s29  ;;  %s3417_s29 = sld [smem:[#allocation8 + $0x86]] }
 0x245   :  { %v4767_v33 = vadd.f32 %v1495_v45, %v1407_v32  ;;  %v4772_v63 = vadd.f32 %v1496_v51, %v1408_v22  ;;  %v1893_v45 = vmul.f32 %v1889_v39, %v4702_v58  ;;  %v1915_v22 = vstv %s4776_s28  ;;  %s3416_s28 = sld [smem:[#allocation8 + $0x62]] }
 0x246   :  { %v1420_v10 = vpop.permute.xlu0 %1419  ;;  %v1422_v15 = vpop.permute.xlu1 %1421  ;;  %v1514_v51 = vmul.f32 %v1512_v57, %v4497_v4  ;;  %v1516_v37 = vmul.f32 %v1512_v57, %v4509_v36  ;;  %v1523_v59 = vmul.f32 %v1522_v1, %v4492_v8 }
 0x247   :  { %v1431_v9 = vadd.f32 %v1420_v10, %v1327_v25  ;;  %v1432_v56 = vadd.f32 %v1422_v15, %v1328_v31  ;;  %v1916_v31 = vmul.f32 %v1915_v22, %v4685_v6 }
 0x248   :  { %1876 = vrot.lane.b32.xlu0 %v1866_v2, %s3539_s2  ;;  %1878 = vrot.lane.b32.xlu1 %v1867_v41, %s3539_s2  ;;  %v1515_v41 = vmul.f32 %v1512_v57, %v4504_v50 }
 0x249   :  { %v4784_v14 = vadd.f32 %v1503_v18, %v1431_v9  ;;  %v4789_v34 = vadd.f32 %v1504_v26, %v1432_v56  ;;  %v1917_v9 = vmul.f32 %v1915_v22, %v4690_v42  ;;  %v1380_v18 = vadd.f32 %v4725_v3, %v4657_v55 }
 0x24a   :  { %v1424_v60 = vpop.permute.xlu0 %1423  ;;  %v1426_v35 = vpop.permute.xlu1 %1425  ;;  %v1918_v26 = vmul.f32 %v1915_v22, %v4697_v30  ;;  %v1381_v55 = vadd.f32 %v4730_v16, %v4664_v43  ;;  %v1526_v43 = vmul.f32 %v1522_v1, %v4509_v36 }
 0x24b   :  { %v1433_v53 = vadd.f32 %v1424_v60, %v1329_v13  ;;  %v1434_v5 = vadd.f32 %v1426_v35, %v1330_v44  ;;  %v1941_v35 = vstv %s3392_s30  ;;  %s3422_s30 = sld [smem:[#allocation8 + $0x1c]] }
 0x24c   :  { %1898 = vrot.lane.b32.xlu0 %v1890_v19, %s3540_s5  ;;  %1900 = vrot.lane.b32.xlu1 %v1891_v46, %s3540_s5  ;;  %v1919_v19 = vmul.f32 %v1915_v22, %v4702_v58  ;;  %v1382_v46 = vadd.f32 %v4733_v17, %v4669_v61  ;;  %v1944_v17 = vmul.f32 %v1941_v35, %v4697_v30 }
 0x24d   :  { %v4801_v21 = vadd.f32 %v1505_v49, %v1433_v53  ;;  %v4806_v0 = vadd.f32 %v1506_v27, %v1434_v5  ;;  %v1524_v53 = vmul.f32 %v1522_v1, %v4497_v4  ;;  %v1942_v5 = vmul.f32 %v1941_v35, %v4685_v6 }
 0x24e   :  { %v1446_v40 = vpop.permute.xlu0 %1445  ;;  %v1448_v32 = vpop.permute.xlu1 %1447  ;;  %v1525_v4 = vmul.f32 %v1522_v1, %v4504_v50 }
 0x24f   :  { %v1457_v11 = vadd.f32 %v1446_v40, %v1353_v28  ;;  %v1458_v12 = vadd.f32 %v1448_v32, %v1354_v29  ;;  %v1943_v28 = vmul.f32 %v1941_v35, %v4690_v42  ;;  %v1945_v32 = vmul.f32 %v1941_v35, %v4702_v58 }
 0x250   :  { %1902 = vrot.lane.b32.xlu0 %v1892_v24, %s3540_s5  ;;  %1904 = vrot.lane.b32.xlu1 %v1893_v45, %s3540_s5 }
 0x251   :  { %v4816_v52 = vadd.f32 %v1513_v38, %v1457_v11  ;;  %v4821_v10 = vadd.f32 %v1514_v51, %v1458_v12  ;;  %v1967_v11 = vstv %s3393_s4  ;;  %v4878_v51 = vld [vmem:[#allocation2 + $0x32] sm:$0xff]  ;;  %s3423_s4 = sld [smem:[#allocation8 + $0x40]] }
 0x252   :  { %v1450_v25 = vpop.permute.xlu0 %1449  ;;  %v1452_v2 = vpop.permute.xlu1 %1451  ;;  %v1968_v36 = vmul.f32 %v1967_v11, %v4685_v6  ;;  %v1969_v22 = vmul.f32 %v1967_v11, %v4690_v42  ;;  %v1970_v12 = vmul.f32 %v1967_v11, %v4697_v30 }
 0x253   :  { %v1459_v15 = vadd.f32 %v1450_v25, %v1355_v7  ;;  %v1460_v39 = vadd.f32 %v1452_v2, %v1356_v54  ;;  %v1971_v54 = vmul.f32 %v1967_v11, %v4702_v58  ;;  %v2037_v25 = vstv %s3398_s6  ;;  %s3424_s6 = sld [smem:[#allocation8 + $0x64]] }
 0x254   :  { %1924 = vrot.lane.b32.xlu0 %v1916_v31, %s3540_s5  ;;  %1926 = vrot.lane.b32.xlu1 %v1917_v9, %s3540_s5  ;;  %v4883_v31 = vld [vmem:[#allocation2 + $0x3a] sm:$0xff]  ;;  %v4890_v9 = vld [vmem:[#allocation2 + $0x92] sm:$0xff] }
 0x255   :  { %v4831_v23 = vadd.f32 %v1515_v41, %v1459_v15  ;;  %v4836_v13 = vadd.f32 %v1516_v37, %v1460_v39  ;;  %v2038_v15 = vmul.f32 %v2037_v25, %v4878_v51  ;;  %v2039_v39 = vmul.f32 %v2037_v25, %v4883_v31  ;;  %v4895_v37 = vld [vmem:[#allocation2 + $0x9a] sm:$0xff] }
 0x256   :  { %v1472_v56 = vpop.permute.xlu0 %1471  ;;  %v1474_v44 = vpop.permute.xlu1 %1473 }
 0x257   :  { %v1483_v60 = vadd.f32 %v1472_v56, %v1379_v48  ;;  %v1484_v62 = vadd.f32 %v1474_v44, %v1380_v18  ;;  %v2040_v48 = vmul.f32 %v2037_v25, %v4890_v9  ;;  %v2041_v56 = vmul.f32 %v2037_v25, %v4895_v37 }
 0x258   :  { %1928 = vrot.lane.b32.xlu0 %v1918_v26, %s3540_s5  ;;  %1930 = vrot.lane.b32.xlu1 %v1919_v19, %s3540_s5  ;;  %v2063_v26 = vstv %s3399_s7  ;;  %s3406_s7 = sld [smem:[#allocation8 + $0x18]] }
 0x259   :  { %v4845_v3 = vadd.f32 %v1523_v59, %v1483_v60  ;;  %v4850_v27 = vadd.f32 %v1524_v53, %v1484_v62  ;;  %v2064_v60 = vmul.f32 %v2063_v26, %v4878_v51  ;;  %v2065_v35 = vmul.f32 %v2063_v26, %v4883_v31 }
 0x25a   :  { %v1476_v49 = vpop.permute.xlu0 %1475  ;;  %v1478_v8 = vpop.permute.xlu1 %1477  ;;  %v2066_v62 = vmul.f32 %v2063_v26, %v4890_v9 }
 0x25b   :  { %v1485_v57 = vadd.f32 %v1476_v49, %v1381_v55  ;;  %v1486_v29 = vadd.f32 %v1478_v8, %v1382_v46  ;;  %v2067_v55 = vmul.f32 %v2063_v26, %v4895_v37  ;;  %v2089_v46 = vstv %s3400_s8  ;;  %s3425_s8 = sld [smem:[#allocation8 + $0x88]] }
 0x25c   :  { %1950 = vrot.lane.b32.xlu0 %v1942_v5, %s3540_s5  ;;  %1952 = vrot.lane.b32.xlu1 %v1943_v28, %s3540_s5  ;;  %v2090_v5 = vmul.f32 %v2089_v46, %v4878_v51  ;;  %v1745_v28 = vstv %s3382_s9  ;;  %s3407_s9 = sld [smem:[#allocation8 + $0x3c]] }
 0x25d   :  { %v4857_v16 = vadd.f32 %v1525_v4, %v1485_v57  ;;  %v4862_v40 = vadd.f32 %v1526_v43, %v1486_v29  ;;  %v2091_v57 = vmul.f32 %v2089_v46, %v4883_v31 }
 0x25e   :  { %v4859_v61 = vpop.permute.xlu0 %1541  ;;  %v1544_v24 = vpop.permute.xlu1 %1543 }
 0x25f   :  { %v1553_v4 = vadd.f32 %v4859_v61, %v4751_v47  ;;  %v1554_v29 = vadd.f32 %v1544_v24, %v4756_v20  ;;  %v1747_v47 = vmul.f32 %v1745_v28, %v4690_v42 }
 0x260   :  { %1954 = vrot.lane.b32.xlu0 %v1944_v17, %s3540_s5  ;;  %1956 = vrot.lane.b32.xlu1 %v1945_v32, %s3540_s5  ;;  %v2092_v17 = vmul.f32 %v2089_v46, %v4890_v9 }
 0x262   :  { %v4867_v50 = vpop.permute.xlu0 %1545  ;;  %v4870_v45 = vpop.permute.xlu1 %1547 }
 0x263   :  { %v1555_v20 = vadd.f32 %v4867_v50, %v4767_v33  ;;  %v1556_v24 = vadd.f32 %v4870_v45, %v4772_v63  ;;  %v1749_v50 = vmul.f32 %v1745_v28, %v4702_v58 }
 0x264   :  { %1976 = vrot.lane.b32.xlu0 %v1968_v36, %s3540_s5  ;;  %1978 = vrot.lane.b32.xlu1 %v1969_v22, %s3540_s5  ;;  %v2093_v36 = vmul.f32 %v2089_v46, %v4895_v37  ;;  %v2115_v22 = vstv %s3401_s10  ;;  %s5322_s10 = sld [smem:[#allocation8 + $0x1d]] }
 0x265   :  { %v2117_v26 = vmul.f32 %v2115_v22, %v4883_v31  ;;  %v2118_v46 = vmul.f32 %v2115_v22, %v4890_v9 }
 0x266   :  { %v4875_v38 = vpop.permute.xlu0 %1567  ;;  %v4880_v7 = vpop.permute.xlu1 %1569 }
 0x267   :  { %v1579_v63 = vadd.f32 %v4875_v38, %v4784_v14 }
 0x268   :  { %1980 = vrot.lane.b32.xlu0 %v1970_v12, %s3540_s5  ;;  %1982 = vrot.lane.b32.xlu1 %v1971_v54, %s3540_s5  ;;  %v1746_v12 = vmul.f32 %v1745_v28, %v4685_v6 }
 0x26a   :  { %v4887_v2 = vpop.permute.xlu0 %1571  ;;  %v4892_v41 = vpop.permute.xlu1 %1573 }
 0x26c   :  { %2046 = vrot.lane.b32.xlu0 %v2038_v15, %s3539_s2  ;;  %2048 = vrot.lane.b32.xlu1 %v2039_v39, %s3539_s2  ;;  %v2116_v15 = vmul.f32 %v2115_v22, %v4878_v51 }
 0x26e   :  { %v4899_v1 = vpop.permute.xlu0 %1593  ;;  %v4902_v18 = vpop.permute.xlu1 %1595 }
 0x270   :  { %2050 = vrot.lane.b32.xlu0 %v2040_v48, %s3539_s2  ;;  %2052 = vrot.lane.b32.xlu1 %v2041_v56, %s3539_s2 }
 0x272   :  { %v4907_v44 = vpop.permute.xlu0 %1597  ;;  %v4910_v19 = vpop.permute.xlu1 %1599 }
 0x274   :  { %2072 = vrot.lane.b32.xlu0 %v2064_v60, %s3539_s2  ;;  %2074 = vrot.lane.b32.xlu1 %v2065_v35, %s3539_s2  ;;  %v1748_v60 = vmul.f32 %v1745_v28, %v4697_v30  ;;  %v1755_v35 = vstv %s3383_s11  ;;  %s5341_s11 = sld [smem:[#allocation8 + $0x60]] }
 0x275   :  { %v1756_v14 = vmul.f32 %v1755_v35, %v4685_v6 }
 0x276   :  { %v4915_v59 = vpop.permute.xlu0 %1619  ;;  %v4918_v53 = vpop.permute.xlu1 %1621 }
 0x278   :  { %2076 = vrot.lane.b32.xlu0 %v2066_v62, %s3539_s2  ;;  %2078 = vrot.lane.b32.xlu1 %v2067_v55, %s3539_s2  ;;  %v1580_v62 = vadd.f32 %v4880_v7, %v4789_v34  ;;  %v1757_v34 = vmul.f32 %v1755_v35, %v4690_v42  ;;  %v1581_v7 = vadd.f32 %v4887_v2, %v4801_v21 }
 0x279   :  { %v1759_v2 = vmul.f32 %v1755_v35, %v4702_v58 }
 0x27a   :  { %v4923_v49 = vpop.permute.xlu0 %1623  ;;  %v4926_v8 = vpop.permute.xlu1 %1625 }
 0x27c   :  { %2098 = vrot.lane.b32.xlu0 %v2090_v5, %s3539_s2  ;;  %2100 = vrot.lane.b32.xlu1 %v2091_v57, %s3539_s2 }
 0x27e   :  { %v1646_v43 = vpop.permute.xlu0 %1645  ;;  %v1648_v32 = vpop.permute.xlu1 %1647 }
 0x27f   :  { %v1657_v11 = vadd.f32 %v1646_v43, %v1553_v4  ;;  %v1658_v54 = vadd.f32 %v1648_v32, %v1554_v29  ;;  %v2119_v4 = vmul.f32 %v2115_v22, %v4895_v37  ;;  %v2141_v29 = vstv %s4936_s12  ;;  %s5355_s12 = sld [smem:[#allocation8 + $0x41]] }
 0x280   :  { %2102 = vrot.lane.b32.xlu0 %v2092_v17, %s3539_s2  ;;  %2104 = vrot.lane.b32.xlu1 %v2093_v36, %s3539_s2  ;;  %v1582_v17 = vadd.f32 %v4892_v41, %v4806_v0  ;;  %v1605_v0 = vadd.f32 %v4899_v1, %v4816_v52 }
 0x281   :  { %v4944_v61 = vadd.f32 %v1746_v12, %v1657_v11  ;;  %v4949_v39 = vadd.f32 %v1747_v47, %v1658_v54  ;;  %v2142_v11 = vmul.f32 %v2141_v29, %v4878_v51  ;;  %v2143_v54 = vmul.f32 %v2141_v29, %v4883_v31 }
 0x282   :  { %v1650_v25 = vpop.permute.xlu0 %1649  ;;  %v1652_v48 = vpop.permute.xlu1 %1651  ;;  %v1758_v47 = vmul.f32 %v1755_v35, %v4697_v30  ;;  %v1608_v35 = vadd.f32 %v4910_v19, %v4836_v13  ;;  %v1631_v13 = vadd.f32 %v4915_v59, %v4845_v3 }
 0x283   :  { %v1659_v56 = vadd.f32 %v1650_v25, %v1555_v20  ;;  %v1660_v33 = vadd.f32 %v1652_v48, %v1556_v24  ;;  %v1765_v20 = vstv %s4955_s13  ;;  %v1606_v24 = vadd.f32 %v4902_v18, %v4821_v10  ;;  %s5375_s13 = sld [smem:[#allocation8 + $0x84]] }
 0x284   :  { %2124 = vrot.lane.b32.xlu0 %v2116_v15, %s3539_s2  ;;  %2126 = vrot.lane.b32.xlu1 %v2117_v26, %s3539_s2  ;;  %v2144_v15 = vmul.f32 %v2141_v29, %v4890_v9  ;;  %v1766_v52 = vmul.f32 %v1765_v20, %v4685_v6  ;;  %v1607_v10 = vadd.f32 %v4907_v44, %v4831_v23  ;;  %v1775_v44 = vstv %s4989_s17  ;;  %s3429_s17 = sld [smem:[#allocation8 + $0x89]] }
 0x285   :  { %v4960_v45 = vadd.f32 %v1748_v60, %v1659_v56  ;;  %v4965_v5 = vadd.f32 %v1749_v50, %v1660_v33  ;;  %v2145_v60 = vmul.f32 %v2141_v29, %v4895_v37  ;;  %v2167_v33 = vstv %s4969_s14  ;;  %s3428_s14 = sld [smem:[#allocation8 + $0x65]] }
 0x286   :  { %v1672_v55 = vpop.permute.xlu0 %1671  ;;  %v1674_v57 = vpop.permute.xlu1 %1673  ;;  %v1767_v50 = vmul.f32 %v1765_v20, %v4690_v42  ;;  %v1769_v23 = vmul.f32 %v1765_v20, %v4702_v58  ;;  %v1776_v3 = vmul.f32 %v1775_v44, %v4685_v6 }
 0x287   :  { %v1683_v28 = vadd.f32 %v1672_v55, %v1579_v63  ;;  %v1684_v38 = vadd.f32 %v1674_v57, %v1580_v62  ;;  %v2168_v62 = vmul.f32 %v2167_v33, %v4878_v51 }
 0x288   :  { %2128 = vrot.lane.b32.xlu0 %v2118_v46, %s3539_s2  ;;  %2130 = vrot.lane.b32.xlu1 %v2119_v4, %s3539_s2  ;;  %v1768_v4 = vmul.f32 %v1765_v20, %v4697_v30 }
 0x289   :  { %v4977_v43 = vadd.f32 %v1756_v14, %v1683_v28  ;;  %v4982_v36 = vadd.f32 %v1757_v34, %v1684_v38  ;;  %v2169_v28 = vmul.f32 %v2167_v33, %v4883_v31  ;;  %v1632_v14 = vadd.f32 %v4918_v53, %v4850_v27 }
 0x28a   :  { %v1676_v32 = vpop.permute.xlu0 %1675  ;;  %v1678_v22 = vpop.permute.xlu1 %1677  ;;  %v2170_v34 = vmul.f32 %v2167_v33, %v4890_v9  ;;  %v1633_v27 = vadd.f32 %v4923_v49, %v4857_v16  ;;  %v1779_v16 = vmul.f32 %v1775_v44, %v4702_v58 }
 0x28b   :  { %v1685_v12 = vadd.f32 %v1676_v32, %v1581_v7  ;;  %v1686_v21 = vadd.f32 %v1678_v22, %v1582_v17  ;;  %v2193_v22 = vstv %s3404_s18  ;;  %s3434_s18 = sld [smem:[#allocation8 + $0x1f]] }
 0x28c   :  { %2150 = vrot.lane.b32.xlu0 %v2142_v11, %s3540_s5  ;;  %2152 = vrot.lane.b32.xlu1 %v2143_v54, %s3540_s5  ;;  %v2171_v11 = vmul.f32 %v2167_v33, %v4895_v37  ;;  %v1634_v54 = vadd.f32 %v4926_v8, %v4862_v40  ;;  %v2196_v8 = vmul.f32 %v2193_v22, %v4890_v9 }
 0x28d   :  { %v4994_v41 = vadd.f32 %v1758_v47, %v1685_v12  ;;  %v4999_v48 = vadd.f32 %v1759_v2, %v1686_v21  ;;  %v1777_v12 = vmul.f32 %v1775_v44, %v4690_v42  ;;  %v2194_v21 = vmul.f32 %v2193_v22, %v4878_v51 }
 0x28e   :  { %v1698_v25 = vpop.permute.xlu0 %1697  ;;  %v1700_v56 = vpop.permute.xlu1 %1699  ;;  %v1778_v42 = vmul.f32 %v1775_v44, %v4697_v30 }
 0x28f   :  { %v1709_v26 = vadd.f32 %v1698_v25, %v1605_v0  ;;  %v1710_v1 = vadd.f32 %v1700_v56, %v1606_v24  ;;  %v2195_v0 = vmul.f32 %v2193_v22, %v4883_v31  ;;  %v2197_v56 = vmul.f32 %v2193_v22, %v4895_v37 }
 0x290   :  { %2154 = vrot.lane.b32.xlu0 %v2144_v15, %s3540_s5  ;;  %2156 = vrot.lane.b32.xlu1 %v2145_v60, %s3540_s5 }
 0x291   :  { %v5009_v18 = vadd.f32 %v1766_v52, %v1709_v26  ;;  %v5014_v55 = vadd.f32 %v1767_v50, %v1710_v1  ;;  %v2219_v26 = vstv %s3405_s19  ;;  %v5071_v50 = vld [vmem:[#allocation2 + $0x34] sm:$0xff]  ;;  %s3435_s19 = sld [smem:[#allocation8 + $0x43]] }
 0x292   :  { %v1702_v63 = vpop.permute.xlu0 %1701  ;;  %v1704_v46 = vpop.permute.xlu1 %1703  ;;  %v2220_v58 = vmul.f32 %v2219_v26, %v4878_v51  ;;  %v2221_v33 = vmul.f32 %v2219_v26, %v4883_v31  ;;  %v2222_v1 = vmul.f32 %v2219_v26, %v4890_v9 }
 0x293   :  { %v1711_v57 = vadd.f32 %v1702_v63, %v1607_v10  ;;  %v1712_v29 = vadd.f32 %v1704_v46, %v1608_v35  ;;  %v2223_v35 = vmul.f32 %v2219_v26, %v4895_v37  ;;  %v2289_v63 = vstv %s3410_s20  ;;  %s3436_s20 = sld [smem:[#allocation8 + $0x67]] }
 0x294   :  { %2176 = vrot.lane.b32.xlu0 %v2168_v62, %s3540_s5  ;;  %2178 = vrot.lane.b32.xlu1 %v2169_v28, %s3540_s5  ;;  %v5076_v62 = vld [vmem:[#allocation2 + $0x3c] sm:$0xff]  ;;  %v5083_v28 = vld [vmem:[#allocation2 + $0x94] sm:$0xff] }
 0x295   :  { %v5024_v19 = vadd.f32 %v1768_v4, %v1711_v57  ;;  %v5029_v7 = vadd.f32 %v1769_v23, %v1712_v29  ;;  %v2290_v57 = vmul.f32 %v2289_v63, %v5071_v50  ;;  %v2291_v29 = vmul.f32 %v2289_v63, %v5076_v62  ;;  %v5088_v23 = vld [vmem:[#allocation2 + $0x9c] sm:$0xff] }
 0x296   :  { %v1724_v38 = vpop.permute.xlu0 %1723  ;;  %v1726_v17 = vpop.permute.xlu1 %1725 }
 0x297   :  { %v1735_v32 = vadd.f32 %v1724_v38, %v1631_v13  ;;  %v1736_v59 = vadd.f32 %v1726_v17, %v1632_v14  ;;  %v2292_v13 = vmul.f32 %v2289_v63, %v5083_v28  ;;  %v2293_v38 = vmul.f32 %v2289_v63, %v5088_v23 }
 0x298   :  { %2180 = vrot.lane.b32.xlu0 %v2170_v34, %s3540_s5  ;;  %2182 = vrot.lane.b32.xlu1 %v2171_v11, %s3540_s5  ;;  %v2315_v34 = vstv %s3411_s21  ;;  %s3418_s21 = sld [smem:[#allocation8 + $0x1b]] }
 0x299   :  { %v5038_v53 = vadd.f32 %v1776_v3, %v1735_v32  ;;  %v5043_v2 = vadd.f32 %v1777_v12, %v1736_v59  ;;  %v2316_v32 = vmul.f32 %v2315_v34, %v5071_v50  ;;  %v2317_v22 = vmul.f32 %v2315_v34, %v5076_v62 }
 0x29a   :  { %v1728_v47 = vpop.permute.xlu0 %1727  ;;  %v1730_v6 = vpop.permute.xlu1 %1729  ;;  %v2318_v59 = vmul.f32 %v2315_v34, %v5083_v28 }
 0x29b   :  { %v1737_v20 = vadd.f32 %v1728_v47, %v1633_v27  ;;  %v1738_v24 = vadd.f32 %v1730_v6, %v1634_v54  ;;  %v2319_v27 = vmul.f32 %v2315_v34, %v5088_v23  ;;  %v2341_v54 = vstv %s3412_s22  ;;  %s3437_s22 = sld [smem:[#allocation8 + $0x8b]] }
 0x29c   :  { %2202 = vrot.lane.b32.xlu0 %v2194_v21, %s3540_s5  ;;  %2204 = vrot.lane.b32.xlu1 %v2195_v0, %s3540_s5  ;;  %v2342_v21 = vmul.f32 %v2341_v54, %v5071_v50  ;;  %v1997_v0 = vstv %s3394_s23  ;;  %s3419_s23 = sld [smem:[#allocation8 + $0x3f]] }
 0x29d   :  { %v5050_v49 = vadd.f32 %v1778_v42, %v1737_v20  ;;  %v5055_v25 = vadd.f32 %v1779_v16, %v1738_v24  ;;  %v2343_v20 = vmul.f32 %v2341_v54, %v5076_v62 }
 0x29e   :  { %v5052_v40 = vpop.permute.xlu0 %1794  ;;  %v1797_v15 = vpop.permute.xlu1 %1796 }
 0x29f   :  { %v1806_v42 = vadd.f32 %v5052_v40, %v4944_v61  ;;  %v1807_v24 = vadd.f32 %v1797_v15, %v4949_v39  ;;  %v1999_v61 = vmul.f32 %v1997_v0, %v4883_v31 }
 0x2a0   :  { %2206 = vrot.lane.b32.xlu0 %v2196_v8, %s3540_s5  ;;  %2208 = vrot.lane.b32.xlu1 %v2197_v56, %s3540_s5  ;;  %v2344_v8 = vmul.f32 %v2341_v54, %v5083_v28 }
 0x2a2   :  { %v5060_v30 = vpop.permute.xlu0 %1798  ;;  %v5063_v60 = vpop.permute.xlu1 %1800 }
 0x2a3   :  { %v1808_v39 = vadd.f32 %v5060_v30, %v4960_v45  ;;  %v1809_v15 = vadd.f32 %v5063_v60, %v4965_v5  ;;  %v2001_v30 = vmul.f32 %v1997_v0, %v4895_v37 }
 0x2a4   :  { %2228 = vrot.lane.b32.xlu0 %v2220_v58, %s3540_s5  ;;  %2230 = vrot.lane.b32.xlu1 %v2221_v33, %s3540_s5  ;;  %v2345_v58 = vmul.f32 %v2341_v54, %v5088_v23  ;;  %v2367_v33 = vstv %s3413_s24  ;;  %s5515_s24 = sld [smem:[#allocation8 + $0x20]] }
 0x2a5   :  { %v2369_v34 = vmul.f32 %v2367_v33, %v5076_v62  ;;  %v2370_v54 = vmul.f32 %v2367_v33, %v5083_v28 }
 0x2a6   :  { %v5068_v52 = vpop.permute.xlu0 %1820  ;;  %v5073_v10 = vpop.permute.xlu1 %1822 }
 0x2a7   :  { %v1832_v5 = vadd.f32 %v5068_v52, %v4977_v43 }
 0x2a8   :  { %2232 = vrot.lane.b32.xlu0 %v2222_v1, %s3540_s5  ;;  %2234 = vrot.lane.b32.xlu1 %v2223_v35, %s3540_s5  ;;  %v1998_v1 = vmul.f32 %v1997_v0, %v4878_v51 }
 0x2aa   :  { %v5080_v46 = vpop.permute.xlu0 %1824  ;;  %v5085_v4 = vpop.permute.xlu1 %1826 }
 0x2ac   :  { %2298 = vrot.lane.b32.xlu0 %v2290_v57, %s3539_s2  ;;  %2300 = vrot.lane.b32.xlu1 %v2291_v29, %s3539_s2  ;;  %v2368_v57 = vmul.f32 %v2367_v33, %v5071_v50 }
 0x2ae   :  { %v5092_v44 = vpop.permute.xlu0 %1846  ;;  %v5095_v14 = vpop.permute.xlu1 %1848 }
 0x2b0   :  { %2302 = vrot.lane.b32.xlu0 %v2292_v13, %s3539_s2  ;;  %2304 = vrot.lane.b32.xlu1 %v2293_v38, %s3539_s2 }
 0x2b2   :  { %v5100_v17 = vpop.permute.xlu0 %1850  ;;  %v5103_v11 = vpop.permute.xlu1 %1852 }
 0x2b4   :  { %2324 = vrot.lane.b32.xlu0 %v2316_v32, %s3539_s2  ;;  %2326 = vrot.lane.b32.xlu1 %v2317_v22, %s3539_s2  ;;  %v2000_v32 = vmul.f32 %v1997_v0, %v4890_v9  ;;  %v2007_v22 = vstv %s3395_s25  ;;  %s5534_s25 = sld [smem:[#allocation8 + $0x63]] }
 0x2b5   :  { %v2008_v43 = vmul.f32 %v2007_v22, %v4878_v51 }
 0x2b6   :  { %v5108_v3 = vpop.permute.xlu0 %1872  ;;  %v5111_v12 = vpop.permute.xlu1 %1874 }
 0x2b8   :  { %2328 = vrot.lane.b32.xlu0 %v2318_v59, %s3539_s2  ;;  %2330 = vrot.lane.b32.xlu1 %v2319_v27, %s3539_s2  ;;  %v1833_v59 = vadd.f32 %v5073_v10, %v4982_v36  ;;  %v2009_v36 = vmul.f32 %v2007_v22, %v4883_v31  ;;  %v1834_v10 = vadd.f32 %v5080_v46, %v4994_v41 }
 0x2b9   :  { %v2011_v46 = vmul.f32 %v2007_v22, %v4895_v37 }
 0x2ba   :  { %v5116_v47 = vpop.permute.xlu0 %1876  ;;  %v5119_v6 = vpop.permute.xlu1 %1878 }
 0x2bc   :  { %2350 = vrot.lane.b32.xlu0 %v2342_v21, %s3539_s2  ;;  %2352 = vrot.lane.b32.xlu1 %v2343_v20, %s3539_s2 }
 0x2be   :  { %v1899_v16 = vpop.permute.xlu0 %1898  ;;  %v1901_v56 = vpop.permute.xlu1 %1900 }
 0x2bf   :  { %v1910_v26 = vadd.f32 %v1899_v16, %v1806_v42  ;;  %v1911_v35 = vadd.f32 %v1901_v56, %v1807_v24  ;;  %v2371_v42 = vmul.f32 %v2367_v33, %v5088_v23  ;;  %v2393_v24 = vstv %s5129_s26  ;;  %s5548_s26 = sld [smem:[#allocation8 + $0x44]] }
 0x2c0   :  { %2354 = vrot.lane.b32.xlu0 %v2344_v8, %s3539_s2  ;;  %2356 = vrot.lane.b32.xlu1 %v2345_v58, %s3539_s2  ;;  %v1835_v8 = vadd.f32 %v5085_v4, %v4999_v48  ;;  %v1858_v48 = vadd.f32 %v5092_v44, %v5009_v18 }
 0x2c1   :  { %v5137_v40 = vadd.f32 %v1998_v1, %v1910_v26  ;;  %v5142_v29 = vadd.f32 %v1999_v61, %v1911_v35  ;;  %v2394_v26 = vmul.f32 %v2393_v24, %v5071_v50  ;;  %v2395_v35 = vmul.f32 %v2393_v24, %v5076_v62 }
 0x2c2   :  { %v1903_v63 = vpop.permute.xlu0 %1902  ;;  %v1905_v13 = vpop.permute.xlu1 %1904  ;;  %v2010_v61 = vmul.f32 %v2007_v22, %v4890_v9  ;;  %v1861_v22 = vadd.f32 %v5103_v11, %v5029_v7  ;;  %v1884_v7 = vadd.f32 %v5108_v3, %v5038_v53 }
 0x2c3   :  { %v1912_v38 = vadd.f32 %v1903_v63, %v1808_v39  ;;  %v1913_v45 = vadd.f32 %v1905_v13, %v1809_v15  ;;  %v2017_v39 = vstv %s5148_s0  ;;  %v1859_v15 = vadd.f32 %v5095_v14, %v5014_v55  ;;  %s5568_s0 = sld [smem:[#allocation8 + $0x87]] }
 0x2c4   :  { %2376 = vrot.lane.b32.xlu0 %v2368_v57, %s3539_s2  ;;  %2378 = vrot.lane.b32.xlu1 %v2369_v34, %s3539_s2  ;;  %v2396_v57 = vmul.f32 %v2393_v24, %v5083_v28  ;;  %v2018_v18 = vmul.f32 %v2017_v39, %v4878_v51  ;;  %v1860_v55 = vadd.f32 %v5100_v17, %v5024_v19  ;;  %v2027_v17 = vstv %s5182_s27  ;;  %s3441_s27 = sld [smem:[#allocation8 + $0x8c]] }
 0x2c5   :  { %v5153_v60 = vadd.f32 %v2000_v32, %v1912_v38  ;;  %v5158_v21 = vadd.f32 %v2001_v30, %v1913_v45  ;;  %v2397_v32 = vmul.f32 %v2393_v24, %v5088_v23  ;;  %v2419_v45 = vstv %s5162_s1  ;;  %s3440_s1 = sld [smem:[#allocation8 + $0x68]] }
 0x2c6   :  { %v1925_v27 = vpop.permute.xlu0 %1924  ;;  %v1927_v20 = vpop.permute.xlu1 %1926  ;;  %v2019_v30 = vmul.f32 %v2017_v39, %v4883_v31  ;;  %v2021_v19 = vmul.f32 %v2017_v39, %v4895_v37  ;;  %v2028_v53 = vmul.f32 %v2027_v17, %v4878_v51 }
 0x2c7   :  { %v1936_v0 = vadd.f32 %v1925_v27, %v1832_v5  ;;  %v1937_v52 = vadd.f32 %v1927_v20, %v1833_v59  ;;  %v2420_v59 = vmul.f32 %v2419_v45, %v5071_v50 }
 0x2c8   :  { %2380 = vrot.lane.b32.xlu0 %v2370_v54, %s3539_s2  ;;  %2382 = vrot.lane.b32.xlu1 %v2371_v42, %s3539_s2  ;;  %v2020_v42 = vmul.f32 %v2017_v39, %v4890_v9 }
 0x2c9   :  { %v5170_v16 = vadd.f32 %v2008_v43, %v1936_v0  ;;  %v5175_v58 = vadd.f32 %v2009_v36, %v1937_v52  ;;  %v2421_v0 = vmul.f32 %v2419_v45, %v5076_v62  ;;  %v1885_v43 = vadd.f32 %v5111_v12, %v5043_v2 }
 0x2ca   :  { %v1929_v56 = vpop.permute.xlu0 %1928  ;;  %v1931_v33 = vpop.permute.xlu1 %1930  ;;  %v2422_v36 = vmul.f32 %v2419_v45, %v5083_v28  ;;  %v1886_v2 = vadd.f32 %v5116_v47, %v5050_v49  ;;  %v2031_v49 = vmul.f32 %v2027_v17, %v4895_v37 }
 0x2cb   :  { %v1938_v1 = vadd.f32 %v1929_v56, %v1834_v10  ;;  %v1939_v41 = vadd.f32 %v1931_v33, %v1835_v8  ;;  %v2445_v33 = vstv %s3416_s28  ;;  %s3446_s28 = sld [smem:[#allocation8 + $0x22]] }
 0x2cc   :  { %2402 = vrot.lane.b32.xlu0 %v2394_v26, %s3540_s5  ;;  %2404 = vrot.lane.b32.xlu1 %v2395_v35, %s3540_s5  ;;  %v2423_v26 = vmul.f32 %v2419_v45, %v5088_v23  ;;  %v1887_v35 = vadd.f32 %v5119_v6, %v5055_v25  ;;  %v2448_v6 = vmul.f32 %v2445_v33, %v5083_v28 }
 0x2cd   :  { %v5187_v4 = vadd.f32 %v2010_v61, %v1938_v1  ;;  %v5192_v13 = vadd.f32 %v2011_v46, %v1939_v41  ;;  %v2029_v1 = vmul.f32 %v2027_v17, %v4883_v31  ;;  %v2446_v41 = vmul.f32 %v2445_v33, %v5071_v50 }
 0x2ce   :  { %v1951_v63 = vpop.permute.xlu0 %1950  ;;  %v1953_v38 = vpop.permute.xlu1 %1952  ;;  %v2030_v31 = vmul.f32 %v2027_v17, %v4890_v9 }
 0x2cf   :  { %v1962_v34 = vadd.f32 %v1951_v63, %v1858_v48  ;;  %v1963_v44 = vadd.f32 %v1953_v38, %v1859_v15  ;;  %v2447_v48 = vmul.f32 %v2445_v33, %v5076_v62  ;;  %v2449_v38 = vmul.f32 %v2445_v33, %v5088_v23 }
 0x2d0   :  { %2406 = vrot.lane.b32.xlu0 %v2396_v57, %s3540_s5  ;;  %2408 = vrot.lane.b32.xlu1 %v2397_v32, %s3540_s5 }
 0x2d1   :  { %v5202_v14 = vadd.f32 %v2018_v18, %v1962_v34  ;;  %v5207_v27 = vadd.f32 %v2019_v30, %v1963_v44  ;;  %v2471_v34 = vstv %s3417_s29  ;;  %v5264_v30 = vld [vmem:[#allocation2 + $0x48] sm:$0xff]  ;;  %s3447_s29 = sld [smem:[#allocation8 + $0x46]] }
 0x2d2   :  { %v1955_v5 = vpop.permute.xlu0 %1954  ;;  %v1957_v54 = vpop.permute.xlu1 %1956  ;;  %v2472_v37 = vmul.f32 %v2471_v34, %v5071_v50  ;;  %v2473_v45 = vmul.f32 %v2471_v34, %v5076_v62  ;;  %v2474_v44 = vmul.f32 %v2471_v34, %v5083_v28 }
 0x2d3   :  { %v1964_v20 = vadd.f32 %v1955_v5, %v1860_v55  ;;  %v1965_v24 = vadd.f32 %v1957_v54, %v1861_v22  ;;  %v2475_v22 = vmul.f32 %v2471_v34, %v5088_v23  ;;  %v2542_v5 = vstv %s3422_s30  ;;  %s3448_s30 = sld [smem:[#allocation8 + $0x6a]] }
 0x2d4   :  { %2428 = vrot.lane.b32.xlu0 %v2420_v59, %s3540_s5  ;;  %2430 = vrot.lane.b32.xlu1 %v2421_v0, %s3540_s5  ;;  %v5269_v59 = vld [vmem:[#allocation2 + $0x50] sm:$0xff]  ;;  %v5276_v0 = vld [vmem:[#allocation2 + $0xa8] sm:$0xff] }
 0x2d5   :  { %v5217_v11 = vadd.f32 %v2020_v42, %v1964_v20  ;;  %v5222_v10 = vadd.f32 %v2021_v19, %v1965_v24  ;;  %v2543_v20 = vmul.f32 %v2542_v5, %v5264_v30  ;;  %v2544_v24 = vmul.f32 %v2542_v5, %v5269_v59  ;;  %v5281_v19 = vld [vmem:[#allocation2 + $0xb0] sm:$0xff] }
 0x2d6   :  { %v1977_v52 = vpop.permute.xlu0 %1976  ;;  %v1979_v8 = vpop.permute.xlu1 %1978 }
 0x2d7   :  { %v1988_v56 = vadd.f32 %v1977_v52, %v1884_v7  ;;  %v1989_v3 = vadd.f32 %v1979_v8, %v1885_v43  ;;  %v2545_v7 = vmul.f32 %v2542_v5, %v5276_v0  ;;  %v2546_v52 = vmul.f32 %v2542_v5, %v5281_v19 }
 0x2d8   :  { %2432 = vrot.lane.b32.xlu0 %v2422_v36, %s3540_s5  ;;  %2434 = vrot.lane.b32.xlu1 %v2423_v26, %s3540_s5  ;;  %v2568_v36 = vstv %s3423_s4  ;;  %s3430_s4 = sld [smem:[#allocation8 + $0x1e]] }
 0x2d9   :  { %v5231_v12 = vadd.f32 %v2028_v53, %v1988_v56  ;;  %v5236_v46 = vadd.f32 %v2029_v1, %v1989_v3  ;;  %v2569_v56 = vmul.f32 %v2568_v36, %v5264_v30  ;;  %v2570_v33 = vmul.f32 %v2568_v36, %v5269_v59 }
 0x2da   :  { %v1981_v61 = vpop.permute.xlu0 %1980  ;;  %v1983_v51 = vpop.permute.xlu1 %1982  ;;  %v2571_v3 = vmul.f32 %v2568_v36, %v5276_v0 }
 0x2db   :  { %v1990_v39 = vadd.f32 %v1981_v61, %v1886_v2  ;;  %v1991_v15 = vadd.f32 %v1983_v51, %v1887_v35  ;;  %v2572_v2 = vmul.f32 %v2568_v36, %v5281_v19  ;;  %v2594_v35 = vstv %s3424_s6  ;;  %s3449_s6 = sld [smem:[#allocation8 + $0x8e]] }
 0x2dc   :  { %2454 = vrot.lane.b32.xlu0 %v2446_v41, %s3540_s5  ;;  %2456 = vrot.lane.b32.xlu1 %v2447_v48, %s3540_s5  ;;  %v2595_v41 = vmul.f32 %v2594_v35, %v5264_v30  ;;  %v2249_v48 = vstv %s3406_s7  ;;  %s3431_s7 = sld [smem:[#allocation8 + $0x42]] }
 0x2dd   :  { %v5243_v47 = vadd.f32 %v2030_v31, %v1990_v39  ;;  %v5248_v63 = vadd.f32 %v2031_v49, %v1991_v15  ;;  %v2596_v39 = vmul.f32 %v2594_v35, %v5269_v59 }
 0x2de   :  { %v5245_v25 = vpop.permute.xlu0 %2046  ;;  %v2049_v57 = vpop.permute.xlu1 %2048 }
 0x2df   :  { %v2058_v31 = vadd.f32 %v5245_v25, %v5137_v40  ;;  %v2059_v15 = vadd.f32 %v2049_v57, %v5142_v29  ;;  %v2251_v40 = vmul.f32 %v2249_v48, %v5076_v62 }
 0x2e0   :  { %2458 = vrot.lane.b32.xlu0 %v2448_v6, %s3540_s5  ;;  %2460 = vrot.lane.b32.xlu1 %v2449_v38, %s3540_s5  ;;  %v2597_v6 = vmul.f32 %v2594_v35, %v5276_v0 }
 0x2e2   :  { %v5253_v9 = vpop.permute.xlu0 %2050  ;;  %v5256_v32 = vpop.permute.xlu1 %2052 }
 0x2e3   :  { %v2060_v29 = vadd.f32 %v5253_v9, %v5153_v60  ;;  %v2061_v57 = vadd.f32 %v5256_v32, %v5158_v21  ;;  %v2253_v9 = vmul.f32 %v2249_v48, %v5088_v23 }
 0x2e4   :  { %2480 = vrot.lane.b32.xlu0 %v2472_v37, %s3540_s5  ;;  %2482 = vrot.lane.b32.xlu1 %v2473_v45, %s3540_s5  ;;  %v2598_v37 = vmul.f32 %v2594_v35, %v5281_v19  ;;  %v2620_v45 = vstv %s3425_s8  ;;  %s3450_s8 = sld [smem:[#allocation8 + $0x23]] }
 0x2e5   :  { %v2622_v36 = vmul.f32 %v2620_v45, %v5269_v59  ;;  %v2623_v35 = vmul.f32 %v2620_v45, %v5276_v0 }
 0x2e6   :  { %v5261_v18 = vpop.permute.xlu0 %2072  ;;  %v5266_v55 = vpop.permute.xlu1 %2074 }
 0x2e7   :  { %v2084_v21 = vadd.f32 %v5261_v18, %v5170_v16 }
 0x2e8   :  { %2484 = vrot.lane.b32.xlu0 %v2474_v44, %s3540_s5  ;;  %2486 = vrot.lane.b32.xlu1 %v2475_v22, %s3540_s5  ;;  %v2250_v44 = vmul.f32 %v2249_v48, %v5071_v50 }
 0x2ea   :  { %v5273_v54 = vpop.permute.xlu0 %2076  ;;  %v5278_v42 = vpop.permute.xlu1 %2078 }
 0x2ec   :  { %2551 = vrot.lane.b32.xlu0 %v2543_v20, %s3539_s2  ;;  %2553 = vrot.lane.b32.xlu1 %v2544_v24, %s3539_s2  ;;  %v2621_v20 = vmul.f32 %v2620_v45, %v5264_v30 }
 0x2ee   :  { %v5285_v17 = vpop.permute.xlu0 %2098  ;;  %v5288_v43 = vpop.permute.xlu1 %2100 }
 0x2f0   :  { %2555 = vrot.lane.b32.xlu0 %v2545_v7, %s3539_s2  ;;  %2557 = vrot.lane.b32.xlu1 %v2546_v52, %s3539_s2 }
 0x2f2   :  { %v5293_v8 = vpop.permute.xlu0 %2102  ;;  %v5296_v26 = vpop.permute.xlu1 %2104 }
 0x2f4   :  { %2577 = vrot.lane.b32.xlu0 %v2569_v56, %s3539_s2  ;;  %2579 = vrot.lane.b32.xlu1 %v2570_v33, %s3539_s2  ;;  %v2252_v56 = vmul.f32 %v2249_v48, %v5083_v28  ;;  %v2259_v33 = vstv %s3407_s9  ;;  %s3432_s9 = sld [smem:[#allocation8 + $0x66]] }
 0x2f5   :  { %v2260_v16 = vmul.f32 %v2259_v33, %v5071_v50 }
 0x2f6   :  { %v5301_v53 = vpop.permute.xlu0 %2124  ;;  %v5304_v1 = vpop.permute.xlu1 %2126 }
 0x2f8   :  { %2581 = vrot.lane.b32.xlu0 %v2571_v3, %s3539_s2  ;;  %2583 = vrot.lane.b32.xlu1 %v2572_v2, %s3539_s2  ;;  %v2085_v3 = vadd.f32 %v5266_v55, %v5175_v58  ;;  %v2261_v58 = vmul.f32 %v2259_v33, %v5076_v62  ;;  %v2086_v55 = vadd.f32 %v5273_v54, %v5187_v4 }
 0x2f9   :  { %v2263_v54 = vmul.f32 %v2259_v33, %v5088_v23 }
 0x2fa   :  { %v5309_v61 = vpop.permute.xlu0 %2128  ;;  %v5312_v51 = vpop.permute.xlu1 %2130 }
 0x2fc   :  { %2603 = vrot.lane.b32.xlu0 %v2595_v41, %s3539_s2  ;;  %2605 = vrot.lane.b32.xlu1 %v2596_v39, %s3539_s2 }
 0x2fe   :  { %v2151_v49 = vpop.permute.xlu0 %2150  ;;  %v2153_v38 = vpop.permute.xlu1 %2152 }
 0x2ff   :  { %v2162_v34 = vadd.f32 %v2151_v49, %v2058_v31  ;;  %v2163_v22 = vadd.f32 %v2153_v38, %v2059_v15  ;;  %v2624_v31 = vmul.f32 %v2620_v45, %v5281_v19  ;;  %v2646_v15 = vstv %s5322_s10  ;;  %s3451_s10 = sld [smem:[#allocation8 + $0x47]] }
 0x300   :  { %2607 = vrot.lane.b32.xlu0 %v2597_v6, %s3539_s2  ;;  %2609 = vrot.lane.b32.xlu1 %v2598_v37, %s3539_s2  ;;  %v2087_v6 = vadd.f32 %v5278_v42, %v5192_v13  ;;  %v2110_v13 = vadd.f32 %v5285_v17, %v5202_v14 }
 0x301   :  { %v5330_v25 = vadd.f32 %v2250_v44, %v2162_v34  ;;  %v5335_v24 = vadd.f32 %v2251_v40, %v2163_v22  ;;  %v2647_v34 = vmul.f32 %v2646_v15, %v5264_v30  ;;  %v2648_v22 = vmul.f32 %v2646_v15, %v5269_v59 }
 0x302   :  { %v2155_v5 = vpop.permute.xlu0 %2154  ;;  %v2157_v7 = vpop.permute.xlu1 %2156  ;;  %v2262_v40 = vmul.f32 %v2259_v33, %v5083_v28  ;;  %v2113_v33 = vadd.f32 %v5296_v26, %v5222_v10  ;;  %v2136_v10 = vadd.f32 %v5301_v53, %v5231_v12 }
 0x303   :  { %v2164_v52 = vadd.f32 %v2155_v5, %v2060_v29  ;;  %v2165_v60 = vadd.f32 %v2157_v7, %v2061_v57  ;;  %v2269_v29 = vstv %s5341_s11  ;;  %v2111_v57 = vadd.f32 %v5288_v43, %v5207_v27  ;;  %s3452_s11 = sld [smem:[#allocation8 + $0x6b]] }
 0x304   :  { %2629 = vrot.lane.b32.xlu0 %v2621_v20, %s3539_s2  ;;  %2631 = vrot.lane.b32.xlu1 %v2622_v36, %s3539_s2  ;;  %v2649_v20 = vmul.f32 %v2646_v15, %v5276_v0  ;;  %v2270_v14 = vmul.f32 %v2269_v29, %v5071_v50  ;;  %v2112_v27 = vadd.f32 %v5293_v8, %v5217_v11  ;;  %v2279_v8 = vstv %s5375_s13  ;;  %s3442_s13 = sld [smem:[#allocation8 + $0x21]] }
 0x305   :  { %v5346_v32 = vadd.f32 %v2252_v56, %v2164_v52  ;;  %v5351_v41 = vadd.f32 %v2253_v9, %v2165_v60  ;;  %v2650_v56 = vmul.f32 %v2646_v15, %v5281_v19  ;;  %v2672_v60 = vstv %s5355_s12  ;;  %s3453_s12 = sld [smem:[#allocation8 + $0x8f]] }
 0x306   :  { %v2177_v2 = vpop.permute.xlu0 %2176  ;;  %v2179_v39 = vpop.permute.xlu1 %2178  ;;  %v2271_v9 = vmul.f32 %v2269_v29, %v5076_v62  ;;  %v2273_v11 = vmul.f32 %v2269_v29, %v5088_v23  ;;  %v2280_v12 = vmul.f32 %v2279_v8, %v5071_v50 }
 0x307   :  { %v2188_v48 = vadd.f32 %v2177_v2, %v2084_v21  ;;  %v2189_v18 = vadd.f32 %v2179_v39, %v2085_v3  ;;  %v2673_v3 = vmul.f32 %v2672_v60, %v5264_v30 }
 0x308   :  { %2633 = vrot.lane.b32.xlu0 %v2623_v35, %s3539_s2  ;;  %2635 = vrot.lane.b32.xlu1 %v2624_v31, %s3539_s2  ;;  %v2272_v31 = vmul.f32 %v2269_v29, %v5083_v28 }
 0x309   :  { %v5363_v49 = vadd.f32 %v2260_v16, %v2188_v48  ;;  %v5368_v37 = vadd.f32 %v2261_v58, %v2189_v18  ;;  %v2674_v48 = vmul.f32 %v2672_v60, %v5269_v59  ;;  %v2137_v16 = vadd.f32 %v5304_v1, %v5236_v46 }
 0x30a   :  { %v2181_v38 = vpop.permute.xlu0 %2180  ;;  %v2183_v45 = vpop.permute.xlu1 %2182  ;;  %v2675_v58 = vmul.f32 %v2672_v60, %v5276_v0  ;;  %v2138_v46 = vadd.f32 %v5309_v61, %v5243_v47  ;;  %v2283_v47 = vmul.f32 %v2279_v8, %v5088_v23 }
 0x30b   :  { %v2190_v44 = vadd.f32 %v2181_v38, %v2086_v55  ;;  %v2191_v4 = vadd.f32 %v2183_v45, %v2087_v6  ;;  %v2698_v45 = vstv %s3428_s14  ;;  %s3444_s14 = sld [smem:[#allocation8 + $0x69]] }
 0x30c   :  { %2655 = vrot.lane.b32.xlu0 %v2647_v34, %s3540_s5  ;;  %2657 = vrot.lane.b32.xlu1 %v2648_v22, %s3540_s5  ;;  %v2676_v34 = vmul.f32 %v2672_v60, %v5281_v19  ;;  %v2139_v22 = vadd.f32 %v5312_v51, %v5248_v63  ;;  %v2701_v51 = vmul.f32 %v2698_v45, %v5276_v0 }
 0x30d   :  { %v5380_v42 = vadd.f32 %v2262_v40, %v2190_v44  ;;  %v5385_v7 = vadd.f32 %v2263_v54, %v2191_v4  ;;  %v2281_v44 = vmul.f32 %v2279_v8, %v5076_v62  ;;  %v2699_v4 = vmul.f32 %v2698_v45, %v5264_v30 }
 0x30e   :  { %v2203_v5 = vpop.permute.xlu0 %2202  ;;  %v2205_v52 = vpop.permute.xlu1 %2204  ;;  %v2282_v62 = vmul.f32 %v2279_v8, %v5083_v28 }
 0x30f   :  { %v2214_v36 = vadd.f32 %v2203_v5, %v2110_v13  ;;  %v2215_v17 = vadd.f32 %v2205_v52, %v2111_v57  ;;  %v2700_v13 = vmul.f32 %v2698_v45, %v5269_v59  ;;  %v2702_v52 = vmul.f32 %v2698_v45, %v5281_v19 }
 0x310   :  { %2659 = vrot.lane.b32.xlu0 %v2649_v20, %s3540_s5  ;;  %2661 = vrot.lane.b32.xlu1 %v2650_v56, %s3540_s5 }
 0x311   :  { %v5395_v43 = vadd.f32 %v2270_v14, %v2214_v36  ;;  %v5400_v2 = vadd.f32 %v2271_v9, %v2215_v17  ;;  %v2724_v36 = vstv %s3429_s17  ;;  %v5457_v9 = vld [vmem:[#allocation2 + $0x4a] sm:$0xff]  ;;  %s3445_s17 = sld [smem:[#allocation8 + $0x8d]] }
 0x312   :  { %v2207_v21 = vpop.permute.xlu0 %2206  ;;  %v2209_v35 = vpop.permute.xlu1 %2208  ;;  %v2725_v23 = vmul.f32 %v2724_v36, %v5264_v30  ;;  %v2726_v60 = vmul.f32 %v2724_v36, %v5269_v59  ;;  %v2727_v17 = vmul.f32 %v2724_v36, %v5276_v0 }
 0x313   :  { %v2216_v39 = vadd.f32 %v2207_v21, %v2112_v27  ;;  %v2217_v15 = vadd.f32 %v2209_v35, %v2113_v33  ;;  %v2728_v33 = vmul.f32 %v2724_v36, %v5281_v19  ;;  %v2794_v21 = vstv %s3434_s18  ;;  %s3541_s18 = smov [#allocation10]  }
 0x314   :  { %2681 = vrot.lane.b32.xlu0 %v2673_v3, %s3540_s5  ;;  %2683 = vrot.lane.b32.xlu1 %v2674_v48, %s3540_s5  ;;  %v5462_v3 = vld [vmem:[#allocation2 + $0x52] sm:$0xff]  ;;  %v5469_v48 = vld [vmem:[#allocation2 + $0xaa] sm:$0xff] }
 0x315   :  { %v5410_v26 = vadd.f32 %v2272_v31, %v2216_v39  ;;  %v5415_v55 = vadd.f32 %v2273_v11, %v2217_v15  ;;  %v2795_v39 = vmul.f32 %v2794_v21, %v5457_v9  ;;  %v2796_v15 = vmul.f32 %v2794_v21, %v5462_v3  ;;  %v5474_v11 = vld [vmem:[#allocation2 + $0xb2] sm:$0xff] }
 0x316   :  { %v2229_v18 = vpop.permute.xlu0 %2228  ;;  %v2231_v6 = vpop.permute.xlu1 %2230 }
 0x317   :  { %v2240_v38 = vadd.f32 %v2229_v18, %v2136_v10  ;;  %v2241_v53 = vadd.f32 %v2231_v6, %v2137_v16  ;;  %v2797_v10 = vmul.f32 %v2794_v21, %v5469_v48  ;;  %v2798_v18 = vmul.f32 %v2794_v21, %v5474_v11 }
 0x318   :  { %2685 = vrot.lane.b32.xlu0 %v2675_v58, %s3540_s5  ;;  %2687 = vrot.lane.b32.xlu1 %v2676_v34, %s3540_s5  ;;  %v2820_v58 = vstv %s3435_s19  ;;  %s3294_s19 = sshll.u32 %s3541_s18, 4  ;;  %s3295_s19 = int_to_ptr.vmem [resolvable:$true] %s3294_s19 }
 0x319   :  { %v5424_v1 = vadd.f32 %v2280_v12, %v2240_v38  ;;  %v5429_v54 = vadd.f32 %v2281_v44, %v2241_v53  ;;  %v2821_v38 = vmul.f32 %v2820_v58, %v5457_v9  ;;  %v2822_v45 = vmul.f32 %v2820_v58, %v5462_v3  ;;  %p3509_p11 = scmp.lt.s32.totalorder %s3295_s19, %s3295_s19 }
 0x31a   :  { %v2233_v40 = vpop.permute.xlu0 %2232  ;;  %v2235_v50 = vpop.permute.xlu1 %2234  ;;  %v2823_v53 = vmul.f32 %v2820_v58, %v5469_v48 }
 0x31b   :  { %v2242_v29 = vadd.f32 %v2233_v40, %v2138_v46  ;;  %v2243_v57 = vadd.f32 %v2235_v50, %v2139_v22  ;;  %v2824_v46 = vmul.f32 %v2820_v58, %v5474_v11  ;;  %v2846_v22 = vstv %s3436_s20  ;;  %s3504_s20 = scalar_lea.vmem %s3295_s19, 2048 }
 0x31c   :  { %2707 = vrot.lane.b32.xlu0 %v2699_v4, %s3540_s5  ;;  %2709 = vrot.lane.b32.xlu1 %v2700_v13, %s3540_s5  ;;  %v2847_v4 = vmul.f32 %v2846_v22, %v5457_v9  ;;  %v2502_v13 = vstv %s3418_s21  ;;  %p3505_p10 = scmp.ne.s32.totalorder %s3295_s19, %s3504_s20  ;;  %p3510_p12 = scmp.lt.s32.totalorder %s3504_s20, %s3504_s20 }
 0x31d   :  { %v5436_v61 = vadd.f32 %v2282_v62, %v2242_v29  ;;  %v5441_v5 = vadd.f32 %v2283_v47, %v2243_v57  ;;  %v2848_v29 = vmul.f32 %v2846_v22, %v5462_v3 }
 0x31e   :  { %v5438_v63 = vpop.permute.xlu0 %2298  ;;  %v2301_v20 = vpop.permute.xlu1 %2300  ;;  %p3511_p13 = por %p3510_p12, %p3509_p11 }
 0x31f   :  { %v2310_v62 = vadd.f32 %v5438_v63, %v5330_v25  ;;  %v2311_v57 = vadd.f32 %v2301_v20, %v5335_v24  ;;  %v2504_v25 = vmul.f32 %v2502_v13, %v5269_v59 }
 0x320   :  { %2711 = vrot.lane.b32.xlu0 %v2701_v51, %s3540_s5  ;;  %2713 = vrot.lane.b32.xlu1 %v2702_v52, %s3540_s5  ;;  %v2849_v51 = vmul.f32 %v2846_v22, %v5469_v48  ;;  %p3512_p0 = pnand %p3511_p13, %p3505_p10 }
 0x322   :  { %v5446_v28 = vpop.permute.xlu0 %2302  ;;  %v5449_v56 = vpop.permute.xlu1 %2304 }
 0x323   :  { %v2312_v24 = vadd.f32 %v5446_v28, %v5346_v32  ;;  %v2313_v20 = vadd.f32 %v5449_v56, %v5351_v41  ;;  %v2506_v28 = vmul.f32 %v2502_v13, %v5281_v19 }
 0x324   :  { %2733 = vrot.lane.b32.xlu0 %v2725_v23, %s3540_s5  ;;  %2735 = vrot.lane.b32.xlu1 %v2726_v60, %s3540_s5  ;;  %v2850_v23 = vmul.f32 %v2846_v22, %v5474_v11  ;;  %v2872_v60 = vstv %s3437_s22 }
 0x325   :  { %v2874_v58 = vmul.f32 %v2872_v60, %v5462_v3  ;;  %v2875_v22 = vmul.f32 %v2872_v60, %v5469_v48 }
 0x326   :  { %v5454_v14 = vpop.permute.xlu0 %2324  ;;  %v5459_v27 = vpop.permute.xlu1 %2326 }
 0x327   :  { %v2336_v41 = vadd.f32 %v5454_v14, %v5363_v49 }
 0x328   :  { %2737 = vrot.lane.b32.xlu0 %v2727_v17, %s3540_s5  ;;  %2739 = vrot.lane.b32.xlu1 %v2728_v33, %s3540_s5  ;;  %v2503_v17 = vmul.f32 %v2502_v13, %v5264_v30 }
 0x32a   :  { %v5466_v35 = vpop.permute.xlu0 %2328  ;;  %v5471_v31 = vpop.permute.xlu1 %2330 }
 0x32c   :  { %2803 = vrot.lane.b32.xlu0 %v2795_v39, %s3539_s2  ;;  %2805 = vrot.lane.b32.xlu1 %v2796_v15, %s3539_s2  ;;  %v2873_v39 = vmul.f32 %v2872_v60, %v5457_v9 }
 0x32e   :  { %v5478_v8 = vpop.permute.xlu0 %2350  ;;  %v5481_v16 = vpop.permute.xlu1 %2352 }
 0x330   :  { %2807 = vrot.lane.b32.xlu0 %v2797_v10, %s3539_s2  ;;  %2809 = vrot.lane.b32.xlu1 %v2798_v18, %s3539_s2 }
 0x332   :  { %v5486_v6 = vpop.permute.xlu0 %2354  ;;  %v5489_v34 = vpop.permute.xlu1 %2356 }
 0x334   :  { %2829 = vrot.lane.b32.xlu0 %v2821_v38, %s3539_s2  ;;  %2831 = vrot.lane.b32.xlu1 %v2822_v45, %s3539_s2  ;;  %v2505_v38 = vmul.f32 %v2502_v13, %v5276_v0  ;;  %v2512_v45 = vstv %s3419_s23 }
 0x335   :  { %v2513_v49 = vmul.f32 %v2512_v45, %v5264_v30 }
 0x336   :  { %v5494_v12 = vpop.permute.xlu0 %2376  ;;  %v5497_v44 = vpop.permute.xlu1 %2378 }
 0x338   :  { %2833 = vrot.lane.b32.xlu0 %v2823_v53, %s3539_s2  ;;  %2835 = vrot.lane.b32.xlu1 %v2824_v46, %s3539_s2  ;;  %v2337_v53 = vadd.f32 %v5459_v27, %v5368_v37  ;;  %v2514_v37 = vmul.f32 %v2512_v45, %v5269_v59  ;;  %v2338_v27 = vadd.f32 %v5466_v35, %v5380_v42 }
 0x339   :  { %v2516_v35 = vmul.f32 %v2512_v45, %v5281_v19 }
 0x33a   :  { %v5502_v40 = vpop.permute.xlu0 %2380  ;;  %v5505_v50 = vpop.permute.xlu1 %2382 }
 0x33c   :  { %2855 = vrot.lane.b32.xlu0 %v2847_v4, %s3539_s2  ;;  %2857 = vrot.lane.b32.xlu1 %v2848_v29, %s3539_s2 }
 0x33e   :  { %v2403_v47 = vpop.permute.xlu0 %2402  ;;  %v2405_v52 = vpop.permute.xlu1 %2404 }
 0x33f   :  { %v2414_v36 = vadd.f32 %v2403_v47, %v2310_v62  ;;  %v2415_v33 = vadd.f32 %v2405_v52, %v2311_v57  ;;  %v2876_v62 = vmul.f32 %v2872_v60, %v5474_v11  ;;  %v2898_v57 = vstv %s5515_s24 }
 0x340   :  { %2859 = vrot.lane.b32.xlu0 %v2849_v51, %s3539_s2  ;;  %2861 = vrot.lane.b32.xlu1 %v2850_v23, %s3539_s2  ;;  %v2339_v51 = vadd.f32 %v5471_v31, %v5385_v7  ;;  %v2362_v7 = vadd.f32 %v5478_v8, %v5395_v43 }
 0x341   :  { %v5523_v63 = vadd.f32 %v2503_v17, %v2414_v36  ;;  %v5528_v15 = vadd.f32 %v2504_v25, %v2415_v33  ;;  %v2899_v36 = vmul.f32 %v2898_v57, %v5457_v9  ;;  %v2900_v33 = vmul.f32 %v2898_v57, %v5462_v3 }
 0x342   :  { %v2407_v21 = vpop.permute.xlu0 %2406  ;;  %v2409_v10 = vpop.permute.xlu1 %2408  ;;  %v2515_v25 = vmul.f32 %v2512_v45, %v5276_v0  ;;  %v2365_v45 = vadd.f32 %v5489_v34, %v5415_v55  ;;  %v2388_v55 = vadd.f32 %v5494_v12, %v5424_v1 }
 0x343   :  { %v2416_v18 = vadd.f32 %v2407_v21, %v2312_v24  ;;  %v2417_v32 = vadd.f32 %v2409_v10, %v2313_v20  ;;  %v2522_v24 = vstv %s5534_s25  ;;  %v2363_v20 = vadd.f32 %v5481_v16, %v5400_v2 }
 0x344   :  { %2881 = vrot.lane.b32.xlu0 %v2873_v39, %s3539_s2  ;;  %2883 = vrot.lane.b32.xlu1 %v2874_v58, %s3539_s2  ;;  %v2901_v39 = vmul.f32 %v2898_v57, %v5469_v48  ;;  %v2523_v43 = vmul.f32 %v2522_v24, %v5264_v30  ;;  %v2364_v2 = vadd.f32 %v5486_v6, %v5410_v26  ;;  %v2532_v6 = vstv %s5568_s0 }
 0x345   :  { %v5539_v56 = vadd.f32 %v2505_v38, %v2416_v18  ;;  %v5544_v4 = vadd.f32 %v2506_v28, %v2417_v32  ;;  %v2902_v38 = vmul.f32 %v2898_v57, %v5474_v11  ;;  %v2924_v32 = vstv %s5548_s26 }
 0x346   :  { %v2429_v46 = vpop.permute.xlu0 %2428  ;;  %v2431_v29 = vpop.permute.xlu1 %2430  ;;  %v2524_v28 = vmul.f32 %v2522_v24, %v5269_v59  ;;  %v2526_v26 = vmul.f32 %v2522_v24, %v5281_v19  ;;  %v2533_v1 = vmul.f32 %v2532_v6, %v5264_v30 }
 0x347   :  { %v2440_v13 = vadd.f32 %v2429_v46, %v2336_v41  ;;  %v2441_v14 = vadd.f32 %v2431_v29, %v2337_v53  ;;  %v2925_v53 = vmul.f32 %v2924_v32, %v5457_v9 }
 0x348   :  { %2885 = vrot.lane.b32.xlu0 %v2875_v22, %s3539_s2  ;;  %2887 = vrot.lane.b32.xlu1 %v2876_v62, %s3539_s2  ;;  %v2525_v62 = vmul.f32 %v2522_v24, %v5276_v0 }
 0x349   :  { %v5556_v47 = vadd.f32 %v2513_v49, %v2440_v13  ;;  %v5561_v23 = vadd.f32 %v2514_v37, %v2441_v14  ;;  %v2926_v13 = vmul.f32 %v2924_v32, %v5462_v3  ;;  %v2389_v49 = vadd.f32 %v5497_v44, %v5429_v54 }
 0x34a   :  { %v2433_v52 = vpop.permute.xlu0 %2432  ;;  %v2435_v60 = vpop.permute.xlu1 %2434  ;;  %v2927_v37 = vmul.f32 %v2924_v32, %v5469_v48  ;;  %v2390_v54 = vadd.f32 %v5502_v40, %v5436_v61  ;;  %v2536_v61 = vmul.f32 %v2532_v6, %v5281_v19 }
 0x34b   :  { %v2442_v17 = vadd.f32 %v2433_v52, %v2338_v27  ;;  %v2443_v42 = vadd.f32 %v2435_v60, %v2339_v51  ;;  %v2950_v60 = vstv %s3440_s1 }
 0x34c   :  { %2907 = vrot.lane.b32.xlu0 %v2899_v36, %s3540_s5  ;;  %2909 = vrot.lane.b32.xlu1 %v2900_v33, %s3540_s5  ;;  %v2928_v36 = vmul.f32 %v2924_v32, %v5474_v11  ;;  %v2391_v33 = vadd.f32 %v5505_v50, %v5441_v5  ;;  %v2953_v50 = vmul.f32 %v2950_v60, %v5469_v48 }
 0x34d   :  { %v5573_v31 = vadd.f32 %v2515_v25, %v2442_v17  ;;  %v5578_v10 = vadd.f32 %v2516_v35, %v2443_v42  ;;  %v2534_v17 = vmul.f32 %v2532_v6, %v5269_v59  ;;  %v2951_v42 = vmul.f32 %v2950_v60, %v5457_v9 }
 0x34e   :  { %v2455_v21 = vpop.permute.xlu0 %2454  ;;  %v2457_v18 = vpop.permute.xlu1 %2456  ;;  %v2535_v59 = vmul.f32 %v2532_v6, %v5276_v0  ;;  %v2954_v0 = vmul.f32 %v2950_v60, %v5474_v11 }
 0x34f   :  { %v2466_v58 = vadd.f32 %v2455_v21, %v2362_v7  ;;  %v2467_v8 = vadd.f32 %v2457_v18, %v2363_v20  ;;  %v2952_v7 = vmul.f32 %v2950_v60, %v5462_v3 }
 0x350   :  { %2911 = vrot.lane.b32.xlu0 %v2901_v39, %s3540_s5  ;;  %2913 = vrot.lane.b32.xlu1 %v2902_v38, %s3540_s5 }
 0x351   :  { %v5588_v16 = vadd.f32 %v2523_v43, %v2466_v58  ;;  %v5593_v46 = vadd.f32 %v2524_v28, %v2467_v8  ;;  %v2976_v58 = vstv %s3441_s27 }
 0x352   :  { %v2459_v41 = vpop.permute.xlu0 %2458  ;;  %v2461_v22 = vpop.permute.xlu1 %2460  ;;  %v2977_v32 = vmul.f32 %v2976_v58, %v5457_v9 }
 0x353   :  { %v2468_v29 = vadd.f32 %v2459_v41, %v2364_v2  ;;  %v2469_v57 = vadd.f32 %v2461_v22, %v2365_v45  ;;  %v2979_v2 = vmul.f32 %v2976_v58, %v5469_v48  ;;  %v5654_v45 = vld [vmem:[#allocation2 + $0x4c] sm:$0xff]  ;;  %v3046_v22 = vstv %s3446_s28 }
 0x354   :  { %2933 = vrot.lane.b32.xlu0 %v2925_v53, %s3540_s5  ;;  %2935 = vrot.lane.b32.xlu1 %v2926_v13, %s3540_s5 }
 0x355   :  { %v5603_v34 = vadd.f32 %v2525_v62, %v2468_v29  ;;  %v5608_v27 = vadd.f32 %v2526_v26, %v2469_v57  ;;  %v5660_v29 = vld [vmem:[#allocation2 + $0x54] sm:$0xff]  ;;  %v3047_v62 = vmul.f32 %v3046_v22, %v5654_v45  ;;  %v5668_v57 = vld [vmem:[#allocation2 + $0xac] sm:$0xff] }
 0x356   :  { %v2481_v14 = vpop.permute.xlu0 %2480  ;;  %v2483_v51 = vpop.permute.xlu1 %2482  ;;  %v3048_v6 = vmul.f32 %v3046_v22, %v5660_v29 }
 0x357   :  { %v2492_v52 = vadd.f32 %v2481_v14, %v2388_v55  ;;  %v2493_v12 = vadd.f32 %v2483_v51, %v2389_v49  ;;  %v5674_v55 = vld [vmem:[#allocation2 + $0xb4] sm:$0xff]  ;;  %v3049_v14 = vmul.f32 %v3046_v22, %v5668_v57 }
 0x358   :  { %2937 = vrot.lane.b32.xlu0 %v2927_v37, %s3540_s5  ;;  %2939 = vrot.lane.b32.xlu1 %v2928_v36, %s3540_s5 }
 0x359   :  { %v5617_v44 = vadd.f32 %v2533_v1, %v2492_v52  ;;  %v5622_v35 = vadd.f32 %v2534_v17, %v2493_v12  ;;  %v3072_v52 = vstv %s3447_s29 }
 0x35a   :  { %v2485_v25 = vpop.permute.xlu0 %2484  ;;  %v2487_v30 = vpop.permute.xlu1 %2486  ;;  %v3073_v60 = vmul.f32 %v3072_v52, %v5654_v45 }
 0x35b   :  { %v2494_v24 = vadd.f32 %v2485_v25, %v2390_v54  ;;  %v2495_v20 = vadd.f32 %v2487_v30, %v2391_v33  ;;  %v3075_v54 = vmul.f32 %v3072_v52, %v5668_v57 }
 0x35c   :  { %2959 = vrot.lane.b32.xlu0 %v2951_v42, %s3540_s5  ;;  %2961 = vrot.lane.b32.xlu1 %v2952_v7, %s3540_s5  ;;  %v3098_v42 = vstv %s3448_s30 }
 0x35d   :  { %v5629_v40 = vadd.f32 %v2535_v59, %v2494_v24  ;;  %v5632_v21 = vadd.f32 %v2536_v61, %v2495_v20  ;;  %v3099_v24 = vmul.f32 %v3098_v42, %v5654_v45 }
 0x35e   :  { %v2552_v5 = vpop.permute.xlu0 %2551  ;;  %v2554_v39 = vpop.permute.xlu1 %2553 }
 0x35f   :  { %v5635_v18 = vadd.f32 %v2552_v5, %v5523_v63  ;;  %v5639_v38 = vadd.f32 %v2554_v39, %v5528_v15  ;;  %v2978_v63 = vmul.f32 %v2976_v58, %v5462_v3  ;;  %v3101_v5 = vmul.f32 %v3098_v42, %v5668_v57 }
 0x360   :  { %2963 = vrot.lane.b32.xlu0 %v2953_v50, %s3540_s5  ;;  %2965 = vrot.lane.b32.xlu1 %v2954_v0, %s3540_s5  ;;  %v3124_v0 = vstv %s3449_s6 }
 0x362   :  { %v2556_v19 = vpop.permute.xlu0 %2555  ;;  %v2558_v43 = vpop.permute.xlu1 %2557 }
 0x363   :  { %v5645_v8 = vadd.f32 %v2556_v19, %v5539_v56  ;;  %v5649_v28 = vadd.f32 %v2558_v43, %v5544_v4  ;;  %v2980_v56 = vmul.f32 %v2976_v58, %v5474_v11 }
 0x364   :  { %2985 = vrot.lane.b32.xlu0 %v2977_v32, %s3540_s5  ;;  %2987 = vrot.lane.b32.xlu1 %v2978_v63, %s3540_s5  ;;  %v3125_v63 = vmul.f32 %v3124_v0, %v5654_v45 }
 0x366   :  { %v2578_v15 = vpop.permute.xlu0 %2577  ;;  %v2580_v41 = vpop.permute.xlu1 %2579 }
 0x367   :  { %v5657_v53 = vadd.f32 %v2578_v15, %v5556_v47  ;;  %v5663_v4 = vadd.f32 %v2580_v41, %v5561_v23  ;;  %v3126_v41 = vmul.f32 %v3124_v0, %v5660_v29 }
 0x368   :  { %2989 = vrot.lane.b32.xlu0 %v2979_v2, %s3540_s5  ;;  %2991 = vrot.lane.b32.xlu1 %v2980_v56, %s3540_s5 }
 0x36a   :  { %v2582_v13 = vpop.permute.xlu0 %2581  ;;  %v2584_v47 = vpop.permute.xlu1 %2583 }
 0x36b   :  { %v5671_v26 = vadd.f32 %v2582_v13, %v5573_v31  ;;  %v5677_v23 = vadd.f32 %v2584_v47, %v5578_v10  ;;  %v3050_v31 = vmul.f32 %v3046_v22, %v5674_v55  ;;  %v2764_v13 = vstv %s3431_s7 }
 0x36c   :  { %3055 = vrot.lane.b32.xlu0 %v3047_v62, %s3539_s2  ;;  %3057 = vrot.lane.b32.xlu1 %v3048_v6, %s3539_s2  ;;  %v3127_v6 = vmul.f32 %v3124_v0, %v5668_v57 }
 0x36e   :  { %v2604_v49 = vpop.permute.xlu0 %2603  ;;  %v2606_v37 = vpop.permute.xlu1 %2605 }
 0x36f   :  { %v5683_v51 = vadd.f32 %v2604_v49, %v5588_v16  ;;  %v5687_v36 = vadd.f32 %v2606_v37, %v5593_v46  ;;  %v3074_v16 = vmul.f32 %v3072_v52, %v5660_v29  ;;  %v3150_v37 = vstv %s3450_s8 }
 0x370   :  { %3059 = vrot.lane.b32.xlu0 %v3049_v14, %s3539_s2  ;;  %3061 = vrot.lane.b32.xlu1 %v3050_v31, %s3539_s2  ;;  %v2765_v31 = vmul.f32 %v2764_v13, %v5457_v9 }
 0x372   :  { %v2608_v10 = vpop.permute.xlu0 %2607  ;;  %v2610_v1 = vpop.permute.xlu1 %2609 }
 0x373   :  { %v5693_v12 = vadd.f32 %v2608_v10, %v5603_v34  ;;  %v5697_v17 = vadd.f32 %v2610_v1, %v5608_v27  ;;  %v3076_v34 = vmul.f32 %v3072_v52, %v5674_v55  ;;  %v2766_v10 = vmul.f32 %v2764_v13, %v5462_v3 }
 0x374   :  { %3081 = vrot.lane.b32.xlu0 %v3073_v60, %s3539_s2  ;;  %3083 = vrot.lane.b32.xlu1 %v3074_v16, %s3539_s2  ;;  %v3151_v16 = vmul.f32 %v3150_v37, %v5654_v45 }
 0x376   :  { %v2630_v46 = vpop.permute.xlu0 %2629  ;;  %v2632_v33 = vpop.permute.xlu1 %2631 }
 0x377   :  { %v5703_v25 = vadd.f32 %v2630_v46, %v5617_v44  ;;  %v5707_v30 = vadd.f32 %v2632_v33, %v5622_v35  ;;  %v3100_v44 = vmul.f32 %v3098_v42, %v5660_v29  ;;  %v2754_v35 = vstv %s3430_s4 }
 0x378   :  { %3085 = vrot.lane.b32.xlu0 %v3075_v54, %s3539_s2  ;;  %3087 = vrot.lane.b32.xlu1 %v3076_v34, %s3539_s2  ;;  %v2755_v58 = vmul.f32 %v2754_v35, %v5457_v9  ;;  %v2756_v19 = vmul.f32 %v2754_v35, %v5462_v3  ;;  %v2758_v22 = vmul.f32 %v2754_v35, %v5474_v11 }
 0x379   :  { %v3152_v33 = vmul.f32 %v3150_v37, %v5660_v29 }
 0x37a   :  { %v2634_v27 = vpop.permute.xlu0 %2633  ;;  %v2636_v7 = vpop.permute.xlu1 %2635 }
 0x37b   :  { %v5713_v59 = vadd.f32 %v2634_v27, %v5629_v40  ;;  %v5717_v20 = vadd.f32 %v2636_v7, %v5632_v21  ;;  %v3102_v40 = vmul.f32 %v3098_v42, %v5674_v55  ;;  %v2768_v42 = vmul.f32 %v2764_v13, %v5474_v11 }
 0x37c   :  { %3107 = vrot.lane.b32.xlu0 %v3099_v24, %s3539_s2  ;;  %3109 = vrot.lane.b32.xlu1 %v3100_v44, %s3539_s2  ;;  %v2774_v27 = vstv %s3432_s9  ;;  %v3153_v44 = vmul.f32 %v3150_v37, %v5668_v57 }
 0x37e   :  { %v2656_v61 = vpop.permute.xlu0 %2655  ;;  %v2658_v50 = vpop.permute.xlu1 %2657 }
 0x37f   :  { %v2667_v39 = vadd.f32 %v2656_v61, %v5635_v18  ;;  %v2668_v21 = vadd.f32 %v2658_v50, %v5639_v38  ;;  %v2757_v38 = vmul.f32 %v2754_v35, %v5469_v48  ;;  %v2775_v50 = vmul.f32 %v2774_v27, %v5457_v9 }
 0x380   :  { %3111 = vrot.lane.b32.xlu0 %v3101_v5, %s3539_s2  ;;  %3113 = vrot.lane.b32.xlu1 %v3102_v40, %s3539_s2  ;;  %v3176_v5 = vstv %s3451_s10  ;;  %v2776_v40 = vmul.f32 %v2774_v27, %v5462_v3 }
 0x381   :  { %v5729_v32 = vadd.f32 %v2755_v58, %v2667_v39  ;;  %v5732_v18 = vadd.f32 %v2756_v19, %v2668_v21  ;;  %v3177_v21 = vmul.f32 %v3176_v5, %v5654_v45 }
 0x382   :  { %v2660_v43 = vpop.permute.xlu0 %2659  ;;  %v2662_v15 = vpop.permute.xlu1 %2661 }
 0x383   :  { %v2669_v2 = vadd.f32 %v2660_v43, %v5645_v8  ;;  %v2670_v56 = vadd.f32 %v2662_v15, %v5649_v28  ;;  %v3128_v28 = vmul.f32 %v3124_v0, %v5674_v55 }
 0x384   :  { %3133 = vrot.lane.b32.xlu0 %v3125_v63, %s3539_s2  ;;  %3135 = vrot.lane.b32.xlu1 %v3126_v41, %s3539_s2  ;;  %v3178_v63 = vmul.f32 %v3176_v5, %v5660_v29 }
 0x385   :  { %v5741_v62 = vadd.f32 %v2757_v38, %v2669_v2  ;;  %v5744_v8 = vadd.f32 %v2758_v22, %v2670_v56  ;;  %v2778_v2 = vmul.f32 %v2774_v27, %v5474_v11  ;;  %v3179_v22 = vmul.f32 %v3176_v5, %v5668_v57 }
 0x386   :  { %v2682_v47 = vpop.permute.xlu0 %2681  ;;  %v2684_v49 = vpop.permute.xlu1 %2683 }
 0x387   :  { %v2693_v14 = vadd.f32 %v2682_v47, %v5657_v53  ;;  %v2694_v52 = vadd.f32 %v2684_v49, %v5663_v4  ;;  %v2767_v4 = vmul.f32 %v2764_v13, %v5469_v48  ;;  %v3202_v49 = vstv %s3452_s11 }
 0x388   :  { %3137 = vrot.lane.b32.xlu0 %v3127_v6, %s3539_s2  ;;  %3139 = vrot.lane.b32.xlu1 %v3128_v28, %s3539_s2  ;;  %s3433_s2 = sld [smem:[#allocation8 + $0x8a]]  ;;  %v3180_v6 = vmul.f32 %v3176_v5, %v5674_v55 }
 0x389   :  { %v5753_v60 = vadd.f32 %v2765_v31, %v2693_v14  ;;  %v5756_v53 = vadd.f32 %v2766_v10, %v2694_v52  ;;  %v3203_v52 = vmul.f32 %v3202_v49, %v5654_v45 }
 0x38a   :  { %v2686_v1 = vpop.permute.xlu0 %2685  ;;  %v2688_v46 = vpop.permute.xlu1 %2687 }
 0x38b   :  { %v2695_v54 = vadd.f32 %v2686_v1, %v5671_v26  ;;  %v2696_v34 = vadd.f32 %v2688_v46, %v5677_v23  ;;  %v3154_v23 = vmul.f32 %v3150_v37, %v5674_v55 }
 0x38c   :  { %3159 = vrot.lane.b32.xlu0 %v3151_v16, %s3540_s5  ;;  %3161 = vrot.lane.b32.xlu1 %v3152_v33, %s3540_s5  ;;  %v3204_v16 = vmul.f32 %v3202_v49, %v5660_v29  ;;  %v3205_v33 = vmul.f32 %v3202_v49, %v5668_v57 }
 0x38d   :  { %v5765_v24 = vadd.f32 %v2767_v4, %v2695_v54  ;;  %v5768_v26 = vadd.f32 %v2768_v42, %v2696_v34  ;;  %v3206_v42 = vmul.f32 %v3202_v49, %v5674_v55 }
 0x38e   :  { %v2708_v7 = vpop.permute.xlu0 %2707  ;;  %v2710_v35 = vpop.permute.xlu1 %2709  ;;  %v2784_v41 = vstv %s3433_s2 }
 0x38f   :  { %v2719_v61 = vadd.f32 %v2708_v7, %v5683_v51  ;;  %v2720_v39 = vadd.f32 %v2710_v35, %v5687_v36  ;;  %v2777_v36 = vmul.f32 %v2774_v27, %v5469_v48  ;;  %v2786_v28 = vmul.f32 %v2784_v41, %v5462_v3 }
 0x390   :  { %3163 = vrot.lane.b32.xlu0 %v3153_v44, %s3540_s5  ;;  %3165 = vrot.lane.b32.xlu1 %v3154_v23, %s3540_s5  ;;  %v2788_v3 = vmul.f32 %v2784_v41, %v5474_v11  ;;  %v3228_v27 = vstv %s3453_s12 }
 0x391   :  { %v5777_v0 = vadd.f32 %v2775_v50, %v2719_v61  ;;  %v5780_v51 = vadd.f32 %v2776_v40, %v2720_v39  ;;  %v3230_v35 = vmul.f32 %v3228_v27, %v5660_v29  ;;  %v3232_v50 = vmul.f32 %v3228_v27, %v5674_v55 }
 0x392   :  { %v2712_v58 = vpop.permute.xlu0 %2711  ;;  %v2714_v19 = vpop.permute.xlu1 %2713 }
 0x393   :  { %v2721_v43 = vadd.f32 %v2712_v58, %v5693_v12  ;;  %v2722_v15 = vadd.f32 %v2714_v19, %v5697_v17  ;;  %v2785_v17 = vmul.f32 %v2784_v41, %v5457_v9  ;;  %v2787_v9 = vmul.f32 %v2784_v41, %v5469_v48 }
 0x394   :  { %3185 = vrot.lane.b32.xlu0 %v3177_v21, %s3540_s5  ;;  %3187 = vrot.lane.b32.xlu1 %v3178_v63, %s3540_s5 }
 0x395   :  { %v5789_v38 = vadd.f32 %v2777_v36, %v2721_v43  ;;  %v2782_v13 = vadd.f32 %v2778_v2, %v2722_v15 }
 0x396   :  { %v2734_v56 = vpop.permute.xlu0 %2733  ;;  %v2736_v12 = vpop.permute.xlu1 %2735 }
 0x397   :  { %v2745_v47 = vadd.f32 %v2734_v56, %v5703_v25  ;;  %v2746_v14 = vadd.f32 %v2736_v12, %v5707_v30 }
 0x398   :  { %3189 = vrot.lane.b32.xlu0 %v3179_v22, %s3540_s5  ;;  %3191 = vrot.lane.b32.xlu1 %v3180_v6, %s3540_s5 }
 0x399   :  { %v2789_v37 = vadd.f32 %v2785_v17, %v2745_v47  ;;  %v2790_v10 = vadd.f32 %v2786_v28, %v2746_v14 }
 0x39a   :  { %v2738_v31 = vpop.permute.xlu0 %2737  ;;  %v2740_v25 = vpop.permute.xlu1 %2739 }
 0x39b   :  { %v2747_v1 = vadd.f32 %v2738_v31, %v5713_v59  ;;  %v2748_v30 = vadd.f32 %v2740_v25, %v5717_v20  ;;  %v3229_v20 = vmul.f32 %v3228_v27, %v5654_v45 }
 0x39c   :  { %3211 = vrot.lane.b32.xlu0 %v3203_v52, %s3540_s5  ;;  %3213 = vrot.lane.b32.xlu1 %v3204_v16, %s3540_s5 }
 0x39d   :  { %v2791_v46 = vadd.f32 %v2787_v9, %v2747_v1  ;;  %v2792_v4 = vadd.f32 %v2788_v3, %v2748_v30 }
 0x39e   :  { %v2804_v54 = vpop.permute.xlu0 %2803  ;;  %v2806_v34 = vpop.permute.xlu1 %2805 }
 0x39f   :  { %v2815_v59 = vadd.f32 %v2804_v54, %v5729_v32  ;;  %v2816_v48 = vadd.f32 %v2806_v34, %v5732_v18  ;;  %v3231_v18 = vmul.f32 %v3228_v27, %v5668_v57 }
 0x3a0   :  { %3215 = vrot.lane.b32.xlu0 %v3205_v33, %s3540_s5  ;;  %3217 = vrot.lane.b32.xlu1 %v3206_v42, %s3540_s5 }
 0x3a2   :  { %v2808_v11 = vpop.permute.xlu0 %2807  ;;  %v2810_v7 = vpop.permute.xlu1 %2809 }
 0x3a3   :  { %v2817_v44 = vadd.f32 %v2808_v11, %v5741_v62  ;;  %v2818_v61 = vadd.f32 %v2810_v7, %v5744_v8 }
 0x3a4   :  { %3237 = vrot.lane.b32.xlu0 %v3229_v20, %s3540_s5  ;;  %3239 = vrot.lane.b32.xlu1 %v3230_v35, %s3540_s5  ;;  %v3026_v35 = vstv %s3444_s14 }
 0x3a6   :  { %v2830_v32 = vpop.permute.xlu0 %2829  ;;  %v2832_v23 = vpop.permute.xlu1 %2831 }
 0x3a7   :  { %v2841_v5 = vadd.f32 %v2830_v32, %v5753_v60  ;;  %v2842_v39 = vadd.f32 %v2832_v23, %v5756_v53 }
 0x3a8   :  { %3241 = vrot.lane.b32.xlu0 %v3231_v18, %s3540_s5  ;;  %3243 = vrot.lane.b32.xlu1 %v3232_v50, %s3540_s5  ;;  %s3443_s5 = sld [smem:[#allocation8 + $0x45]]  ;;  %v3027_v50 = vmul.f32 %v3026_v35, %v5654_v45 }
 0x3aa   :  { %v2834_v62 = vpop.permute.xlu0 %2833  ;;  %v2836_v8 = vpop.permute.xlu1 %2835 }
 0x3ab   :  { %v2843_v40 = vadd.f32 %v2834_v62, %v5765_v24  ;;  %v2844_v58 = vadd.f32 %v2836_v8, %v5768_v26  ;;  %v3028_v62 = vmul.f32 %v3026_v35, %v5660_v29 }
 0x3ae   :  { %v2856_v21 = vpop.permute.xlu0 %2855  ;;  %v2858_v19 = vpop.permute.xlu1 %2857  ;;  %v3016_v16 = vstv %s3443_s5 }
 0x3af   :  { %v2867_v43 = vadd.f32 %v2856_v21, %v5777_v0  ;;  %v2868_v60 = vadd.f32 %v2858_v19, %v5780_v51  ;;  %v3006_v0 = vstv %s3442_s13  ;;  %v3017_v33 = vmul.f32 %v3016_v16, %v5654_v45 }
 0x3b0   :  { %v3008_v17 = vmul.f32 %v3006_v0, %v5660_v29  ;;  %v3010_v1 = vmul.f32 %v3006_v0, %v5674_v55  ;;  %v3018_v34 = vmul.f32 %v3016_v16, %v5660_v29  ;;  %v3019_v20 = vmul.f32 %v3016_v16, %v5668_v57 }
 0x3b2   :  { %v2860_v63 = vpop.permute.xlu0 %2859  ;;  %v2862_v36 = vpop.permute.xlu1 %2861 }
 0x3b3   :  { %v2869_v53 = vadd.f32 %v2860_v63, %v5789_v38  ;;  %v2870_v15 = vadd.f32 %v2862_v36, %v2782_v13  ;;  %v3007_v38 = vmul.f32 %v3006_v0, %v5654_v45  ;;  %v3029_v63 = vmul.f32 %v3026_v35, %v5668_v57 }
 0x3b6   :  { %v2882_v2 = vpop.permute.xlu0 %2881  ;;  %v2884_v41 = vpop.permute.xlu1 %2883 }
 0x3b7   :  { %v5830_v56 = vadd.f32 %v2882_v2, %v2789_v37  ;;  %v5832_v22 = vadd.f32 %v2884_v41, %v2790_v10  ;;  %v3009_v10 = vmul.f32 %v3006_v0, %v5668_v57  ;;  %v3030_v2 = vmul.f32 %v3026_v35, %v5674_v55 }
 0x3b8   :  { %v3036_v41 = vstv %s3445_s17 }
 0x3ba   :  { %v2886_v24 = vpop.permute.xlu0 %2885  ;;  %v2888_v26 = vpop.permute.xlu1 %2887 }
 0x3bb   :  { %v5834_v12 = vadd.f32 %v2886_v24, %v2791_v46  ;;  %v5836_v47 = vadd.f32 %v2888_v26, %v2792_v4 }
 0x3be   :  { %v2908_v51 = vpop.permute.xlu0 %2907  ;;  %v2910_v6 = vpop.permute.xlu1 %2909 }
 0x3bf   :  { %v2919_v49 = vadd.f32 %v2908_v51, %v2815_v59  ;;  %v2920_v13 = vadd.f32 %v2910_v6, %v2816_v48  ;;  %v3037_v51 = vmul.f32 %v3036_v41, %v5654_v45 }
 0x3c1   :  { %v5840_v14 = vadd.f32 %v3007_v38, %v2919_v49  ;;  %v5842_v37 = vadd.f32 %v3008_v17, %v2920_v13 }
 0x3c2   :  { %v2912_v28 = vpop.permute.xlu0 %2911  ;;  %v2914_v31 = vpop.permute.xlu1 %2913 }
 0x3c3   :  { %v2921_v52 = vadd.f32 %v2912_v28, %v2817_v44  ;;  %v2922_v25 = vadd.f32 %v2914_v31, %v2818_v61  ;;  %v3020_v44 = vmul.f32 %v3016_v16, %v5674_v55  ;;  %v3039_v28 = vmul.f32 %v3036_v41, %v5668_v57 }
 0x3c5   :  { %v5846_v9 = vadd.f32 %v3009_v10, %v2921_v52  ;;  %v5848_v3 = vadd.f32 %v3010_v1, %v2922_v25 }
 0x3c6   :  { %v2934_v30 = vpop.permute.xlu0 %2933  ;;  %v2936_v46 = vpop.permute.xlu1 %2935 }
 0x3c7   :  { %v2945_v54 = vadd.f32 %v2934_v30, %v2841_v5  ;;  %v2946_v4 = vadd.f32 %v2936_v46, %v2842_v39 }
 0x3c9   :  { %v5852_v59 = vadd.f32 %v3017_v33, %v2945_v54  ;;  %v5854_v27 = vadd.f32 %v3018_v34, %v2946_v4 }
 0x3ca   :  { %v2938_v42 = vpop.permute.xlu0 %2937  ;;  %v2940_v48 = vpop.permute.xlu1 %2939 }
 0x3cb   :  { %v2947_v11 = vadd.f32 %v2938_v42, %v2843_v40  ;;  %v2948_v7 = vadd.f32 %v2940_v48, %v2844_v58 }
 0x3cd   :  { %v5858_v61 = vadd.f32 %v3019_v20, %v2947_v11  ;;  %v5860_v18 = vadd.f32 %v3020_v44, %v2948_v7 }
 0x3ce   :  { %v2960_v32 = vpop.permute.xlu0 %2959  ;;  %v2962_v23 = vpop.permute.xlu1 %2961 }
 0x3cf   :  { %v2971_v5 = vadd.f32 %v2960_v32, %v2867_v43  ;;  %v2972_v39 = vadd.f32 %v2962_v23, %v2868_v60 }
 0x3d1   :  { %v5864_v8 = vadd.f32 %v3027_v50, %v2971_v5  ;;  %v5866_v58 = vadd.f32 %v3028_v62, %v2972_v39 }
 0x3d2   :  { %v2964_v40 = vpop.permute.xlu0 %2963  ;;  %v2966_v21 = vpop.permute.xlu1 %2965 }
 0x3d3   :  { %v2973_v19 = vadd.f32 %v2964_v40, %v2869_v53  ;;  %v2974_v36 = vadd.f32 %v2966_v21, %v2870_v15  ;;  %v3038_v53 = vmul.f32 %v3036_v41, %v5660_v29 }
 0x3d5   :  { %v5870_v24 = vadd.f32 %v3029_v63, %v2973_v19  ;;  %v5872_v26 = vadd.f32 %v3030_v2, %v2974_v36 }
 0x3d6   :  { %v2986_v43 = vpop.permute.xlu0 %2985  ;;  %v2988_v60 = vpop.permute.xlu1 %2987 }
 0x3d7   :  { %v2997_v0 = vadd.f32 %v2986_v43, %v5830_v56  ;;  %v2998_v6 = vadd.f32 %v2988_v60, %v5832_v22  ;;  %v3040_v56 = vmul.f32 %v3036_v41, %v5674_v55 }
 0x3d9   :  { %v5878_v49 = vadd.f32 %v3037_v51, %v2997_v0  ;;  %v5880_v38 = vadd.f32 %v3038_v53, %v2998_v6 }
 0x3da   :  { %v2990_v15 = vpop.permute.xlu0 %2989  ;;  %v2992_v13 = vpop.permute.xlu1 %2991 }
 0x3db   :  { %v2999_v17 = vadd.f32 %v2990_v15, %v5834_v12  ;;  %v3000_v31 = vadd.f32 %v2992_v13, %v5836_v47 }
 0x3dd   :  { %v5886_v52 = vadd.f32 %v3039_v28, %v2999_v17  ;;  %v5888_v22 = vadd.f32 %v3040_v56, %v3000_v31 }
 0x3de   :  { %v3056_v45 = vpop.permute.xlu0 %3055  ;;  %v3058_v29 = vpop.permute.xlu1 %3057 }
 0x3df   :  { %v3067_v42 = vadd.f32 %v3056_v45, %v5840_v14  ;;  %v3068_v48 = vadd.f32 %v3058_v29, %v5842_v37 }
 0x3e2   :  { %v3060_v10 = vpop.permute.xlu0 %3059  ;;  %v3062_v25 = vpop.permute.xlu1 %3061 }
 0x3e3   :  { %v3069_v35 = vadd.f32 %v3060_v10, %v5846_v9  ;;  %v3070_v23 = vadd.f32 %v3062_v25, %v5848_v3 }
 0x3e6   :  { %v3082_v1 = vpop.permute.xlu0 %3081  ;;  %v3084_v16 = vpop.permute.xlu1 %3083 }
 0x3e7   :  { %v3093_v37 = vadd.f32 %v3082_v1, %v5852_v59  ;;  %v3094_v21 = vadd.f32 %v3084_v16, %v5854_v27 }
 0x3ea   :  { %v3086_v30 = vpop.permute.xlu0 %3085  ;;  %v3088_v46 = vpop.permute.xlu1 %3087 }
 0x3eb   :  { %v3095_v2 = vadd.f32 %v3086_v30, %v5858_v61  ;;  %v3096_v43 = vadd.f32 %v3088_v46, %v5860_v18 }
 0x3ee   :  { %v3108_v54 = vpop.permute.xlu0 %3107  ;;  %v3110_v12 = vpop.permute.xlu1 %3109 }
 0x3ef   :  { %v3119_v6 = vadd.f32 %v3108_v54, %v5864_v8  ;;  %v3120_v15 = vadd.f32 %v3110_v12, %v5866_v58 }
 0x3f2   :  { %v3112_v33 = vpop.permute.xlu0 %3111  ;;  %v3114_v57 = vpop.permute.xlu1 %3113 }
 0x3f3   :  { %v3121_v31 = vadd.f32 %v3112_v33, %v5870_v24  ;;  %v3122_v45 = vadd.f32 %v3114_v57, %v5872_v26 }
 0x3f6   :  { %v3134_v4 = vpop.permute.xlu0 %3133  ;;  %v3136_v47 = vpop.permute.xlu1 %3135 }
 0x3f7   :  { %v3145_v1 = vadd.f32 %v3134_v4, %v5878_v49  ;;  %v3146_v30 = vadd.f32 %v3136_v47, %v5880_v38 }
 0x3fa   :  { %v5890_v34 = vpop.permute.xlu0 %3137  ;;  %v5892_v55 = vpop.permute.xlu1 %3139 }
 0x3fb   :  { %v3147_v33 = vadd.f32 %v5890_v34, %v5886_v52 }
 0x3fe   :  { %v3160_v11 = vpop.permute.xlu0 %3159  ;;  %v3162_v20 = vpop.permute.xlu1 %3161 }
 0x3ff   :  { %v3171_v7 = vadd.f32 %v3160_v11, %v3067_v42  ;;  %v3172_v44 = vadd.f32 %v3162_v20, %v3068_v48  ;;  %v3148_v42 = vadd.f32 %v5892_v55, %v5888_v22 }
 0x401   :  { %v3253_v32 = vmax.f32 %v3171_v7, 0.0  ;;  %v3254_v5 = vmax.f32 %v3172_v44, 0.0 }
 0x402   :  { %v3164_v50 = vpop.permute.xlu0 %3163  ;;  %v3166_v39 = vpop.permute.xlu1 %3165 }
 0x403   :  { %3258 = vst.msk [vmem:[#allocation10] sm:$0xff] %vm3257_vm6, %v3253_v32  ;;  %v3173_v62 = vadd.f32 %v3164_v50, %v3069_v35  ;;  %3259 = vst.msk [vmem:[#allocation10 + $0x8] sm:$0xff] %vm3257_vm6, %v3254_v5  ;;  %v3174_v14 = vadd.f32 %v3166_v39, %v3070_v23 }
 0x405   :  { %v3255_v40 = vmax.f32 %v3173_v62, 0.0  ;;  %v3256_v19 = vmax.f32 %v3174_v14, 0.0 }
 0x406   :  { %v3186_v63 = vpop.permute.xlu0 %3185  ;;  %v3188_v9 = vpop.permute.xlu1 %3187 }
 0x407   :  { %3260 = vst.msk [vmem:[#allocation10 + $0x40] sm:$0xff] %vm3257_vm6, %v3255_v40  ;;  %v3197_v3 = vadd.f32 %v3186_v63, %v3093_v37  ;;  %3261 = vst.msk [vmem:[#allocation10 + $0x48] sm:$0xff] %vm3257_vm6, %v3256_v19  ;;  %v3198_v36 = vadd.f32 %v3188_v9, %v3094_v21 }
 0x409   :  { %v3262_v41 = vmax.f32 %v3197_v3, 0.0  ;;  %v3263_v60 = vmax.f32 %v3198_v36, 0.0 }
 0x40a   :  { %v3190_v0 = vpop.permute.xlu0 %3189  ;;  %v3192_v59 = vpop.permute.xlu1 %3191 }
 0x40b   :  { %3267 = vst.msk [vmem:[#allocation10 + $0x10] sm:$0xff] %vm3257_vm6, %v3262_v41  ;;  %v3199_v27 = vadd.f32 %v3190_v0, %v3095_v2  ;;  %3268 = vst.msk [vmem:[#allocation10 + $0x18] sm:$0xff] %vm3257_vm6, %v3263_v60  ;;  %v3200_v51 = vadd.f32 %v3192_v59, %v3096_v43 }
 0x40d   :  { %v3264_v53 = vmax.f32 %v3199_v27, 0.0  ;;  %v3265_v13 = vmax.f32 %v3200_v51, 0.0 }
 0x40e   :  { %v3212_v17 = vpop.permute.xlu0 %3211  ;;  %v3214_v61 = vpop.permute.xlu1 %3213 }
 0x40f   :  { %3269 = vst.msk [vmem:[#allocation10 + $0x50] sm:$0xff] %vm3257_vm6, %v3264_v53  ;;  %v3223_v18 = vadd.f32 %v3212_v17, %v3119_v6  ;;  %3270 = vst.msk [vmem:[#allocation10 + $0x58] sm:$0xff] %vm3257_vm6, %v3265_v13  ;;  %v3224_v28 = vadd.f32 %v3214_v61, %v3120_v15 }
 0x411   :  { %v3271_v56 = vmax.f32 %v3223_v18, 0.0  ;;  %v3272_v29 = vmax.f32 %v3224_v28, 0.0 }
 0x412   :  { %v3216_v10 = vpop.permute.xlu0 %3215  ;;  %v3218_v8 = vpop.permute.xlu1 %3217 }
 0x413   :  { %3276 = vst.msk [vmem:[#allocation10 + $0x20] sm:$0xff] %vm3257_vm6, %v3271_v56  ;;  %v3225_v58 = vadd.f32 %v3216_v10, %v3121_v31  ;;  %3277 = vst.msk [vmem:[#allocation10 + $0x28] sm:$0xff] %vm3257_vm6, %v3272_v29  ;;  %v3226_v25 = vadd.f32 %v3218_v8, %v3122_v45 }
 0x415   :  { %v3273_v16 = vmax.f32 %v3225_v58, 0.0  ;;  %v3274_v46 = vmax.f32 %v3226_v25, 0.0 }
 0x416   :  { %v3238_v54 = vpop.permute.xlu0 %3237  ;;  %v3240_v24 = vpop.permute.xlu1 %3239 }
 0x417   :  { %3278 = vst.msk [vmem:[#allocation10 + $0x60] sm:$0xff] %vm3257_vm6, %v3273_v16  ;;  %v3249_v26 = vadd.f32 %v3238_v54, %v3145_v1  ;;  %3279 = vst.msk [vmem:[#allocation10 + $0x68] sm:$0xff] %vm3257_vm6, %v3274_v46  ;;  %v3250_v12 = vadd.f32 %v3240_v24, %v3146_v30 }
 0x419   :  { %v3280_v57 = vmax.f32 %v3249_v26, 0.0  ;;  %v3281_v49 = vmax.f32 %v3250_v12, 0.0 }
 0x41a   :  { %v3242_v4 = vpop.permute.xlu0 %3241  ;;  %v3244_v38 = vpop.permute.xlu1 %3243 }
 0x41b   :  { %3285 = vst.msk [vmem:[#allocation10 + $0x30] sm:$0xff] %vm3257_vm6, %v3280_v57  ;;  %v3251_v47 = vadd.f32 %v3242_v4, %v3147_v33  ;;  %3286 = vst.msk [vmem:[#allocation10 + $0x38] sm:$0xff] %vm3257_vm6, %v3281_v49  ;;  %v3252_v48 = vadd.f32 %v3244_v38, %v3148_v42 }
 0x41d   :  { %v3282_v11 = vmax.f32 %v3251_v47, 0.0  ;;  %v3283_v20 = vmax.f32 %v3252_v48, 0.0 }
 0x41f   :  { %3287 = vst.msk [vmem:[#allocation10 + $0x70] sm:$0xff] %vm3257_vm6, %v3282_v11  ;;  %3288 = vst.msk [vmem:[#allocation10 + $0x78] sm:$0xff] %vm3257_vm6, %v3283_v20 }
 0x420   :  { %3515 = shalt.err (!%p3512_p0)
}
 0x421   :  { %3300 = dma.vmem_to_hbm [thread:$0]  %s3295_s19, 2048, %s5937_s3, [#allocation5], %s3533_s15, %s3533_s15, %s3534_s16  }
 0x422   :  { %3530 = dma.done.wait [#allocation5], 2048  }
 0x423   :  { %3531 = vsyncadd [#allocation5], 4294965248 }
 0x424   :  { %3304 = vsyncpa [#allocation4], 1 }
 0x425   :  { %3305 = vsyncpa [#allocation5], 1 }
 0x426   :  { %3306 = vsyncpa [#allocation6], 1 }
 0x427   :  { %3307 = vsyncpa [#allocation7], 1 }

</bundles_post_ra>
